<compile_context>
chip_gen: v7x
topology: tpu7x:2x2x1
jax: 0.10.0
libtpu: 0.0.40
codegen_flags: <defaults>
</compile_context>

<pallas_src>
import functools

import jax
import jax.numpy as jnp
from jax import lax
from jax.experimental import pallas as pl
from jax.experimental.pallas import tpu as pltpu

C = 3                # in_channels (fixed by the module: Grapher(in_channels=3))
K_NEIGHBORS = 9      # ViG default kNN size
FC_OUT = 4           # nn.Linear(3, 4)
LANE = 128           # lane-dense output padding


# ----------------------- Fused kernel: CPE + Grapher + pool + fc ----------------------- #
def fused_kernel(x_ref, wmask_ref, eye_ref, bdw_ref, w1t_ref, b1_ref,
                 wab_ref, wgb_ref, bg_ref, w2t_ref, b2_ref, wfc_ref, bfc_ref,
                 o_ref, mcol_ref, *, W, N, k):
    x = x_ref[0]                                      # (C, N)

    # ---------- CPE: depthwise 3x3 conv (zero padded) + bias + residual ----------
    # wmask_ref[t] == boundary_mask_tap_t[None, :] * w_dw[:, tap_t][:, None], folded at
    # trace time, so each tap is a single FMA on the rolled block.
    cpe = x + bdw_ref[...]
    t = 0
    for dy in (-1, 0, 1):
        for dx in (-1, 0, 1):
            off = dy * W + dx                         # shifted[n] = x[(n + off) mod N]
            shifted = x if off == 0 else pltpu.roll(x, shift=(-off) % N, axis=1)
            cpe = cpe + shifted * wmask_ref[t]
            t += 1

    # ---------- Grapher fc1 (BatchNorm folded to identity) ----------
    f = jnp.dot(w1t_ref[...], cpe, preferred_element_type=jnp.float32) + b1_ref[...]   # (C, N)

    # Node-major copy of f via a trans_b MXU matmul against the constant identity
    # (single row<->column relayout; the identity is a trace-time input, DMA'd once).
    f_col = lax.dot_general(eye_ref[...], f, (((1,), (1,)), ((), ())),
                            preferred_element_type=jnp.float32)                        # (N, C)

    # Row-shifted squared distances: dmat[i, j] = |f_j|^2 - 2 <f_i, f_j>.
    # (The omitted per-row constant |f_i|^2 does not change each row's kNN ordering.)
    gram = jnp.dot(f_col, f, preferred_element_type=jnp.float32)                       # (N, N)
    sq_row = jnp.sum(f * f, axis=0, keepdims=True)                                     # (1, N)
    dmat = sq_row - 2.0 * gram

    # ---------- kNN threshold: k successive row minima (ties included), with no (N,N)
    # writeback -- thresholds are monotone, so each pass re-masks dmat in flight. ----------
    thr = jnp.min(dmat, axis=-1, keepdims=True)                                        # (N, 1)
    for _ in range(k - 1):
        thr = jnp.min(jnp.where(dmat <= thr, jnp.float32(1e30), dmat),
                      axis=-1, keepdims=True)
    nbr = dmat <= thr                                                                  # (N, N)

    # ---------- Max-relative aggregation: per-channel masked row max ----------
    for c in range(C):
        mcol_ref[:, c:c + 1] = jnp.max(
            jnp.where(nbr, f[c:c + 1, :], jnp.float32(-1e30)), axis=-1, keepdims=True)
    maxfeat_col = mcol_ref[...]                                                        # (N, C)

    # pre = Wa^T f + Wb^T (maxfeat - f) + bg == (Wa - Wb)^T f + Wb^T maxfeat + bg
    pre = (jnp.dot(wab_ref[...], f, preferred_element_type=jnp.float32)
           + lax.dot_general(wgb_ref[...], maxfeat_col, (((1,), (1,)), ((), ())),
                             preferred_element_type=jnp.float32)
           + bg_ref[...])                                                              # (2C, N)
    hg = jax.nn.gelu(pre, approximate=True)

    # fc2 (1x1 conv) + residual around the whole Grapher.
    out = jnp.dot(w2t_ref[...], hg, preferred_element_type=jnp.float32) + b2_ref[...]  # (C, N)
    y = out + cpe

    # ---------- x.mean(dim=[2,3]) (mean over nodes) + final Linear(3, 4) ----------
    pooled = jnp.mean(y, axis=1, keepdims=True)                                        # (C, 1)
    logits = jnp.sum(pooled * wfc_ref[...], axis=0, keepdims=True) + bfc_ref[...]      # (1, 128)
    o_ref[0] = logits


# -------------------------------------- Wrapper -------------------------------------- #
@jax.jit
def combined2_forward(x, params):
    B, Cin, H, W = x.shape
    assert Cin == C
    N = H * W

    # Glue (trace-time / XLA, all tiny): flat channel-major nodes per image.
    x_flat = x.reshape(B, C, N).astype(jnp.float32)                     # (B, C, N)

    # Boundary-validity masks for the 9 conv taps (zero padding), folded into the
    # depthwise weights -> (9, C, N) constant shared across the batch.
    rows = jnp.arange(N, dtype=jnp.int32) // W
    cols = jnp.arange(N, dtype=jnp.int32) % W
    tap_masks = []
    for dy in (-1, 0, 1):
        for dx in (-1, 0, 1):
            ok = ((rows + dy >= 0) & (rows + dy < H) &
                  (cols + dx >= 0) & (cols + dx < W))
            tap_masks.append(ok.astype(jnp.float32))
    mask9 = jnp.stack(tap_masks, axis=0)                                # (9, N)
    wdw9 = params["w_dw"].reshape(C, 9).astype(jnp.float32)             # (C, 9)
    wmask = mask9[:, None, :] * wdw9.T[:, :, None]                      # (9, C, N)

    # Tiny trace-time weight reshapes/transposes for the channel-major kernel layout.
    bdw = params["b_dw"].reshape(C, 1)
    w1t = params["w1"].T                                                # (C, C)
    b1c = params["b1"].reshape(C, 1)
    wab_t = (params["wg_a"] - params["wg_b"]).T                         # (2C, C)
    wgb_t = params["wg_b"].T                                            # (2C, C)
    bg_c = params["bg"].reshape(2 * C, 1)
    w2t = params["w2"].T                                                # (C, 2C)
    b2c = params["b2"].reshape(C, 1)
    wfc_pad = jnp.pad(params["wfc"], ((0, 0), (0, LANE - FC_OUT)))      # (C, 128)
    bfc_pad = jnp.pad(params["bfc"], ((0, 0), (0, LANE - FC_OUT)))      # (1, 128)
    eye_n = jnp.eye(N, dtype=jnp.float32)                               # (N, N), DMA'd once

    def cspec(a):  # grid-invariant constant operand: full block, index fixed at 0
        nd = a.ndim
        return pl.BlockSpec(a.shape, lambda b, _nd=nd: (0,) * _nd)

    consts = (wmask, eye_n, bdw, w1t, b1c, wab_t, wgb_t, bg_c, w2t, b2c,
              wfc_pad, bfc_pad)

    out = pl.pallas_call(
        functools.partial(fused_kernel, W=W, N=N, k=K_NEIGHBORS),
        grid=(B,),
        in_specs=[pl.BlockSpec((1, C, N), lambda b: (b, 0, 0))]
                 + [cspec(a) for a in consts],
        out_specs=pl.BlockSpec((1, 1, LANE), lambda b: (b, 0, 0)),
        out_shape=jax.ShapeDtypeStruct((B, 1, LANE), jnp.float32),
        scratch_shapes=[pltpu.VMEM((N, C), jnp.float32)],
        compiler_params=pltpu.CompilerParams(dimension_semantics=("parallel",)),
    )(x_flat, *consts)

    return out[:, 0, :FC_OUT]


# ----------------------------- Pure-JAX reference (check) ----------------------------- #
def ref_forward(x, params):
    B, _, H, W = x.shape
    N = H * W
    hi = lax.Precision.HIGHEST
    xpad = jnp.pad(x, ((0, 0), (0, 0), (1, 1), (1, 1)))
    conv = jnp.zeros_like(x)
    for dy in range(3):
        for dx in range(3):
            conv = conv + xpad[:, :, dy:dy + H, dx:dx + W] * \
                params["w_dw"][None, :, dy, dx, None, None]
    cpe = x + conv + params["b_dw"][None, :, None, None]
    nodes = cpe.reshape(B, C, N).transpose(0, 2, 1)

    def per_image(xin):
        f = jnp.dot(xin, params["w1"], precision=hi) + params["b1"][0]
        gram = jnp.dot(f, f.T, precision=hi)
        sq = jnp.sum(f * f, axis=-1)
        d = sq[None, :] - 2.0 * gram          # row-shifted sq. distances (same kNN order)
        work = d
        thr = None
        for i in range(K_NEIGHBORS):
            thr = work.min(-1, keepdims=True)
            if i + 1 < K_NEIGHBORS:
                work = jnp.where(work <= thr, 1e30, work)
        nbr = d <= thr
        maxfeat = jnp.max(jnp.where(nbr[:, :, None], f[None, :, :], -1e30), axis=1)
        max_rel = maxfeat - f
        pre = (jnp.dot(f, params["wg_a"], precision=hi)
               + jnp.dot(max_rel, params["wg_b"], precision=hi) + params["bg"][0])
        hg = jax.nn.gelu(pre, approximate=True)
        out = jnp.dot(hg, params["w2"], precision=hi) + params["b2"][0]
        y = out + xin
        pooled = y.mean(axis=0)
        return jnp.dot(pooled, params["wfc"], precision=hi) + params["bfc"][0]

    return jax.vmap(per_image)(nodes)


def init_params(key):
    ks = jax.random.split(key, 12)
    n = lambda k, s, sc: (sc * jax.random.normal(k, s)).astype(jnp.float32)
    return {
        "w_dw": n(ks[0], (C, 3, 3), 0.2),        # depthwise conv weight (groups=C)
        "b_dw": n(ks[1], (C,), 0.05),
        "w1":   n(ks[2], (C, C), 0.3),           # Grapher fc1 (1x1 conv)
        "b1":   n(ks[3], (1, C), 0.05),
        "wg_a": n(ks[4], (C, 2 * C), 0.3),       # MRConv weight, x-half
        "wg_b": n(ks[5], (C, 2 * C), 0.3),       # MRConv weight, max_rel-half
        "bg":   n(ks[6], (1, 2 * C), 0.05),
        "w2":   n(ks[7], (2 * C, C), 0.3),       # Grapher fc2 (1x1 conv)
        "b2":   n(ks[8], (1, C), 0.05),
        "wfc":  n(ks[9], (C, FC_OUT), 0.3),      # nn.Linear(3, 4) (transposed)
        "bfc":  n(ks[10], (1, FC_OUT), 0.05),
    }


if __name__ == "__main__":
    key = jax.random.PRNGKey(0)
    kx, kp = jax.random.split(key)
    B, H, W = 2, 16, 16
    x = jax.random.normal(kx, (B, C, H, W), jnp.float32)
    params = init_params(kp)

    out = combined2_forward(x, params)
    out = jax.block_until_ready(out)
    assert out.shape == (B, FC_OUT), out.shape

    ref = ref_forward(x, params)
    if not jnp.allclose(out, ref, atol=3e-3, rtol=3e-3):
        raise AssertionError(f"kernel vs reference mismatch:\n{out}\n{ref}")
    print("KERNEL_OK")
</pallas_src>

<mosaic_0001>
module attributes {stable_mosaic.version = 11 : i64} {
  func.func @fused_kernel(%arg0: i32, %arg1: memref<1x3x256xf32, #tpu.memory_space<vmem>>, %arg2: memref<9x3x256xf32, #tpu.memory_space<vmem>>, %arg3: memref<256x256xf32, #tpu.memory_space<vmem>>, %arg4: memref<3x1xf32, #tpu.memory_space<vmem>>, %arg5: memref<3x3xf32, #tpu.memory_space<vmem>>, %arg6: memref<3x1xf32, #tpu.memory_space<vmem>>, %arg7: memref<6x3xf32, #tpu.memory_space<vmem>>, %arg8: memref<6x3xf32, #tpu.memory_space<vmem>>, %arg9: memref<6x1xf32, #tpu.memory_space<vmem>>, %arg10: memref<3x6xf32, #tpu.memory_space<vmem>>, %arg11: memref<3x1xf32, #tpu.memory_space<vmem>>, %arg12: memref<3x128xf32, #tpu.memory_space<vmem>>, %arg13: memref<1x128xf32, #tpu.memory_space<vmem>>, %arg14: memref<1x1x128xf32, #tpu.memory_space<vmem>>, %arg15: memref<256x3xf32, #tpu.memory_space<vmem>>) attributes {dimension_semantics = [#tpu.dimension_semantics<parallel>], iteration_bounds = array<i64: 2>, scalar_prefetch = 0 : i64, scratch_operands = 1 : i64, tpu.core_type = #tpu.core_type<tc>, window_params = [{transform_indices = @transform_0, window_bounds = array<i64: 1, 3, 256>}, {pipeline_mode = #tpu.pipeline_mode<synchronous>, transform_indices = @transform_1, window_bounds = array<i64: 9, 3, 256>}, {pipeline_mode = #tpu.pipeline_mode<synchronous>, transform_indices = @transform_2, window_bounds = array<i64: 256, 256>}, {pipeline_mode = #tpu.pipeline_mode<synchronous>, transform_indices = @transform_3, window_bounds = array<i64: 3, 1>}, {pipeline_mode = #tpu.pipeline_mode<synchronous>, transform_indices = @transform_4, window_bounds = array<i64: 3, 3>}, {pipeline_mode = #tpu.pipeline_mode<synchronous>, transform_indices = @transform_5, window_bounds = array<i64: 3, 1>}, {pipeline_mode = #tpu.pipeline_mode<synchronous>, transform_indices = @transform_6, window_bounds = array<i64: 6, 3>}, {pipeline_mode = #tpu.pipeline_mode<synchronous>, transform_indices = @transform_7, window_bounds = array<i64: 6, 3>}, {pipeline_mode = #tpu.pipeline_mode<synchronous>, transform_indices = @transform_8, window_bounds = array<i64: 6, 1>}, {pipeline_mode = #tpu.pipeline_mode<synchronous>, transform_indices = @transform_9, window_bounds = array<i64: 3, 6>}, {pipeline_mode = #tpu.pipeline_mode<synchronous>, transform_indices = @transform_10, window_bounds = array<i64: 3, 1>}, {pipeline_mode = #tpu.pipeline_mode<synchronous>, transform_indices = @transform_11, window_bounds = array<i64: 3, 128>}, {pipeline_mode = #tpu.pipeline_mode<synchronous>, transform_indices = @transform_12, window_bounds = array<i64: 1, 128>}, {transform_indices = @transform_13, window_bounds = array<i64: 1, 1, 128>}]} {
    %c0 = arith.constant 0 : index
    %c0_0 = arith.constant 0 : index
    %c0_1 = arith.constant 0 : index
    %0 = vector.load %arg1[%c0, %c0_0, %c0_1] : memref<1x3x256xf32, #tpu.memory_space<vmem>>, vector<1x3x256xf32>
    %1 = vector.shape_cast %0 : vector<1x3x256xf32> to vector<3x256xf32>
    %c0_2 = arith.constant 0 : index
    %c0_3 = arith.constant 0 : index
    %2 = vector.load %arg4[%c0_2, %c0_3] : memref<3x1xf32, #tpu.memory_space<vmem>>, vector<3x1xf32>
    %3 = vector.broadcast %2 : vector<3x1xf32> to vector<3x256xf32>
    %4 = arith.addf %1, %3 : vector<3x256xf32>
    %c17_i32 = arith.constant 17 : i32
    %5 = tpu.dynamic_rotate %1 by %c17_i32 dim 1 : vector<3x256xf32>, i32 -> vector<3x256xf32>
    %c0_4 = arith.constant 0 : index
    %c0_5 = arith.constant 0 : index
    %c0_6 = arith.constant 0 : index
    %6 = vector.load %arg2[%c0_4, %c0_5, %c0_6] : memref<9x3x256xf32, #tpu.memory_space<vmem>>, vector<1x3x256xf32>
    %7 = vector.shape_cast %6 : vector<1x3x256xf32> to vector<3x256xf32>
    %8 = arith.mulf %5, %7 : vector<3x256xf32>
    %9 = arith.addf %4, %8 : vector<3x256xf32>
    %c16_i32 = arith.constant 16 : i32
    %10 = tpu.dynamic_rotate %1 by %c16_i32 dim 1 : vector<3x256xf32>, i32 -> vector<3x256xf32>
    %c1 = arith.constant 1 : index
    %c0_7 = arith.constant 0 : index
    %c0_8 = arith.constant 0 : index
    %11 = vector.load %arg2[%c1, %c0_7, %c0_8] : memref<9x3x256xf32, #tpu.memory_space<vmem>>, vector<1x3x256xf32>
    %12 = vector.shape_cast %11 : vector<1x3x256xf32> to vector<3x256xf32>
    %13 = arith.mulf %10, %12 : vector<3x256xf32>
    %14 = arith.addf %9, %13 : vector<3x256xf32>
    %c15_i32 = arith.constant 15 : i32
    %15 = tpu.dynamic_rotate %1 by %c15_i32 dim 1 : vector<3x256xf32>, i32 -> vector<3x256xf32>
    %c2 = arith.constant 2 : index
    %c0_9 = arith.constant 0 : index
    %c0_10 = arith.constant 0 : index
    %16 = vector.load %arg2[%c2, %c0_9, %c0_10] : memref<9x3x256xf32, #tpu.memory_space<vmem>>, vector<1x3x256xf32>
    %17 = vector.shape_cast %16 : vector<1x3x256xf32> to vector<3x256xf32>
    %18 = arith.mulf %15, %17 : vector<3x256xf32>
    %19 = arith.addf %14, %18 : vector<3x256xf32>
    %c1_i32 = arith.constant 1 : i32
    %20 = tpu.dynamic_rotate %1 by %c1_i32 dim 1 : vector<3x256xf32>, i32 -> vector<3x256xf32>
    %c3 = arith.constant 3 : index
    %c0_11 = arith.constant 0 : index
    %c0_12 = arith.constant 0 : index
    %21 = vector.load %arg2[%c3, %c0_11, %c0_12] : memref<9x3x256xf32, #tpu.memory_space<vmem>>, vector<1x3x256xf32>
    %22 = vector.shape_cast %21 : vector<1x3x256xf32> to vector<3x256xf32>
    %23 = arith.mulf %20, %22 : vector<3x256xf32>
    %24 = arith.addf %19, %23 : vector<3x256xf32>
    %c4 = arith.constant 4 : index
    %c0_13 = arith.constant 0 : index
    %c0_14 = arith.constant 0 : index
    %25 = vector.load %arg2[%c4, %c0_13, %c0_14] : memref<9x3x256xf32, #tpu.memory_space<vmem>>, vector<1x3x256xf32>
    %26 = vector.shape_cast %25 : vector<1x3x256xf32> to vector<3x256xf32>
    %27 = arith.mulf %1, %26 : vector<3x256xf32>
    %28 = arith.addf %24, %27 : vector<3x256xf32>
    %c255_i32 = arith.constant 255 : i32
    %29 = tpu.dynamic_rotate %1 by %c255_i32 dim 1 : vector<3x256xf32>, i32 -> vector<3x256xf32>
    %c5 = arith.constant 5 : index
    %c0_15 = arith.constant 0 : index
    %c0_16 = arith.constant 0 : index
    %30 = vector.load %arg2[%c5, %c0_15, %c0_16] : memref<9x3x256xf32, #tpu.memory_space<vmem>>, vector<1x3x256xf32>
    %31 = vector.shape_cast %30 : vector<1x3x256xf32> to vector<3x256xf32>
    %32 = arith.mulf %29, %31 : vector<3x256xf32>
    %33 = arith.addf %28, %32 : vector<3x256xf32>
    %c241_i32 = arith.constant 241 : i32
    %34 = tpu.dynamic_rotate %1 by %c241_i32 dim 1 : vector<3x256xf32>, i32 -> vector<3x256xf32>
    %c6 = arith.constant 6 : index
    %c0_17 = arith.constant 0 : index
    %c0_18 = arith.constant 0 : index
    %35 = vector.load %arg2[%c6, %c0_17, %c0_18] : memref<9x3x256xf32, #tpu.memory_space<vmem>>, vector<1x3x256xf32>
    %36 = vector.shape_cast %35 : vector<1x3x256xf32> to vector<3x256xf32>
    %37 = arith.mulf %34, %36 : vector<3x256xf32>
    %38 = arith.addf %33, %37 : vector<3x256xf32>
    %c240_i32 = arith.constant 240 : i32
    %39 = tpu.dynamic_rotate %1 by %c240_i32 dim 1 : vector<3x256xf32>, i32 -> vector<3x256xf32>
    %c7 = arith.constant 7 : index
    %c0_19 = arith.constant 0 : index
    %c0_20 = arith.constant 0 : index
    %40 = vector.load %arg2[%c7, %c0_19, %c0_20] : memref<9x3x256xf32, #tpu.memory_space<vmem>>, vector<1x3x256xf32>
    %41 = vector.shape_cast %40 : vector<1x3x256xf32> to vector<3x256xf32>
    %42 = arith.mulf %39, %41 : vector<3x256xf32>
    %43 = arith.addf %38, %42 : vector<3x256xf32>
    %c239_i32 = arith.constant 239 : i32
    %44 = tpu.dynamic_rotate %1 by %c239_i32 dim 1 : vector<3x256xf32>, i32 -> vector<3x256xf32>
    %c8 = arith.constant 8 : index
    %c0_21 = arith.constant 0 : index
    %c0_22 = arith.constant 0 : index
    %45 = vector.load %arg2[%c8, %c0_21, %c0_22] : memref<9x3x256xf32, #tpu.memory_space<vmem>>, vector<1x3x256xf32>
    %46 = vector.shape_cast %45 : vector<1x3x256xf32> to vector<3x256xf32>
    %47 = arith.mulf %44, %46 : vector<3x256xf32>
    %48 = arith.addf %43, %47 : vector<3x256xf32>
    %c0_23 = arith.constant 0 : index
    %c0_24 = arith.constant 0 : index
    %49 = vector.load %arg5[%c0_23, %c0_24] : memref<3x3xf32, #tpu.memory_space<vmem>>, vector<3x3xf32>
    %cst = arith.constant dense<0.000000e+00> : vector<3x256xf32>
    %50 = tpu.matmul %49, %48, %cst {dimension_numbers = #tpu.dot_dimension_numbers<[1], [0], [0], [1], [0, 0, 1, 1], [], []>} : vector<3x3xf32>, vector<3x256xf32>, vector<3x256xf32> -> vector<3x256xf32>
    %c0_25 = arith.constant 0 : index
    %c0_26 = arith.constant 0 : index
    %51 = vector.load %arg6[%c0_25, %c0_26] : memref<3x1xf32, #tpu.memory_space<vmem>>, vector<3x1xf32>
    %52 = vector.broadcast %51 : vector<3x1xf32> to vector<3x256xf32>
    %53 = arith.addf %50, %52 : vector<3x256xf32>
    %c0_27 = arith.constant 0 : index
    %c0_28 = arith.constant 0 : index
    %54 = vector.load %arg3[%c0_27, %c0_28] : memref<256x256xf32, #tpu.memory_space<vmem>>, vector<256x256xf32>
    %cst_29 = arith.constant dense<0.000000e+00> : vector<256x3xf32>
    %55 = tpu.matmul %54, %53, %cst_29 {dimension_numbers = #tpu.dot_dimension_numbers<[1], [1], [0], [0], [0, 0, 1, 0], [], []>} : vector<256x256xf32>, vector<3x256xf32>, vector<256x3xf32> -> vector<256x3xf32>
    %cst_30 = arith.constant dense<0.000000e+00> : vector<256x256xf32>
    %56 = tpu.matmul %55, %53, %cst_30 {dimension_numbers = #tpu.dot_dimension_numbers<[1], [0], [0], [1], [0, 0, 1, 1], [], []>} : vector<256x3xf32>, vector<3x256xf32>, vector<256x256xf32> -> vector<256x256xf32>
    %57 = arith.mulf %53, %53 : vector<3x256xf32>
    %cst_31 = arith.constant dense<0.000000e+00> : vector<256xf32>
    %58 = vector.multi_reduction <add>, %57, %cst_31 [0] : vector<3x256xf32> to vector<256xf32>
    %59 = vector.shape_cast %58 : vector<256xf32> to vector<1x256xf32>
    %cst_32 = arith.constant 2.000000e+00 : f32
    %60 = vector.broadcast %cst_32 : f32 to vector<256x256xf32>
    %61 = arith.mulf %60, %56 : vector<256x256xf32>
    %62 = vector.broadcast %59 : vector<1x256xf32> to vector<256x256xf32>
    %63 = arith.subf %62, %61 : vector<256x256xf32>
    %cst_33 = arith.constant dense<0x7F800000> : vector<256xf32>
    %64 = vector.multi_reduction <minimumf>, %63, %cst_33 [1] : vector<256x256xf32> to vector<256xf32>
    %65 = vector.shape_cast %64 : vector<256xf32> to vector<256x1xf32>
    %66 = vector.broadcast %65 : vector<256x1xf32> to vector<256x256xf32>
    %67 = arith.cmpf ole, %63, %66 : vector<256x256xf32>
    %cst_34 = arith.constant 1.000000e+30 : f32
    %68 = vector.broadcast %cst_34 : f32 to vector<256x256xf32>
    %69 = arith.select %67, %68, %63 : vector<256x256xi1>, vector<256x256xf32>
    %cst_35 = arith.constant dense<0x7F800000> : vector<256xf32>
    %70 = vector.multi_reduction <minimumf>, %69, %cst_35 [1] : vector<256x256xf32> to vector<256xf32>
    %71 = vector.shape_cast %70 : vector<256xf32> to vector<256x1xf32>
    %72 = vector.broadcast %71 : vector<256x1xf32> to vector<256x256xf32>
    %73 = arith.cmpf ole, %63, %72 : vector<256x256xf32>
    %cst_36 = arith.constant 1.000000e+30 : f32
    %74 = vector.broadcast %cst_36 : f32 to vector<256x256xf32>
    %75 = arith.select %73, %74, %63 : vector<256x256xi1>, vector<256x256xf32>
    %cst_37 = arith.constant dense<0x7F800000> : vector<256xf32>
    %76 = vector.multi_reduction <minimumf>, %75, %cst_37 [1] : vector<256x256xf32> to vector<256xf32>
    %77 = vector.shape_cast %76 : vector<256xf32> to vector<256x1xf32>
    %78 = vector.broadcast %77 : vector<256x1xf32> to vector<256x256xf32>
    %79 = arith.cmpf ole, %63, %78 : vector<256x256xf32>
    %cst_38 = arith.constant 1.000000e+30 : f32
    %80 = vector.broadcast %cst_38 : f32 to vector<256x256xf32>
    %81 = arith.select %79, %80, %63 : vector<256x256xi1>, vector<256x256xf32>
    %cst_39 = arith.constant dense<0x7F800000> : vector<256xf32>
    %82 = vector.multi_reduction <minimumf>, %81, %cst_39 [1] : vector<256x256xf32> to vector<256xf32>
    %83 = vector.shape_cast %82 : vector<256xf32> to vector<256x1xf32>
    %84 = vector.broadcast %83 : vector<256x1xf32> to vector<256x256xf32>
    %85 = arith.cmpf ole, %63, %84 : vector<256x256xf32>
    %cst_40 = arith.constant 1.000000e+30 : f32
    %86 = vector.broadcast %cst_40 : f32 to vector<256x256xf32>
    %87 = arith.select %85, %86, %63 : vector<256x256xi1>, vector<256x256xf32>
    %cst_41 = arith.constant dense<0x7F800000> : vector<256xf32>
    %88 = vector.multi_reduction <minimumf>, %87, %cst_41 [1] : vector<256x256xf32> to vector<256xf32>
    %89 = vector.shape_cast %88 : vector<256xf32> to vector<256x1xf32>
    %90 = vector.broadcast %89 : vector<256x1xf32> to vector<256x256xf32>
    %91 = arith.cmpf ole, %63, %90 : vector<256x256xf32>
    %cst_42 = arith.constant 1.000000e+30 : f32
    %92 = vector.broadcast %cst_42 : f32 to vector<256x256xf32>
    %93 = arith.select %91, %92, %63 : vector<256x256xi1>, vector<256x256xf32>
    %cst_43 = arith.constant dense<0x7F800000> : vector<256xf32>
    %94 = vector.multi_reduction <minimumf>, %93, %cst_43 [1] : vector<256x256xf32> to vector<256xf32>
    %95 = vector.shape_cast %94 : vector<256xf32> to vector<256x1xf32>
    %96 = vector.broadcast %95 : vector<256x1xf32> to vector<256x256xf32>
    %97 = arith.cmpf ole, %63, %96 : vector<256x256xf32>
    %cst_44 = arith.constant 1.000000e+30 : f32
    %98 = vector.broadcast %cst_44 : f32 to vector<256x256xf32>
    %99 = arith.select %97, %98, %63 : vector<256x256xi1>, vector<256x256xf32>
    %cst_45 = arith.constant dense<0x7F800000> : vector<256xf32>
    %100 = vector.multi_reduction <minimumf>, %99, %cst_45 [1] : vector<256x256xf32> to vector<256xf32>
    %101 = vector.shape_cast %100 : vector<256xf32> to vector<256x1xf32>
    %102 = vector.broadcast %101 : vector<256x1xf32> to vector<256x256xf32>
    %103 = arith.cmpf ole, %63, %102 : vector<256x256xf32>
    %cst_46 = arith.constant 1.000000e+30 : f32
    %104 = vector.broadcast %cst_46 : f32 to vector<256x256xf32>
    %105 = arith.select %103, %104, %63 : vector<256x256xi1>, vector<256x256xf32>
    %cst_47 = arith.constant dense<0x7F800000> : vector<256xf32>
    %106 = vector.multi_reduction <minimumf>, %105, %cst_47 [1] : vector<256x256xf32> to vector<256xf32>
    %107 = vector.shape_cast %106 : vector<256xf32> to vector<256x1xf32>
    %108 = vector.broadcast %107 : vector<256x1xf32> to vector<256x256xf32>
    %109 = arith.cmpf ole, %63, %108 : vector<256x256xf32>
    %cst_48 = arith.constant 1.000000e+30 : f32
    %110 = vector.broadcast %cst_48 : f32 to vector<256x256xf32>
    %111 = arith.select %109, %110, %63 : vector<256x256xi1>, vector<256x256xf32>
    %cst_49 = arith.constant dense<0x7F800000> : vector<256xf32>
    %112 = vector.multi_reduction <minimumf>, %111, %cst_49 [1] : vector<256x256xf32> to vector<256xf32>
    %113 = vector.shape_cast %112 : vector<256xf32> to vector<256x1xf32>
    %114 = vector.broadcast %113 : vector<256x1xf32> to vector<256x256xf32>
    %115 = arith.cmpf ole, %63, %114 : vector<256x256xf32>
    %116 = vector.extract_strided_slice %53 {offsets = [0, 0], sizes = [1, 256], strides = [1, 1]} : vector<3x256xf32> to vector<1x256xf32>
    %cst_50 = arith.constant -1.000000e+30 : f32
    %117 = vector.shape_cast %116 : vector<1x256xf32> to vector<1x256xf32>
    %118 = vector.broadcast %117 : vector<1x256xf32> to vector<256x256xf32>
    %119 = vector.broadcast %cst_50 : f32 to vector<256x256xf32>
    %120 = arith.select %115, %118, %119 : vector<256x256xi1>, vector<256x256xf32>
    %cst_51 = arith.constant dense<0xFF800000> : vector<256xf32>
    %121 = vector.multi_reduction <maximumf>, %120, %cst_51 [1] : vector<256x256xf32> to vector<256xf32>
    %122 = vector.shape_cast %121 : vector<256xf32> to vector<256x1xf32>
    %c0_52 = arith.constant 0 : index
    %c0_53 = arith.constant 0 : index
    %123 = vector.load %arg15[%c0_52, %c0_53] : memref<256x3xf32, #tpu.memory_space<vmem>>, vector<256x1xf32>
    tpu.vector_store %arg15[%c0_52, %c0_53], %122 {strides = array<i32>} : memref<256x3xf32, #tpu.memory_space<vmem>>, vector<256x1xf32>,
    %124 = vector.extract_strided_slice %53 {offsets = [1, 0], sizes = [1, 256], strides = [1, 1]} : vector<3x256xf32> to vector<1x256xf32>
    %cst_54 = arith.constant -1.000000e+30 : f32
    %125 = vector.shape_cast %124 : vector<1x256xf32> to vector<1x256xf32>
    %126 = vector.broadcast %125 : vector<1x256xf32> to vector<256x256xf32>
    %127 = vector.broadcast %cst_54 : f32 to vector<256x256xf32>
    %128 = arith.select %115, %126, %127 : vector<256x256xi1>, vector<256x256xf32>
    %cst_55 = arith.constant dense<0xFF800000> : vector<256xf32>
    %129 = vector.multi_reduction <maximumf>, %128, %cst_55 [1] : vector<256x256xf32> to vector<256xf32>
    %130 = vector.shape_cast %129 : vector<256xf32> to vector<256x1xf32>
    %c0_56 = arith.constant 0 : index
    %c1_57 = arith.constant 1 : index
    %131 = vector.load %arg15[%c0_56, %c1_57] : memref<256x3xf32, #tpu.memory_space<vmem>>, vector<256x1xf32>
    tpu.vector_store %arg15[%c0_56, %c1_57], %130 {strides = array<i32>} : memref<256x3xf32, #tpu.memory_space<vmem>>, vector<256x1xf32>,
    %132 = vector.extract_strided_slice %53 {offsets = [2, 0], sizes = [1, 256], strides = [1, 1]} : vector<3x256xf32> to vector<1x256xf32>
    %cst_58 = arith.constant -1.000000e+30 : f32
    %133 = vector.shape_cast %132 : vector<1x256xf32> to vector<1x256xf32>
    %134 = vector.broadcast %133 : vector<1x256xf32> to vector<256x256xf32>
    %135 = vector.broadcast %cst_58 : f32 to vector<256x256xf32>
    %136 = arith.select %115, %134, %135 : vector<256x256xi1>, vector<256x256xf32>
    %cst_59 = arith.constant dense<0xFF800000> : vector<256xf32>
    %137 = vector.multi_reduction <maximumf>, %136, %cst_59 [1] : vector<256x256xf32> to vector<256xf32>
    %138 = vector.shape_cast %137 : vector<256xf32> to vector<256x1xf32>
    %c0_60 = arith.constant 0 : index
    %c2_61 = arith.constant 2 : index
    %139 = vector.load %arg15[%c0_60, %c2_61] : memref<256x3xf32, #tpu.memory_space<vmem>>, vector<256x1xf32>
    tpu.vector_store %arg15[%c0_60, %c2_61], %138 {strides = array<i32>} : memref<256x3xf32, #tpu.memory_space<vmem>>, vector<256x1xf32>,
    %c0_62 = arith.constant 0 : index
    %c0_63 = arith.constant 0 : index
    %140 = vector.load %arg15[%c0_62, %c0_63] : memref<256x3xf32, #tpu.memory_space<vmem>>, vector<256x3xf32>
    %c0_64 = arith.constant 0 : index
    %c0_65 = arith.constant 0 : index
    %141 = vector.load %arg7[%c0_64, %c0_65] : memref<6x3xf32, #tpu.memory_space<vmem>>, vector<6x3xf32>
    %cst_66 = arith.constant dense<0.000000e+00> : vector<6x256xf32>
    %142 = tpu.matmul %141, %53, %cst_66 {dimension_numbers = #tpu.dot_dimension_numbers<[1], [0], [0], [1], [0, 0, 1, 1], [], []>} : vector<6x3xf32>, vector<3x256xf32>, vector<6x256xf32> -> vector<6x256xf32>
    %c0_67 = arith.constant 0 : index
    %c0_68 = arith.constant 0 : index
    %143 = vector.load %arg8[%c0_67, %c0_68] : memref<6x3xf32, #tpu.memory_space<vmem>>, vector<6x3xf32>
    %cst_69 = arith.constant dense<0.000000e+00> : vector<6x256xf32>
    %144 = tpu.matmul %143, %140, %cst_69 {dimension_numbers = #tpu.dot_dimension_numbers<[1], [1], [0], [0], [0, 0, 1, 0], [], []>} : vector<6x3xf32>, vector<256x3xf32>, vector<6x256xf32> -> vector<6x256xf32>
    %145 = arith.addf %142, %144 : vector<6x256xf32>
    %c0_70 = arith.constant 0 : index
    %c0_71 = arith.constant 0 : index
    %146 = vector.load %arg9[%c0_70, %c0_71] : memref<6x1xf32, #tpu.memory_space<vmem>>, vector<6x1xf32>
    %147 = vector.broadcast %146 : vector<6x1xf32> to vector<6x256xf32>
    %148 = arith.addf %145, %147 : vector<6x256xf32>
    %149 = arith.mulf %148, %148 : vector<6x256xf32>
    %150 = arith.mulf %148, %149 : vector<6x256xf32>
    %cst_72 = arith.constant 4.471500e-02 : f32
    %151 = vector.broadcast %cst_72 : f32 to vector<6x256xf32>
    %152 = arith.mulf %151, %150 : vector<6x256xf32>
    %153 = arith.addf %148, %152 : vector<6x256xf32>
    %cst_73 = arith.constant 0.797884583 : f32
    %154 = vector.broadcast %cst_73 : f32 to vector<6x256xf32>
    %155 = arith.mulf %154, %153 : vector<6x256xf32>
    %156 = math.tanh %155 : vector<6x256xf32>
    %cst_74 = arith.constant 1.000000e+00 : f32
    %157 = vector.broadcast %cst_74 : f32 to vector<6x256xf32>
    %158 = arith.addf %157, %156 : vector<6x256xf32>
    %cst_75 = arith.constant 5.000000e-01 : f32
    %159 = vector.broadcast %cst_75 : f32 to vector<6x256xf32>
    %160 = arith.mulf %159, %158 : vector<6x256xf32>
    %161 = arith.mulf %148, %160 : vector<6x256xf32>
    %c0_76 = arith.constant 0 : index
    %c0_77 = arith.constant 0 : index
    %162 = vector.load %arg10[%c0_76, %c0_77] : memref<3x6xf32, #tpu.memory_space<vmem>>, vector<3x6xf32>
    %cst_78 = arith.constant dense<0.000000e+00> : vector<3x256xf32>
    %163 = tpu.matmul %162, %161, %cst_78 {dimension_numbers = #tpu.dot_dimension_numbers<[1], [0], [0], [1], [0, 0, 1, 1], [], []>} : vector<3x6xf32>, vector<6x256xf32>, vector<3x256xf32> -> vector<3x256xf32>
    %c0_79 = arith.constant 0 : index
    %c0_80 = arith.constant 0 : index
    %164 = vector.load %arg11[%c0_79, %c0_80] : memref<3x1xf32, #tpu.memory_space<vmem>>, vector<3x1xf32>
    %165 = vector.broadcast %164 : vector<3x1xf32> to vector<3x256xf32>
    %166 = arith.addf %163, %165 : vector<3x256xf32>
    %167 = arith.addf %166, %48 : vector<3x256xf32>
    %cst_81 = arith.constant dense<0.000000e+00> : vector<3xf32>
    %168 = vector.multi_reduction <add>, %167, %cst_81 [1] : vector<3x256xf32> to vector<3xf32>
    %169 = vector.shape_cast %168 : vector<3xf32> to vector<3x1xf32>
    %cst_82 = arith.constant 2.560000e+02 : f32
    %170 = vector.broadcast %cst_82 : f32 to vector<3x1xf32>
    %171 = arith.divf %169, %170 : vector<3x1xf32>
    %c0_83 = arith.constant 0 : index
    %c0_84 = arith.constant 0 : index
    %172 = vector.load %arg12[%c0_83, %c0_84] : memref<3x128xf32, #tpu.memory_space<vmem>>, vector<3x128xf32>
    %173 = vector.broadcast %171 : vector<3x1xf32> to vector<3x128xf32>
    %174 = arith.mulf %173, %172 : vector<3x128xf32>
    %cst_85 = arith.constant dense<0.000000e+00> : vector<128xf32>
    %175 = vector.multi_reduction <add>, %174, %cst_85 [0] : vector<3x128xf32> to vector<128xf32>
    %176 = vector.shape_cast %175 : vector<128xf32> to vector<1x128xf32>
    %c0_86 = arith.constant 0 : index
    %c0_87 = arith.constant 0 : index
    %177 = vector.load %arg13[%c0_86, %c0_87] : memref<1x128xf32, #tpu.memory_space<vmem>>, vector<1x128xf32>
    %178 = arith.addf %176, %177 : vector<1x128xf32>
    %c0_88 = arith.constant 0 : index
    %c0_89 = arith.constant 0 : index
    %c0_90 = arith.constant 0 : index
    %179 = vector.load %arg14[%c0_88, %c0_89, %c0_90] : memref<1x1x128xf32, #tpu.memory_space<vmem>>, vector<1x1x128xf32>
    %180 = vector.shape_cast %179 : vector<1x1x128xf32> to vector<1x128xf32>
    %181 = vector.shape_cast %178 : vector<1x128xf32> to vector<1x1x128xf32>
    tpu.vector_store %arg14[%c0_88, %c0_89, %c0_90], %181 {strides = array<i32>} : memref<1x1x128xf32, #tpu.memory_space<vmem>>, vector<1x1x128xf32>,
    return
  }
  func.func @transform_0(%arg0: i32) -> (i32, i32, i32) {
    %c0_i32 = arith.constant 0 : i32
    %c0_i32_0 = arith.constant 0 : i32
    %c0_i32_1 = arith.constant 0 : i32
    return %arg0, %c0_i32, %c0_i32_0 : i32, i32, i32
  }
  func.func @transform_1(%arg0: i32) -> (i32, i32, i32) {
    %c0_i32 = arith.constant 0 : i32
    %c0_i32_0 = arith.constant 0 : i32
    %c0_i32_1 = arith.constant 0 : i32
    %c0_i32_2 = arith.constant 0 : i32
    return %c0_i32, %c0_i32_0, %c0_i32_1 : i32, i32, i32
  }
  func.func @transform_2(%arg0: i32) -> (i32, i32) {
    %c0_i32 = arith.constant 0 : i32
    %c0_i32_0 = arith.constant 0 : i32
    %c0_i32_1 = arith.constant 0 : i32
    return %c0_i32, %c0_i32_0 : i32, i32
  }
  func.func @transform_3(%arg0: i32) -> (i32, i32) {
    %c0_i32 = arith.constant 0 : i32
    %c0_i32_0 = arith.constant 0 : i32
    %c0_i32_1 = arith.constant 0 : i32
    return %c0_i32, %c0_i32_0 : i32, i32
  }
  func.func @transform_4(%arg0: i32) -> (i32, i32) {
    %c0_i32 = arith.constant 0 : i32
    %c0_i32_0 = arith.constant 0 : i32
    %c0_i32_1 = arith.constant 0 : i32
    return %c0_i32, %c0_i32_0 : i32, i32
  }
  func.func @transform_5(%arg0: i32) -> (i32, i32) {
    %c0_i32 = arith.constant 0 : i32
    %c0_i32_0 = arith.constant 0 : i32
    %c0_i32_1 = arith.constant 0 : i32
    return %c0_i32, %c0_i32_0 : i32, i32
  }
  func.func @transform_6(%arg0: i32) -> (i32, i32) {
    %c0_i32 = arith.constant 0 : i32
    %c0_i32_0 = arith.constant 0 : i32
    %c0_i32_1 = arith.constant 0 : i32
    return %c0_i32, %c0_i32_0 : i32, i32
  }
  func.func @transform_7(%arg0: i32) -> (i32, i32) {
    %c0_i32 = arith.constant 0 : i32
    %c0_i32_0 = arith.constant 0 : i32
    %c0_i32_1 = arith.constant 0 : i32
    return %c0_i32, %c0_i32_0 : i32, i32
  }
  func.func @transform_8(%arg0: i32) -> (i32, i32) {
    %c0_i32 = arith.constant 0 : i32
    %c0_i32_0 = arith.constant 0 : i32
    %c0_i32_1 = arith.constant 0 : i32
    return %c0_i32, %c0_i32_0 : i32, i32
  }
  func.func @transform_9(%arg0: i32) -> (i32, i32) {
    %c0_i32 = arith.constant 0 : i32
    %c0_i32_0 = arith.constant 0 : i32
    %c0_i32_1 = arith.constant 0 : i32
    return %c0_i32, %c0_i32_0 : i32, i32
  }
  func.func @transform_10(%arg0: i32) -> (i32, i32) {
    %c0_i32 = arith.constant 0 : i32
    %c0_i32_0 = arith.constant 0 : i32
    %c0_i32_1 = arith.constant 0 : i32
    return %c0_i32, %c0_i32_0 : i32, i32
  }
  func.func @transform_11(%arg0: i32) -> (i32, i32) {
    %c0_i32 = arith.constant 0 : i32
    %c0_i32_0 = arith.constant 0 : i32
    %c0_i32_1 = arith.constant 0 : i32
    return %c0_i32, %c0_i32_0 : i32, i32
  }
  func.func @transform_12(%arg0: i32) -> (i32, i32) {
    %c0_i32 = arith.constant 0 : i32
    %c0_i32_0 = arith.constant 0 : i32
    %c0_i32_1 = arith.constant 0 : i32
    return %c0_i32, %c0_i32_0 : i32, i32
  }
  func.func @transform_13(%arg0: i32) -> (i32, i32, i32) {
    %c0_i32 = arith.constant 0 : i32
    %c0_i32_0 = arith.constant 0 : i32
    %c0_i32_1 = arith.constant 0 : i32
    return %arg0, %c0_i32, %c0_i32_0 : i32, i32, i32
  }
}

</mosaic_0001>

<bundles_post_ra>
// kernel: combined2_forward.1
= control target key start
LH: loop header
LB: loop body
LE: loop exit
PB: predicated region body
PF: predicated region fallthrough
CT: control target
= control target key end

     0   :  { %s7628_s0 = inlined_call_operand.vmem [shape: f32[2,3,256], index: 0, kind: input, shape index: {}]   ;;  %s7629_s1 = inlined_call_operand.vmem [shape: f32[9,3,256], index: 1, kind: input, shape index: {}]   ;;  %s7630_s2 = inlined_call_operand.vmem [shape: f32[256,256], index: 2, kind: input, shape index: {}]   ;;  %s7631_s3 = inlined_call_operand.vmem [shape: f32[3,1], index: 3, kind: input, shape index: {}]   ;;  %s7632_s4 = inlined_call_operand.vmem [shape: f32[3,3], index: 4, kind: input, shape index: {}]   ;;  %s7633_s5 = inlined_call_operand.vmem [shape: f32[3,1], index: 5, kind: input, shape index: {}]   ;;  %s7634_s6 = inlined_call_operand.vmem [shape: f32[6,3], index: 6, kind: input, shape index: {}]   ;;  %s7635_s7 = inlined_call_operand.vmem [shape: f32[6,3], index: 7, kind: input, shape index: {}]   ;;  %s7636_s8 = inlined_call_operand.vmem [shape: f32[6,1], index: 8, kind: input, shape index: {}]   ;;  %s7637_s9 = inlined_call_operand.vmem [shape: f32[3,6], index: 9, kind: input, shape index: {}]   ;;  %s7638_s10 = inlined_call_operand.vmem [shape: f32[3,1], index: 10, kind: input, shape index: {}]   ;;  %s7639_s11 = inlined_call_operand.vmem [shape: f32[3,128], index: 11, kind: input, shape index: {}]   ;;  %s7640_s12 = inlined_call_operand.vmem [shape: f32[1,128], index: 12, kind: input, shape index: {}]   ;;  %s7641_s13 = inlined_call_operand.hbm [shape: f32[2,1,128], index: 13, kind: output, shape index: {}]  }
   0x1   :  { %7815 = sst [smem:[#allocation58_spill]] %s7628_s0 }
   0x2   :  { %7816 = sst [smem:[#allocation59_spill]] %s7629_s1 }
   0x3   :  { %7817 = sst [smem:[#allocation60_spill]] %s7630_s2 }
   0x4   :  { %18 = vsyncpa [#allocation4], 0 }
   0x5   :  { %20 = vsyncpa [#allocation4 + $0x1], 0  ;;  %s4921_s25 = smov 0   ;;  %s4923_s26 = smov 0  }
   0x6   :  { %s4925_s27 = smov 0   ;;  %s4927_s28 = smov 0  }
   0x7 LB: > { %s4942_s29 = sadd.s32 4294967295, %s4837_s28   ;;  %s4532_s30 = sadd.s32 4294967294, %s4837_s28   ;;  %s4837_s28 = sphi %s4927_s28, %s8003_s28   ;;  %s4833_s27 = sphi %s4925_s27, %s8002_s27   ;;  %s4829_s26 = sphi %s4923_s26, %s8001_s26   ;;  %s4825_s25 = sphi %s4921_s25, %s8000_s25  }
   0x8   : > { %s4946_s14 = sadd.s32 1, %s4837_s28   ;;  %s311_s15 = sadd.s32 1, %s4833_s27 }
   0x9   : > { %s308_s16 = ssub.s32 %s4837_s28, %s4946_s14  ;;  %p321_p0 = scmp.ne.s32.totalorder %s4833_s27, %s4829_s26 }
   0xa   : > { %p309_p1 = scmp.eq.s32.totalorder %s308_s16, 0  ;;  %p322_p2 = scmp.eq.s32.totalorder %s4942_s29, 1 }
   0xb   : > { %p327_p3 = scmp.ne.s32.totalorder %s4829_s26, %s4825_s25  ;;  %p328_p4 = scmp.eq.s32.totalorder %s4532_s30, 1 }
   0xc   : > { %s4957_s17 = scalar_select %p309_p1, %s4833_s27, %s311_s15  }
   0xd   : > { %p4959_p5 = por %p322_p2, %p321_p0  ;;  %p4963_p6 = por %p328_p4, %p327_p3 }
   0xe   : > { %p4535_p7 = scmp.ge.s32.totalorder %s4837_s28, 1  ;;  %p390_p8 = scmp.lt.s32.totalorder %s4837_s28, 3 }
  0x10   : > { %p391_p9 = pnand %p4535_p7, %p390_p8 }
  0x12   : > { %394 = sbr.rel (%p391_p9) target bundleno = 3168 (0xc60), region = 72 }
  0x19   : > { %v439_v0 = vld [vmem:[%s7631_s3] sm:$0x7]  ;;  %p433_p10 = scmp.lt.s32.totalorder %s4942_s29, 1  ;;  %v4839_v1 = vmov 0   ;;  %s7820_s0 = sld [smem:[#allocation58_spill]]  ;;  %v7642_v4 = vmov 0.0   ;;  %v447_v8 = vlaneseq }
  0x1a   : > { %4760 = vset.pattern.permute.xlu0 %v4839_v1  ;;  %4761 = vset.pattern.permute.xlu1 %v4839_v1  ;;  %s4840_s16 = smov 16   ;;  %s4841_s20 = smov 17   ;;  %v614_v5 = vld [vmem:[%s7633_s5] sm:$0x7]  ;;  %v4849_v9 = vmov 839922192  }
  0x1b   : > { %442 = vperm.xlu0 %4760, %v439_v0   ;;  %s434_s22 = scalar_select %p433_p10, %s4942_s29, 1  ;;  %695 = vmatprep.mubr.f32.mxu0 %v7642_v4  ;;  %v445_v10 = vunpack.c.l.s4 %v4849_v9  ;;  %v4993_v11 = vand.u32 127, %v447_v8  ;;  %v4998_v16 = vshrl.u32 %v447_v8, 7  ;;  %vm626_vm8 = vcmask 1042432  }
  0x1c   : > { %s4842_s21 = smov 15   ;;  %s4845_s24 = smov 113   ;;  %vm622_vm9 = vcmask 23552  }
  0x1d   : > { %s4625_s23 = sshll.u32 %s434_s22, 3  ;;  %s4843_s22 = smov 1   ;;  %v446_v15 = vunpack.c.0.s8 %v445_v10  ;;  %7822 = vst [vmem:[#allocation6_spill] sm:$0xff] %v4998_v16  ;;  %vm462_vm0 = vcmp.lt.s32.totalorder %v4993_v11, 17  ;;  %vm480_vm1 = vcmp.lt.s32.totalorder %v4993_v11, 16  ;;  %vm499_vm2 = vcmp.lt.s32.totalorder %v4993_v11, 15 }
  0x1e   : > { %s4846_s30 = smov 112   ;;  %s7821_s1 = sld [smem:[#allocation59_spill]]  ;;  %vm518_vm3 = vcmp.lt.s32.totalorder %v4993_v11, 1  ;;  %vm541_vm4 = vcmp.lt.s32.totalorder %v4993_v11, 127  ;;  %vm560_vm5 = vcmp.lt.s32.totalorder %v4993_v11, 113  ;;  %vm579_vm6 = vcmp.lt.s32.totalorder %v4993_v11, 112 }
  0x1f   : > { %s437_s15 = scalar_lea.vmem %s7820_s0, %s4625_s23  ;;  %s4844_s23 = smov 127   ;;  %v449_v24 = vsub.s32 %v446_v15, %v4998_v16  ;;  %vm598_vm7 = vcmp.lt.s32.totalorder %v4993_v11, 111 }
  0x20   : > { %v4977_v2 = vld [vmem:[%s437_s15] sm:$0x77]  ;;  %s4847_s15 = smov 111   ;;  %s7825_s2 = sld [smem:[#allocation60_spill]] }
  0x21   : > { %476 = vrot.lane.b32.xlu1 %v4977_v2, %s4840_s16  ;;  %456 = vrot.lane.b32.xlu0 %v4977_v2, %s4841_s20  ;;  %v454_v3 = vcombine.high %v4977_v2, %v4977_v2 }
  0x24   : > { %v465_v14 = vld [vmem:[%s7821_s1] sm:$0x77]  ;;  %v4538_v18 = vld [vmem:[%s7821_s1 + $0x8] sm:$0x77]  ;;  %v4539_v23 = vld [vmem:[%s7821_s1 + $0x10] sm:$0x77] }
  0x25   : > { %495 = vrot.lane.b32.xlu1 %v4977_v2, %s4842_s21  ;;  %478 = vrot.lane.b32.xlu0 %v454_v3, %s4840_s16  ;;  %v467_v19 = vcombine.high %v465_v14, %v465_v14  ;;  %v486_v25 = vcombine.high %v4538_v18, %v4538_v18  ;;  %v505_v31 = vcombine.high %v4539_v23, %v4539_v23  ;;  %v4540_v32 = vld [vmem:[%s7821_s1 + $0x18] sm:$0x77]  ;;  %v4542_v49 = vld [vmem:[%s7821_s1 + $0x28] sm:$0x77]  ;;  %s431_s16 = sand.u32 1, %s4829_s26  }
  0x26   : > { %v524_v43 = vcombine.high %v4540_v32, %v4540_v32  ;;  %v4543_v55 = vld [vmem:[%s7821_s1 + $0x30] sm:$0x77]  ;;  %v547_v59 = vcombine.high %v4542_v49, %v4542_v49  ;;  %v4541_v60 = vld [vmem:[%s7821_s1 + $0x20] sm:$0x77]  ;;  %v4544_v1 = vld [vmem:[%s7821_s1 + $0x38] sm:$0x77] }
  0x27   : > { %v566_v0 = vcombine.high %v4543_v55, %v4543_v55  ;;  %v585_v15 = vcombine.high %v4544_v1, %v4544_v1 }
  0x29   : > { %458 = vrot.lane.b32.xlu1 %v454_v3, %s4841_s20  ;;  %497 = vrot.lane.b32.xlu0 %v454_v3, %s4842_s21  ;;  %s432_s21 = scalar_lea.vmem [#allocation3], %s431_s16 }
  0x2d   : > { %516 = vrot.lane.b32.xlu0 %v454_v3, %s4843_s22  ;;  %514 = vrot.lane.b32.xlu1 %v4977_v2, %s4843_s22  ;;  %s4477_s22 = sshll.u32 %s432_s21, 4  ;;  %s7588_s22 = int_to_ptr.vmem [resolvable:$true] %s4477_s22 }
  0x31   : > { %539 = vrot.lane.b32.xlu0 %v454_v3, %s4844_s23  ;;  %537 = vrot.lane.b32.xlu1 %v4977_v2, %s4844_s23 }
  0x35   : > { %558 = vrot.lane.b32.xlu0 %v454_v3, %s4845_s24  ;;  %556 = vrot.lane.b32.xlu1 %v4977_v2, %s4845_s24 }
  0x39   : > { %577 = vrot.lane.b32.xlu0 %v454_v3, %s4846_s30  ;;  %575 = vrot.lane.b32.xlu1 %v4977_v2, %s4846_s30 }
  0x3d   : > { %596 = vrot.lane.b32.xlu0 %v454_v3, %s4847_s15  ;;  %594 = vrot.lane.b32.xlu1 %v4977_v2, %s4847_s15  ;;  %s4465_s15 = scalar_lea.sflag [#allocation4], %s431_s16 }
  0x41   : > { %617 = vperm.xlu1 %4761, %v614_v5   ;;  %v535_v5 = vmul.f32 %v4541_v60, %v4977_v2  ;;  %v719_v60 = vld [vmem:[%s7825_s2 + $0x88] sm:$0xff] }
  0x93   : > { %v477_v6 = vpop.permute.xlu1 %476 }
  0x97   : > { %v496_v7 = vpop.permute.xlu1 %495 }
  0x9a   : > { %v443_v12 = vpop.permute.xlu0 %442 }
  0x9b   : > { %v459_v13 = vpop.permute.xlu1 %458  ;;  %v450_v33 = vrot.slane %v443_v12, %v449_v24 }
  0x9d   : > { %v452_v44 = vadd.f32 %v450_v33, %v4977_v2 }
  0x9e   : > { %v457_v17 = vpop.permute.xlu0 %456 }
  0x9f   : > { %v515_v20 = vpop.permute.xlu1 %514  ;;  %v463_v21 = vsel %vm462_vm0, %v457_v17, %v459_v13  ;;  %v464_v22 = vsel %vm462_vm0, %v459_v13, %v457_v17  ;;  %v4545_v17 = vld [vmem:[%s7821_s1 + $0x40] sm:$0x77]  ;;  %s4622_s1 = sshll.u32 %s4942_s29, 4  ;;  %s4850_s29 = smov [#allocation3]  }
  0xa0   : > { %v469_v29 = vmul.f32 %v465_v14, %v464_v22  ;;  %v470_v30 = vmul.f32 %v467_v19, %v463_v21  ;;  %s7586_s30 = scalar_lea.hbm %s7641_s13, %s4622_s1  ;;  %s4779_s20 = sshll.u32 %s4850_s29, 4  ;;  %s4780_s20 = int_to_ptr.vmem [resolvable:$false] %s4779_s20 }
  0xa1   : > { %s4781_s0 = scalar_lea.vmem %s4780_s20, 32  ;;  %p4782_p0 = scmp.lt.s32.totalorder %s7588_s22, %s4780_s20 }
  0xa2   : > { %v479_v26 = vpop.permute.xlu0 %478  ;;  %v473_v40 = vcombine.low %v469_v29, %v470_v30 }
  0xa3   : > { %v481_v27 = vsel %vm480_vm1, %v477_v6, %v479_v26  ;;  %v482_v28 = vsel %vm480_vm1, %v479_v26, %v477_v6  ;;  %v538_v37 = vpop.permute.xlu1 %537 }
  0xa4   : > { %v488_v34 = vmul.f32 %v4538_v18, %v482_v28  ;;  %v489_v35 = vmul.f32 %v486_v25, %v481_v27  ;;  %v475_v50 = vadd.f32 %v473_v40, %v452_v44  ;;  %v604_v25 = vcombine.high %v4545_v17, %v4545_v17 }
  0xa6   : > { %v498_v36 = vpop.permute.xlu0 %497  ;;  %v492_v45 = vcombine.low %v488_v34, %v489_v35 }
  0xa7   : > { %v500_v38 = vsel %vm499_vm2, %v496_v7, %v498_v36  ;;  %v501_v39 = vsel %vm499_vm2, %v498_v36, %v496_v7  ;;  %v557_v54 = vpop.permute.xlu1 %556 }
  0xa8   : > { %v507_v41 = vmul.f32 %v4539_v23, %v501_v39  ;;  %v508_v42 = vmul.f32 %v505_v31, %v500_v38  ;;  %v494_v56 = vadd.f32 %v492_v45, %v475_v50  ;;  %v613_v38 = vld [vmem:[%s7632_s4] sm:$0x7]  ;;  %v703_v39 = vld [vmem:[%s7825_s2 + $0x8] sm:$0xff]  ;;  %v709_v50 = vld [vmem:[%s7825_s2 + $0x38] sm:$0xff] }
  0xa9   : > { %830 = vmatprep.mubr.f32.mxu1 %v703_v39  ;;  %v702_v45 = vld [vmem:[%s7825_s2] sm:$0xff]  ;;  %v756_v39 = vld [vmem:[%s7825_s2 + $0x1b0] sm:$0xff] }
  0xaa   : > { %v517_v46 = vpop.permute.xlu0 %516  ;;  %v511_v51 = vcombine.low %v507_v41, %v508_v42 }
  0xab   : > { %v519_v47 = vsel %vm518_vm3, %v515_v20, %v517_v46  ;;  %v520_v48 = vsel %vm518_vm3, %v517_v46, %v515_v20  ;;  %v576_v9 = vpop.permute.xlu1 %575  ;;  %v705_v46 = vld [vmem:[%s7825_s2 + $0x18] sm:$0xff] }
  0xac   : > { %v526_v52 = vmul.f32 %v4540_v32, %v520_v48  ;;  %v527_v53 = vmul.f32 %v524_v43, %v519_v47  ;;  %v513_v63 = vadd.f32 %v511_v51, %v494_v56  ;;  %v704_v47 = vld [vmem:[%s7825_s2 + $0x10] sm:$0xff]  ;;  %v707_v48 = vld [vmem:[%s7825_s2 + $0x28] sm:$0xff] }
  0xad   : > { %v708_v51 = vld [vmem:[%s7825_s2 + $0x30] sm:$0xff]  ;;  %v715_v56 = vld [vmem:[%s7825_s2 + $0x68] sm:$0xff] }
  0xae   : > { %v530_v57 = vcombine.low %v526_v52, %v527_v53  ;;  %v540_v58 = vpop.permute.xlu0 %539  ;;  %v711_v52 = vld [vmem:[%s7825_s2 + $0x48] sm:$0xff]  ;;  %v710_v53 = vld [vmem:[%s7825_s2 + $0x40] sm:$0xff] }
  0xaf   : > { %v542_v61 = vsel %vm541_vm4, %v538_v37, %v540_v58  ;;  %v543_v62 = vsel %vm541_vm4, %v540_v58, %v538_v37  ;;  %v595_v26 = vpop.permute.xlu1 %594  ;;  %v717_v58 = vld [vmem:[%s7825_s2 + $0x78] sm:$0xff] }
  0xb0   : > { %v532_v3 = vadd.f32 %v530_v57, %v513_v63  ;;  %v549_v6 = vmul.f32 %v4542_v49, %v542_v61  ;;  %v550_v7 = vmul.f32 %v547_v59, %v543_v62  ;;  %v706_v49 = vld [vmem:[%s7825_s2 + $0x20] sm:$0xff]  ;;  %v716_v59 = vld [vmem:[%s7825_s2 + $0x70] sm:$0xff]  ;;  %v721_v62 = vld [vmem:[%s7825_s2 + $0x98] sm:$0xff] }
  0xb1   : > { %v714_v57 = vld [vmem:[%s7825_s2 + $0x60] sm:$0xff]  ;;  %v720_v63 = vld [vmem:[%s7825_s2 + $0x90] sm:$0xff] }
  0xb2   : > { %v559_v8 = vpop.permute.xlu0 %558  ;;  %v536_v18 = vadd.f32 %v535_v5, %v532_v3  ;;  %v553_v19 = vcombine.low %v549_v6, %v550_v7  ;;  %v718_v61 = vld [vmem:[%s7825_s2 + $0x80] sm:$0xff]  ;;  %v725_v3 = vld [vmem:[%s7825_s2 + $0xb8] sm:$0xff]  ;;  %v724_v5 = vld [vmem:[%s7825_s2 + $0xb0] sm:$0xff] }
  0xb3   : > { %v561_v10 = vsel %vm560_vm5, %v557_v54, %v559_v8  ;;  %v562_v12 = vsel %vm560_vm5, %v559_v8, %v557_v54  ;;  %v713_v54 = vld [vmem:[%s7825_s2 + $0x58] sm:$0xff]  ;;  %v727_v6 = vld [vmem:[%s7825_s2 + $0xc8] sm:$0xff]  ;;  %v726_v7 = vld [vmem:[%s7825_s2 + $0xc0] sm:$0xff] }
  0xb4   : > { %v568_v13 = vmul.f32 %v4543_v55, %v561_v10  ;;  %v569_v14 = vmul.f32 %v566_v0, %v562_v12  ;;  %v555_v27 = vadd.f32 %v553_v19, %v536_v18  ;;  %v712_v55 = vld [vmem:[%s7825_s2 + $0x50] sm:$0xff]  ;;  %v723_v0 = vld [vmem:[%s7825_s2 + $0xa8] sm:$0xff]  ;;  %v729_v8 = vld [vmem:[%s7825_s2 + $0xd8] sm:$0xff] }
  0xb5   : > { %v731_v10 = vld [vmem:[%s7825_s2 + $0xe8] sm:$0xff]  ;;  %v730_v12 = vld [vmem:[%s7825_s2 + $0xe0] sm:$0xff]  ;;  %v737_v18 = vld [vmem:[%s7825_s2 + $0x118] sm:$0xff] }
  0xb6   : > { %v578_v20 = vpop.permute.xlu0 %577  ;;  %v572_v22 = vcombine.low %v568_v13, %v569_v14  ;;  %v733_v13 = vld [vmem:[%s7825_s2 + $0xf8] sm:$0xff]  ;;  %v732_v14 = vld [vmem:[%s7825_s2 + $0xf0] sm:$0xff] }
  0xb7   : > { %v580_v21 = vsel %vm579_vm6, %v576_v9, %v578_v20  ;;  %v581_v2 = vsel %vm579_vm6, %v578_v20, %v576_v9  ;;  %v728_v9 = vld [vmem:[%s7825_s2 + $0xd0] sm:$0xff]  ;;  %v739_v20 = vld [vmem:[%s7825_s2 + $0x128] sm:$0xff] }
  0xb8   : > { %v587_v23 = vmul.f32 %v4544_v1, %v580_v21  ;;  %v588_v24 = vmul.f32 %v585_v15, %v581_v2  ;;  %v574_v32 = vadd.f32 %v572_v22, %v555_v27  ;;  %v722_v1 = vld [vmem:[%s7825_s2 + $0xa0] sm:$0xff]  ;;  %v735_v15 = vld [vmem:[%s7825_s2 + $0x108] sm:$0xff]  ;;  %v736_v19 = vld [vmem:[%s7825_s2 + $0x110] sm:$0xff] }
  0xb9   : > { %v738_v21 = vld [vmem:[%s7825_s2 + $0x120] sm:$0xff]  ;;  %v741_v2 = vld [vmem:[%s7825_s2 + $0x138] sm:$0xff]  ;;  %v740_v22 = vld [vmem:[%s7825_s2 + $0x130] sm:$0xff] }
  0xba   : > { %v591_v28 = vcombine.low %v587_v23, %v588_v24  ;;  %v597_v29 = vpop.permute.xlu0 %596  ;;  %v743_v23 = vld [vmem:[%s7825_s2 + $0x148] sm:$0xff]  ;;  %v742_v24 = vld [vmem:[%s7825_s2 + $0x140] sm:$0xff] }
  0xbb   : > { %v599_v30 = vsel %vm598_vm7, %v595_v26, %v597_v29  ;;  %v600_v31 = vsel %vm598_vm7, %v597_v29, %v595_v26  ;;  %v744_v26 = vld [vmem:[%s7825_s2 + $0x150] sm:$0xff]  ;;  %v747_v27 = vld [vmem:[%s7825_s2 + $0x168] sm:$0xff]  ;;  %v749_v29 = vld [vmem:[%s7825_s2 + $0x178] sm:$0xff] }
  0xbc   : > { %v606_v33 = vmul.f32 %v4545_v17, %v599_v30  ;;  %v607_v34 = vmul.f32 %v604_v25, %v600_v31  ;;  %v593_v36 = vadd.f32 %v591_v28, %v574_v32  ;;  %v734_v17 = vld [vmem:[%s7825_s2 + $0x100] sm:$0xff]  ;;  %v745_v25 = vld [vmem:[%s7825_s2 + $0x158] sm:$0xff]  ;;  %v748_v30 = vld [vmem:[%s7825_s2 + $0x170] sm:$0xff] }
  0xbd   : > { %v746_v28 = vld [vmem:[%s7825_s2 + $0x160] sm:$0xff]  ;;  %v751_v31 = vld [vmem:[%s7825_s2 + $0x188] sm:$0xff] }
  0xbe   : > { %v610_v35 = vcombine.low %v606_v33, %v607_v34  ;;  %v750_v32 = vld [vmem:[%s7825_s2 + $0x180] sm:$0xff]  ;;  %v753_v33 = vld [vmem:[%s7825_s2 + $0x198] sm:$0xff]  ;;  %v752_v34 = vld [vmem:[%s7825_s2 + $0x190] sm:$0xff] }
  0xc0   : > { %v5035_v37 = vadd.f32 %v610_v35, %v593_v36  ;;  %v618_v40 = vpop.permute.xlu1 %617  ;;  %v755_v35 = vld [vmem:[%s7825_s2 + $0x1a8] sm:$0xff]  ;;  %v754_v36 = vld [vmem:[%s7825_s2 + $0x1a0] sm:$0xff] }
  0xc2   : > { %7823 = vst [vmem:[#allocation7_spill] sm:$0xff] %v5035_v37  ;;  %v5039_v11 = vcombine.high %v5035_v37, %v5035_v37 }
  0xc4   : > { %7824 = vst [vmem:[#allocation8_spill] sm:$0xff] %v5039_v11  ;;  %4546 = vmatprep.subr.msk.mxu0 %vm626_vm8, %v5039_v11 }
  0xc5   : > { %4547 = vmatpush1.msk.msra.mxu0 %vm626_vm8, %v5035_v37 }
  0xc6   : > { %4548 = vmatmul.mubr.msk.f32.vlgmr.msra.gmra.mrb[0].mxu0 %vm622_vm9, %v613_v38  ;;  %v757_v38 = vld [vmem:[%s7825_s2 + $0x1b8] sm:$0xff] }
  0xc7   : > { %1157 = vmatprep.mubr.f32.mxu0 %v7642_v4 }
 0x199   : > { %v697_v41 = vpop.f32.mrb[0].mxu0 }
 0x19a   : > { %v699_v42 = vpop.f32.mrb[1].mxu0  ;;  %v5055_v44 = vadd.f32 %v697_v41, %v618_v40  ;;  %v758_v41 = vld [vmem:[%s7825_s2 + $0x1c0] sm:$0xff] }
 0x19b   : > { %v5053_v43 = vadd.f32 %v699_v42, %v618_v40  ;;  %v759_v40 = vld [vmem:[%s7825_s2 + $0x1c8] sm:$0xff]  ;;  %v761_v42 = vld [vmem:[%s7825_s2 + $0x1d8] sm:$0xff] }
 0x19c   : > { %7827 = vst [vmem:[#allocation10_spill] sm:$0xff] %v5055_v44 }
 0x19d   : > { %7826 = vst [vmem:[#allocation9_spill] sm:$0xff] %v5053_v43  ;;  %766 = vmatprep.subr.mxu1 %v5053_v43  ;;  %4549 = vmatprep.subr.msk.mxu0 %vm626_vm8, %v5053_v43 }
 0x19e   : > { %767 = vmatpush1.xpose.msra.mxu1 %v5055_v44  ;;  %4550 = vmatpush1.msk.msra.mxu0 %vm626_vm8, %v5055_v44 }
 0x1a1   : > { %831 = vmatmul.mubr.f32.vlgmr.msra.gmra.mrb[0].mxu1 %v702_v45  ;;  %v760_v45 = vld [vmem:[%s7825_s2 + $0x1d0] sm:$0xff] }
 0x1a2   : > { %835 = vmatprep.mubr.f32.mxu1 %v705_v46  ;;  %v763_v46 = vld [vmem:[%s7825_s2 + $0x1e8] sm:$0xff] }
 0x1a5   : > { %836 = vmatmul.mubr.f32.gmra.mrb[2].mxu1 %v704_v47  ;;  %v762_v47 = vld [vmem:[%s7825_s2 + $0x1e0] sm:$0xff] }
 0x1a6   : > { %840 = vmatprep.mubr.f32.mxu1 %v707_v48  ;;  %v765_v48 = vld [vmem:[%s7825_s2 + $0x1f8] sm:$0xff] }
 0x1a9   : > { %841 = vmatmul.mubr.f32.gmra.mrb[4].mxu1 %v706_v49  ;;  %v764_v49 = vld [vmem:[%s7825_s2 + $0x1f0] sm:$0xff]  ;;  %s4775_s2 = scalar_lea.vmem %s7588_s22, 16 }
 0x1aa   : > { %845 = vmatprep.mubr.f32.mxu1 %v709_v50  ;;  %p4776_p11 = scmp.ne.s32.totalorder %s7588_s22, %s4775_s2  ;;  %p4783_p1 = scmp.lt.s32.totalorder %s4781_s0, %s4775_s2 }
 0x1ac   : > { %p4777_p12 = pnand %p4776_p11, %p4959_p5  ;;  %p4784_p2 = por %p4783_p1, %p4782_p0 }
 0x1ad   : > { %846 = vmatmul.mubr.f32.gmra.mrb[6].mxu1 %v708_v51 }
 0x1ae   : > { %850 = vmatprep.mubr.f32.mxu1 %v711_v52  ;;  %p4778_p13 = pneg %p4777_p12 }
 0x1b0   : > { %p4785_p3 = pnand %p4784_p2, %p4778_p13 }
 0x1b1   : > { %851 = vmatmul.mubr.f32.gmra.mrb[8].mxu1 %v710_v53 }
 0x1b2   : > { %855 = vmatprep.mubr.f32.mxu1 %v713_v54 }
 0x1b5   : > { %856 = vmatmul.mubr.f32.gmra.mrb[10].mxu1 %v712_v55 }
 0x1b6   : > { %860 = vmatprep.mubr.f32.mxu1 %v715_v56 }
 0x1b9   : > { %861 = vmatmul.mubr.f32.gmra.mrb[12].mxu1 %v714_v57 }
 0x1ba   : > { %865 = vmatprep.mubr.f32.mxu1 %v717_v58 }
 0x1bd   : > { %866 = vmatmul.mubr.f32.gmra.mrb[14].mxu1 %v716_v59 }
 0x1be   : > { %870 = vmatprep.mubr.f32.mxu1 %v719_v60 }
 0x1c1   : > { %871 = vmatmul.mubr.f32.gmra.mrb[16].mxu1 %v718_v61 }
 0x1c2   : > { %875 = vmatprep.mubr.f32.mxu1 %v721_v62 }
 0x1c5   : > { %876 = vmatmul.mubr.f32.gmra.mrb[18].mxu1 %v720_v63 }
 0x1c6   : > { %880 = vmatprep.mubr.f32.mxu1 %v723_v0 }
 0x1c9   : > { %881 = vmatmul.mubr.f32.gmra.mrb[20].mxu1 %v722_v1 }
 0x1ca   : > { %885 = vmatprep.mubr.f32.mxu1 %v725_v3 }
 0x1cd   : > { %886 = vmatmul.mubr.f32.gmra.mrb[22].mxu1 %v724_v5 }
 0x1ce   : > { %890 = vmatprep.mubr.f32.mxu1 %v727_v6 }
 0x1d1   : > { %891 = vmatmul.mubr.f32.gmra.mrb[24].mxu1 %v726_v7 }
 0x1d2   : > { %895 = vmatprep.mubr.f32.mxu1 %v729_v8 }
 0x1d5   : > { %896 = vmatmul.mubr.f32.gmra.mrb[26].mxu1 %v728_v9 }
 0x1d6   : > { %900 = vmatprep.mubr.f32.mxu1 %v731_v10 }
 0x1d9   : > { %901 = vmatmul.mubr.f32.gmra.mrb[28].mxu1 %v730_v12 }
 0x1da   : > { %905 = vmatprep.mubr.f32.mxu1 %v733_v13 }
 0x1dd   : > { %906 = vmatmul.mubr.f32.gmra.mrb[30].mxu1 %v732_v14 }
 0x1de   : > { %910 = vmatprep.mubr.f32.mxu1 %v735_v15 }
 0x1e1   : > { %911 = vmatmul.mubr.f32.gmra.mrb[32].mxu1 %v734_v17 }
 0x1e2   : > { %915 = vmatprep.mubr.f32.mxu1 %v737_v18 }
 0x1e5   : > { %916 = vmatmul.mubr.f32.gmra.mrb[34].mxu1 %v736_v19 }
 0x1e6   : > { %920 = vmatprep.mubr.f32.mxu1 %v739_v20 }
 0x1e9   : > { %921 = vmatmul.mubr.f32.gmra.mrb[36].mxu1 %v738_v21 }
 0x1ea   : > { %925 = vmatprep.mubr.f32.mxu1 %v741_v2 }
 0x1ed   : > { %926 = vmatmul.mubr.f32.gmra.mrb[38].mxu1 %v740_v22 }
 0x1ee   : > { %930 = vmatprep.mubr.f32.mxu1 %v743_v23 }
 0x1f1   : > { %931 = vmatmul.mubr.f32.gmra.mrb[40].mxu1 %v742_v24 }
 0x1f2   : > { %935 = vmatprep.mubr.f32.mxu1 %v745_v25 }
 0x1f5   : > { %936 = vmatmul.mubr.f32.gmra.mrb[42].mxu1 %v744_v26 }
 0x1f6   : > { %940 = vmatprep.mubr.f32.mxu1 %v747_v27 }
 0x1f9   : > { %941 = vmatmul.mubr.f32.gmra.mrb[44].mxu1 %v746_v28 }
 0x1fa   : > { %945 = vmatprep.mubr.f32.mxu1 %v749_v29 }
 0x1fd   : > { %946 = vmatmul.mubr.f32.gmra.mrb[46].mxu1 %v748_v30 }
 0x1fe   : > { %950 = vmatprep.mubr.f32.mxu1 %v751_v31 }
 0x201   : > { %951 = vmatmul.mubr.f32.gmra.mrb[48].mxu1 %v750_v32 }
 0x202   : > { %955 = vmatprep.mubr.f32.mxu1 %v753_v33 }
 0x205   : > { %956 = vmatmul.mubr.f32.gmra.mrb[50].mxu1 %v752_v34 }
 0x206   : > { %960 = vmatprep.mubr.f32.mxu1 %v755_v35 }
 0x209   : > { %961 = vmatmul.mubr.f32.gmra.mrb[52].mxu1 %v754_v36 }
 0x20a   : > { %965 = vmatprep.mubr.f32.mxu1 %v757_v38 }
 0x20d   : > { %966 = vmatmul.mubr.f32.gmra.mrb[54].mxu1 %v756_v39 }
 0x20e   : > { %970 = vmatprep.mubr.f32.mxu1 %v759_v40 }
 0x211   : > { %971 = vmatmul.mubr.f32.gmra.mrb[56].mxu1 %v758_v41 }
 0x212   : > { %975 = vmatprep.mubr.f32.mxu1 %v761_v42 }
 0x215   : > { %976 = vmatmul.mubr.f32.gmra.mrb[58].mxu1 %v760_v45 }
 0x216   : > { %980 = vmatprep.mubr.f32.mxu1 %v763_v46 }
 0x219   : > { %981 = vmatmul.mubr.f32.gmra.mrb[60].mxu1 %v762_v47 }
 0x21a   : > { %985 = vmatprep.mubr.f32.mxu1 %v765_v48 }
 0x21d   : > { %986 = vmatmul.mubr.f32.gmra.mrb[62].mxu1 %v764_v49 }
 0x274   : > { %v832_v50 = vpop.f32.mrb[0].mxu1 }
 0x275   : > { %v834_v51 = vpop.f32.mrb[1].mxu1  ;;  %4551 = vmatmul.mubr.msk.f32.vlgmr.msra.gmra.mrb[2].mxu0 %vm622_vm9, %v832_v50 }
 0x276   : > { %1163 = vmatprep.mubr.f32.mxu0 %v7642_v4 }
 0x278   : > { %v837_v52 = vpop.f32.mrb[2].mxu1 }
 0x279   : > { %v839_v53 = vpop.f32.mrb[3].mxu1  ;;  %4552 = vmatmul.mubr.msk.f32.gmra.mrb[4].mxu0 %vm622_vm9, %v837_v52 }
 0x27a   : > { %1169 = vmatprep.mubr.f32.mxu0 %v7642_v4 }
 0x27c   : > { %v842_v54 = vpop.f32.mrb[4].mxu1 }
 0x27d   : > { %v844_v55 = vpop.f32.mrb[5].mxu1  ;;  %4553 = vmatmul.mubr.msk.f32.gmra.mrb[6].mxu0 %vm622_vm9, %v842_v54 }
 0x27e   : > { %1175 = vmatprep.mubr.f32.mxu0 %v7642_v4 }
 0x280   : > { %v847_v56 = vpop.f32.mrb[6].mxu1 }
 0x281   : > { %v849_v57 = vpop.f32.mrb[7].mxu1  ;;  %4554 = vmatmul.mubr.msk.f32.gmra.mrb[8].mxu0 %vm622_vm9, %v847_v56  ;;  %v1350_v56 = vmul.f32 %v5055_v44, %v5055_v44 }
 0x282   : > { %1181 = vmatprep.mubr.f32.mxu0 %v7642_v4  ;;  %v1351_v57 = vmul.f32 %v5053_v43, %v5053_v43 }
 0x284   : > { %v852_v58 = vpop.f32.mrb[8].mxu1 }
 0x285   : > { %v854_v59 = vpop.f32.mrb[9].mxu1  ;;  %4555 = vmatmul.mubr.msk.f32.gmra.mrb[10].mxu0 %vm622_vm9, %v852_v58  ;;  %v1352_v58 = vsel %vm626_vm8, %v1350_v56, 0.0 }
 0x286   : > { %1187 = vmatprep.mubr.f32.mxu0 %v7642_v4  ;;  %v1359_v59 = vsel %vm626_vm8, %v1351_v57, 0.0 }
 0x288   : > { %v857_v60 = vpop.f32.mrb[10].mxu1 }
 0x289   : > { %v859_v61 = vpop.f32.mrb[11].mxu1  ;;  %4556 = vmatmul.mubr.msk.f32.gmra.mrb[12].mxu0 %vm622_vm9, %v857_v60  ;;  %v1353_v60 = vrot.slane %v1352_v58, 4 }
 0x28a   : > { %1193 = vmatprep.mubr.f32.mxu0 %v7642_v4  ;;  %v1360_v61 = vrot.slane %v1359_v59, 4 }
 0x28c   : > { %v862_v62 = vpop.f32.mrb[12].mxu1 }
 0x28d   : > { %v864_v63 = vpop.f32.mrb[13].mxu1  ;;  %4557 = vmatmul.mubr.msk.f32.gmra.mrb[14].mxu0 %vm622_vm9, %v862_v62  ;;  %v1354_v62 = vadd.f32 %v1353_v60, %v1352_v58 }
 0x28e   : > { %1199 = vmatprep.mubr.f32.mxu0 %v7642_v4  ;;  %v1361_v63 = vadd.f32 %v1360_v61, %v1359_v59 }
 0x290   : > { %v867_v0 = vpop.f32.mrb[14].mxu1 }
 0x291   : > { %v869_v1 = vpop.f32.mrb[15].mxu1  ;;  %4558 = vmatmul.mubr.msk.f32.gmra.mrb[16].mxu0 %vm622_vm9, %v867_v0  ;;  %v1355_v0 = vrot.slane %v1354_v62, 2 }
 0x292   : > { %1205 = vmatprep.mubr.f32.mxu0 %v7642_v4  ;;  %v1362_v1 = vrot.slane %v1361_v63, 2 }
 0x294   : > { %v872_v3 = vpop.f32.mrb[16].mxu1 }
 0x295   : > { %v874_v5 = vpop.f32.mrb[17].mxu1  ;;  %4559 = vmatmul.mubr.msk.f32.gmra.mrb[18].mxu0 %vm622_vm9, %v872_v3  ;;  %v1356_v3 = vadd.f32 %v1355_v0, %v1354_v62 }
 0x296   : > { %1211 = vmatprep.mubr.f32.mxu0 %v7642_v4  ;;  %v1363_v5 = vadd.f32 %v1362_v1, %v1361_v63 }
 0x298   : > { %v877_v6 = vpop.f32.mrb[18].mxu1 }
 0x299   : > { %v879_v7 = vpop.f32.mrb[19].mxu1  ;;  %4560 = vmatmul.mubr.msk.f32.gmra.mrb[20].mxu0 %vm622_vm9, %v877_v6  ;;  %v1357_v6 = vrot.slane %v1356_v3, 1 }
 0x29a   : > { %1217 = vmatprep.mubr.f32.mxu0 %v7642_v4  ;;  %v1364_v7 = vrot.slane %v1363_v5, 1 }
 0x29c   : > { %v882_v8 = vpop.f32.mrb[20].mxu1 }
 0x29d   : > { %v884_v9 = vpop.f32.mrb[21].mxu1  ;;  %4561 = vmatmul.mubr.msk.f32.gmra.mrb[22].mxu0 %vm622_vm9, %v882_v8 }
 0x29e   : > { %1223 = vmatprep.mubr.f32.mxu0 %v7642_v4  ;;  %v5322_v9 = vadd.f32 %v1357_v6, %v1356_v3 }
 0x2a0   : > { %v887_v10 = vpop.f32.mrb[22].mxu1 }
 0x2a1   : > { %v889_v12 = vpop.f32.mrb[23].mxu1  ;;  %4562 = vmatmul.mubr.msk.f32.gmra.mrb[24].mxu0 %vm622_vm9, %v887_v10 }
 0x2a2   : > { %1229 = vmatprep.mubr.f32.mxu0 %v7642_v4 }
 0x2a4   : > { %v892_v13 = vpop.f32.mrb[24].mxu1 }
 0x2a5   : > { %v894_v14 = vpop.f32.mrb[25].mxu1  ;;  %4563 = vmatmul.mubr.msk.f32.gmra.mrb[26].mxu0 %vm622_vm9, %v892_v13  ;;  %v5324_v13 = vadd.f32 %v1364_v7, %v1363_v5 }
 0x2a6   : > { %1235 = vmatprep.mubr.f32.mxu0 %v7642_v4 }
 0x2a8   : > { %v897_v15 = vpop.f32.mrb[26].mxu1 }
 0x2a9   : > { %v899_v17 = vpop.f32.mrb[27].mxu1  ;;  %4564 = vmatmul.mubr.msk.f32.gmra.mrb[28].mxu0 %vm622_vm9, %v897_v15 }
 0x2aa   : > { %1241 = vmatprep.mubr.f32.mxu0 %v7642_v4 }
 0x2ac   : > { %v902_v18 = vpop.f32.mrb[28].mxu1 }
 0x2ad   : > { %v904_v19 = vpop.f32.mrb[29].mxu1  ;;  %4565 = vmatmul.mubr.msk.f32.gmra.mrb[30].mxu0 %vm622_vm9, %v902_v18 }
 0x2ae   : > { %1247 = vmatprep.mubr.f32.mxu0 %v7642_v4 }
 0x2b0   : > { %v907_v20 = vpop.f32.mrb[30].mxu1 }
 0x2b1   : > { %v909_v21 = vpop.f32.mrb[31].mxu1  ;;  %4566 = vmatmul.mubr.msk.f32.gmra.mrb[32].mxu0 %vm622_vm9, %v907_v20 }
 0x2b2   : > { %1253 = vmatprep.mubr.f32.mxu0 %v7642_v4 }
 0x2b4   : > { %v912_v2 = vpop.f32.mrb[32].mxu1 }
 0x2b5   : > { %v914_v22 = vpop.f32.mrb[33].mxu1  ;;  %4567 = vmatmul.mubr.msk.f32.gmra.mrb[34].mxu0 %vm622_vm9, %v912_v2 }
 0x2b6   : > { %1259 = vmatprep.mubr.f32.mxu0 %v7642_v4 }
 0x2b8   : > { %v917_v23 = vpop.f32.mrb[34].mxu1 }
 0x2b9   : > { %v919_v24 = vpop.f32.mrb[35].mxu1  ;;  %4568 = vmatmul.mubr.msk.f32.gmra.mrb[36].mxu0 %vm622_vm9, %v917_v23 }
 0x2ba   : > { %1265 = vmatprep.mubr.f32.mxu0 %v7642_v4 }
 0x2bc   : > { %v922_v25 = vpop.f32.mrb[36].mxu1 }
 0x2bd   : > { %4569 = vmatmul.mubr.msk.f32.gmra.mrb[38].mxu0 %vm622_vm9, %v922_v25  ;;  %v924_v26 = vpop.f32.mrb[37].mxu1 }
 0x2be   : > { %1271 = vmatprep.mubr.f32.mxu0 %v7642_v4 }
 0x2c0   : > { %v927_v27 = vpop.f32.mrb[38].mxu1 }
 0x2c1   : > { %4570 = vmatmul.mubr.msk.f32.gmra.mrb[40].mxu0 %vm622_vm9, %v927_v27  ;;  %v929_v28 = vpop.f32.mrb[39].mxu1 }
 0x2c2   : > { %1277 = vmatprep.mubr.f32.mxu0 %v7642_v4 }
 0x2c4   : > { %v932_v29 = vpop.f32.mrb[40].mxu1 }
 0x2c5   : > { %4571 = vmatmul.mubr.msk.f32.gmra.mrb[42].mxu0 %vm622_vm9, %v932_v29  ;;  %v934_v30 = vpop.f32.mrb[41].mxu1 }
 0x2c6   : > { %1283 = vmatprep.mubr.f32.mxu0 %v7642_v4 }
 0x2c8   : > { %v937_v31 = vpop.f32.mrb[42].mxu1 }
 0x2c9   : > { %4572 = vmatmul.mubr.msk.f32.gmra.mrb[44].mxu0 %vm622_vm9, %v937_v31  ;;  %v939_v32 = vpop.f32.mrb[43].mxu1 }
 0x2ca   : > { %1289 = vmatprep.mubr.f32.mxu0 %v7642_v4 }
 0x2cc   : > { %v942_v33 = vpop.f32.mrb[44].mxu1 }
 0x2cd   : > { %4573 = vmatmul.mubr.msk.f32.gmra.mrb[46].mxu0 %vm622_vm9, %v942_v33  ;;  %v944_v34 = vpop.f32.mrb[45].mxu1 }
 0x2ce   : > { %1295 = vmatprep.mubr.f32.mxu0 %v7642_v4 }
 0x2d0   : > { %v947_v35 = vpop.f32.mrb[46].mxu1 }
 0x2d1   : > { %4574 = vmatmul.mubr.msk.f32.gmra.mrb[48].mxu0 %vm622_vm9, %v947_v35  ;;  %v949_v36 = vpop.f32.mrb[47].mxu1 }
 0x2d2   : > { %1301 = vmatprep.mubr.f32.mxu0 %v7642_v4 }
 0x2d4   : > { %v952_v38 = vpop.f32.mrb[48].mxu1 }
 0x2d5   : > { %4575 = vmatmul.mubr.msk.f32.gmra.mrb[50].mxu0 %vm622_vm9, %v952_v38  ;;  %v954_v39 = vpop.f32.mrb[49].mxu1 }
 0x2d6   : > { %1307 = vmatprep.mubr.f32.mxu0 %v7642_v4 }
 0x2d8   : > { %v957_v40 = vpop.f32.mrb[50].mxu1 }
 0x2d9   : > { %4576 = vmatmul.mubr.msk.f32.gmra.mrb[52].mxu0 %vm622_vm9, %v957_v40  ;;  %v959_v41 = vpop.f32.mrb[51].mxu1 }
 0x2da   : > { %1313 = vmatprep.mubr.f32.mxu0 %v7642_v4 }
 0x2dc   : > { %v962_v42 = vpop.f32.mrb[52].mxu1 }
 0x2dd   : > { %4577 = vmatmul.mubr.msk.f32.gmra.mrb[54].mxu0 %vm622_vm9, %v962_v42  ;;  %v964_v45 = vpop.f32.mrb[53].mxu1 }
 0x2de   : > { %1319 = vmatprep.mubr.f32.mxu0 %v7642_v4 }
 0x2e0   : > { %v967_v46 = vpop.f32.mrb[54].mxu1 }
 0x2e1   : > { %4578 = vmatmul.mubr.msk.f32.gmra.mrb[56].mxu0 %vm622_vm9, %v967_v46  ;;  %v969_v47 = vpop.f32.mrb[55].mxu1 }
 0x2e2   : > { %1325 = vmatprep.mubr.f32.mxu0 %v7642_v4 }
 0x2e4   : > { %v972_v48 = vpop.f32.mrb[56].mxu1 }
 0x2e5   : > { %4579 = vmatmul.mubr.msk.f32.gmra.mrb[58].mxu0 %vm622_vm9, %v972_v48  ;;  %v974_v49 = vpop.f32.mrb[57].mxu1 }
 0x2e6   : > { %1331 = vmatprep.mubr.f32.mxu0 %v7642_v4 }
 0x2e8   : > { %v977_v50 = vpop.f32.mrb[58].mxu1 }
 0x2e9   : > { %4580 = vmatmul.mubr.msk.f32.gmra.mrb[60].mxu0 %vm622_vm9, %v977_v50  ;;  %v979_v51 = vpop.f32.mrb[59].mxu1 }
 0x2ea   : > { %1337 = vmatprep.mubr.f32.mxu0 %v7642_v4 }
 0x2ec   : > { %v982_v52 = vpop.f32.mrb[60].mxu1 }
 0x2ed   : > { %4581 = vmatmul.mubr.msk.f32.gmra.mrb[62].mxu0 %vm622_vm9, %v982_v52  ;;  %v984_v53 = vpop.f32.mrb[61].mxu1 }
 0x2ee   : > { %1343 = vmatprep.mubr.f32.mxu0 %v7642_v4 }
 0x2f0   : > { %v987_v54 = vpop.f32.mrb[62].mxu1 }
 0x2f1   : > { %4582 = vmatmul.mubr.msk.f32.gmra.mrb[64].mxu0 %vm622_vm9, %v987_v54  ;;  %v989_v55 = vpop.f32.mrb[63].mxu1 }
 0x2f2   : > { %4435 = vmatprep.mubr.f32.mxu0 %v7642_v4 }
 0x348   : > { %v1159_v8 = vpop.f32.mrb[2].mxu0 }
 0x349   : > { %v1366_v10 = vmul.f32 2.0, %v1159_v8  ;;  %v1161_v12 = vpop.f32.mrb[3].mxu0 }
 0x34a   : > { %v1367_v14 = vmul.f32 2.0, %v1161_v12 }
 0x34b   : > { %v5327_v15 = vsub.f32 %v5322_v9, %v1366_v10 }
 0x34c   : > { %v5330_v17 = vsub.f32 %v5324_v13, %v1367_v14  ;;  %v1165_v18 = vpop.f32.mrb[4].mxu0 }
 0x34d   : > { %v1368_v19 = vmul.f32 2.0, %v1165_v18  ;;  %v1167_v20 = vpop.f32.mrb[5].mxu0 }
 0x34e   : > { %v1369_v21 = vmul.f32 2.0, %v1167_v20  ;;  %v1494_v2 = vmin.f32 %v5327_v15, %v5330_v17 }
 0x34f   : > { %v5335_v22 = vsub.f32 %v5322_v9, %v1368_v19 }
 0x350   : > { %v5338_v23 = vsub.f32 %v5324_v13, %v1369_v21  ;;  %1495 = vmin.xlane.f32.xlu0 %v1494_v2  ;;  %v1171_v24 = vpop.f32.mrb[6].mxu0 }
 0x351   : > { %v1370_v25 = vmul.f32 2.0, %v1171_v24  ;;  %v1173_v26 = vpop.f32.mrb[7].mxu0 }
 0x352   : > { %v1371_v27 = vmul.f32 2.0, %v1173_v26  ;;  %v1497_v28 = vmin.f32 %v5335_v22, %v5338_v23 }
 0x353   : > { %v5343_v29 = vsub.f32 %v5322_v9, %v1370_v25 }
 0x354   : > { %v5346_v30 = vsub.f32 %v5324_v13, %v1371_v27  ;;  %1498 = vmin.xlane.f32.xlu0 %v1497_v28  ;;  %v1177_v31 = vpop.f32.mrb[8].mxu0 }
 0x355   : > { %v1372_v32 = vmul.f32 2.0, %v1177_v31  ;;  %v1179_v33 = vpop.f32.mrb[9].mxu0 }
 0x356   : > { %v1373_v34 = vmul.f32 2.0, %v1179_v33  ;;  %v1500_v35 = vmin.f32 %v5343_v29, %v5346_v30 }
 0x357   : > { %v5351_v36 = vsub.f32 %v5322_v9, %v1372_v32 }
 0x358   : > { %v5354_v38 = vsub.f32 %v5324_v13, %v1373_v34  ;;  %1501 = vmin.xlane.f32.xlu1 %v1500_v35  ;;  %v1183_v39 = vpop.f32.mrb[10].mxu0 }
 0x359   : > { %v1374_v40 = vmul.f32 2.0, %v1183_v39  ;;  %v1185_v41 = vpop.f32.mrb[11].mxu0 }
 0x35a   : > { %v1375_v42 = vmul.f32 2.0, %v1185_v41  ;;  %v1503_v45 = vmin.f32 %v5351_v36, %v5354_v38 }
 0x35b   : > { %v5359_v46 = vsub.f32 %v5322_v9, %v1374_v40 }
 0x35c   : > { %v5362_v47 = vsub.f32 %v5324_v13, %v1375_v42  ;;  %1504 = vmin.xlane.f32.xlu0 %v1503_v45  ;;  %v1189_v48 = vpop.f32.mrb[12].mxu0 }
 0x35d   : > { %v1376_v49 = vmul.f32 2.0, %v1189_v48  ;;  %v1191_v50 = vpop.f32.mrb[13].mxu0 }
 0x35e   : > { %v1377_v51 = vmul.f32 2.0, %v1191_v50  ;;  %v1506_v52 = vmin.f32 %v5359_v46, %v5362_v47 }
 0x35f   : > { %v5367_v53 = vsub.f32 %v5322_v9, %v1376_v49 }
 0x360   : > { %v5370_v54 = vsub.f32 %v5324_v13, %v1377_v51  ;;  %1507 = vmin.xlane.f32.xlu1 %v1506_v52  ;;  %v1195_v55 = vpop.f32.mrb[14].mxu0 }
 0x361   : > { %v1378_v56 = vmul.f32 2.0, %v1195_v55  ;;  %v1197_v57 = vpop.f32.mrb[15].mxu0 }
 0x362   : > { %v1379_v58 = vmul.f32 2.0, %v1197_v57  ;;  %v1509_v59 = vmin.f32 %v5367_v53, %v5370_v54 }
 0x363   : > { %v5375_v60 = vsub.f32 %v5322_v9, %v1378_v56 }
 0x364   : > { %v5378_v61 = vsub.f32 %v5324_v13, %v1379_v58  ;;  %1510 = vmin.xlane.f32.xlu0 %v1509_v59  ;;  %v1201_v62 = vpop.f32.mrb[16].mxu0 }
 0x365   : > { %v1380_v63 = vmul.f32 2.0, %v1201_v62  ;;  %v1203_v0 = vpop.f32.mrb[17].mxu0 }
 0x366   : > { %v1381_v1 = vmul.f32 2.0, %v1203_v0  ;;  %v1512_v3 = vmin.f32 %v5375_v60, %v5378_v61 }
 0x367   : > { %v5383_v5 = vsub.f32 %v5322_v9, %v1380_v63 }
 0x368   : > { %v5386_v6 = vsub.f32 %v5324_v13, %v1381_v1  ;;  %1513 = vmin.xlane.f32.xlu1 %v1512_v3  ;;  %v1207_v7 = vpop.f32.mrb[18].mxu0 }
 0x369   : > { %7828 = vst [vmem:[#allocation11_spill] sm:$0xff] %v5383_v5  ;;  %v1382_v8 = vmul.f32 2.0, %v1207_v7  ;;  %v1209_v10 = vpop.f32.mrb[19].mxu0 }
 0x36a   : > { %7829 = vst [vmem:[#allocation12_spill] sm:$0xff] %v5386_v6  ;;  %v1383_v12 = vmul.f32 2.0, %v1209_v10  ;;  %v1515_v14 = vmin.f32 %v5383_v5, %v5386_v6 }
 0x36b   : > { %v5391_v18 = vsub.f32 %v5322_v9, %v1382_v8 }
 0x36c   : > { %v5394_v19 = vsub.f32 %v5324_v13, %v1383_v12  ;;  %1516 = vmin.xlane.f32.xlu0 %v1515_v14  ;;  %v1213_v20 = vpop.f32.mrb[20].mxu0 }
 0x36d   : > { %7830 = vst [vmem:[#allocation13_spill] sm:$0xff] %v5391_v18  ;;  %v1384_v21 = vmul.f32 2.0, %v1213_v20  ;;  %v1215_v2 = vpop.f32.mrb[21].mxu0 }
 0x36e   : > { %7831 = vst [vmem:[#allocation14_spill] sm:$0xff] %v5394_v19  ;;  %v1385_v24 = vmul.f32 2.0, %v1215_v2  ;;  %v1518_v25 = vmin.f32 %v5391_v18, %v5394_v19 }
 0x36f   : > { %v5399_v26 = vsub.f32 %v5322_v9, %v1384_v21 }
 0x370   : > { %v5402_v27 = vsub.f32 %v5324_v13, %v1385_v24  ;;  %1519 = vmin.xlane.f32.xlu1 %v1518_v25  ;;  %v1219_v28 = vpop.f32.mrb[22].mxu0 }
 0x371   : > { %7832 = vst [vmem:[#allocation15_spill] sm:$0xff] %v5399_v26  ;;  %v1221_v31 = vpop.f32.mrb[23].mxu0  ;;  %v1386_v63 = vmul.f32 2.0, %v1219_v28 }
 0x372   : > { %7833 = vst [vmem:[#allocation16_spill] sm:$0xff] %v5402_v27  ;;  %v1521_v32 = vmin.f32 %v5399_v26, %v5402_v27  ;;  %v1387_v0 = vmul.f32 2.0, %v1221_v31 }
 0x373   : > { %v5427_v2 = vsub.f32 %v5322_v9, %v1386_v63 }
 0x374   : > { %1522 = vmin.xlane.f32.xlu0 %v1521_v32  ;;  %v1225_v33 = vpop.f32.mrb[24].mxu0  ;;  %v5430_v24 = vsub.f32 %v5324_v13, %v1387_v0 }
 0x375   : > { %v1227_v34 = vpop.f32.mrb[25].mxu0  ;;  %v1388_v55 = vmul.f32 2.0, %v1225_v33  ;;  %7840 = vst [vmem:[#allocation23_spill] sm:$0xff] %v5427_v2 }
 0x376   : > { %v1389_v56 = vmul.f32 2.0, %v1227_v34  ;;  %7841 = vst [vmem:[#allocation24_spill] sm:$0xff] %v5430_v24 }
 0x377   : > { %v5413_v7 = vsub.f32 %v5322_v9, %v1388_v55 }
 0x378   : > { %v1231_v35 = vpop.f32.mrb[26].mxu0  ;;  %v5416_v8 = vsub.f32 %v5324_v13, %v1389_v56 }
 0x379   : > { %v1233_v39 = vpop.f32.mrb[27].mxu0  ;;  %7836 = vst [vmem:[#allocation19_spill] sm:$0xff] %v5413_v7  ;;  %v1390_v34 = vmul.f32 2.0, %v1231_v35 }
 0x37a   : > { %7837 = vst [vmem:[#allocation20_spill] sm:$0xff] %v5416_v8  ;;  %v1527_v32 = vmin.f32 %v5413_v7, %v5416_v8 }
 0x37c   : > { %v1237_v40 = vpop.f32.mrb[28].mxu0 }
 0x37d   : > { %v1239_v41 = vpop.f32.mrb[29].mxu0 }
 0x37e   : > { %v1393_v55 = vmul.f32 2.0, %v1239_v41 }
 0x380   : > { %v1243_v42 = vpop.f32.mrb[30].mxu0 }
 0x381   : > { %v1245_v45 = vpop.f32.mrb[31].mxu0 }
 0x384   : > { %v1249_v48 = vpop.f32.mrb[32].mxu0 }
 0x385   : > { %v1251_v49 = vpop.f32.mrb[33].mxu0 }
 0x388   : > { %v1255_v50 = vpop.f32.mrb[34].mxu0 }
 0x389   : > { %v1398_v51 = vmul.f32 2.0, %v1255_v50  ;;  %v1257_v52 = vpop.f32.mrb[35].mxu0  ;;  %v1391_v50 = vmul.f32 2.0, %v1233_v39  ;;  %v5448_v39 = vsub.f32 %v5322_v9, %v1390_v34 }
 0x38a   : > { %v1399_v57 = vmul.f32 2.0, %v1257_v52  ;;  %v1392_v52 = vmul.f32 2.0, %v1237_v40 }
 0x38b   : > { %v5407_v58 = vsub.f32 %v5322_v9, %v1398_v51  ;;  %7844 = vst [vmem:[#allocation27_spill] sm:$0xff] %v5448_v39  ;;  %v5451_v40 = vsub.f32 %v5324_v13, %v1391_v50 }
 0x38c   : > { %v5410_v59 = vsub.f32 %v5324_v13, %v1399_v57  ;;  %v1261_v62 = vpop.f32.mrb[36].mxu0 }
 0x38d   : > { %7834 = vst [vmem:[#allocation17_spill] sm:$0xff] %v5407_v58  ;;  %v1400_v1 = vmul.f32 2.0, %v1261_v62  ;;  %v1263_v3 = vpop.f32.mrb[37].mxu0  ;;  %7845 = vst [vmem:[#allocation28_spill] sm:$0xff] %v5451_v40  ;;  %v1530_v50 = vmin.f32 %v5448_v39, %v5451_v40 }
 0x38e   : > { %7835 = vst [vmem:[#allocation18_spill] sm:$0xff] %v5410_v59  ;;  %v1401_v10 = vmul.f32 2.0, %v1263_v3  ;;  %v1542_v12 = vmin.f32 %v5407_v58, %v5410_v59 }
 0x38f   : > { %v5421_v14 = vsub.f32 %v5322_v9, %v1400_v1  ;;  %v1524_v1 = vmin.f32 %v5427_v2, %v5430_v24 }
 0x390   : > { %v5424_v20 = vsub.f32 %v5324_v13, %v1401_v10  ;;  %1543 = vmin.xlane.f32.xlu0 %v1542_v12  ;;  %v1267_v21 = vpop.f32.mrb[38].mxu0  ;;  %v5457_v10 = vsub.f32 %v5322_v9, %v1392_v52  ;;  %v5460_v12 = vsub.f32 %v5324_v13, %v1393_v55  ;;  %v1396_v52 = vmul.f32 2.0, %v1249_v48 }
 0x391   : > { %7838 = vst [vmem:[#allocation21_spill] sm:$0xff] %v5421_v14  ;;  %v1269_v25 = vpop.f32.mrb[39].mxu0  ;;  %v1402_v28 = vmul.f32 2.0, %v1267_v21  ;;  %v1397_v55 = vmul.f32 2.0, %v1251_v49 }
 0x392   : > { %7839 = vst [vmem:[#allocation22_spill] sm:$0xff] %v5424_v20  ;;  %v1403_v31 = vmul.f32 2.0, %v1269_v25  ;;  %v1545_v33 = vmin.f32 %v5421_v14, %v5424_v20  ;;  %7847 = vst [vmem:[#allocation30_spill] sm:$0xff] %v5460_v12 }
 0x393   : > { %v5437_v62 = vsub.f32 %v5322_v9, %v1402_v28 }
 0x394   : > { %1528 = vmin.xlane.f32.xlu0 %v1527_v32  ;;  %1546 = vmin.xlane.f32.xlu1 %v1545_v33  ;;  %v1273_v51 = vpop.f32.mrb[40].mxu0  ;;  %v5440_v63 = vsub.f32 %v5324_v13, %v1403_v31  ;;  %v1394_v33 = vmul.f32 2.0, %v1243_v42  ;;  %v1533_v42 = vmin.f32 %v5457_v10, %v5460_v12 }
 0x395   : > { %v1404_v56 = vmul.f32 2.0, %v1273_v51  ;;  %v1275_v57 = vpop.f32.mrb[41].mxu0  ;;  %7842 = vst [vmem:[#allocation25_spill] sm:$0xff] %v5437_v62  ;;  %v1395_v51 = vmul.f32 2.0, %v1245_v45 }
 0x396   : > { %7843 = vst [vmem:[#allocation26_spill] sm:$0xff] %v5440_v63  ;;  %v1405_v0 = vmul.f32 2.0, %v1275_v57  ;;  %v1548_v31 = vmin.f32 %v5437_v62, %v5440_v63  ;;  %v5483_v48 = vsub.f32 %v5322_v9, %v1394_v33 }
 0x397   : > { %v5445_v35 = vsub.f32 %v5322_v9, %v1404_v56  ;;  %v5486_v49 = vsub.f32 %v5324_v13, %v1395_v51 }
 0x398   : > { %v5454_v41 = vsub.f32 %v5324_v13, %v1405_v0  ;;  %1525 = vmin.xlane.f32.xlu1 %v1524_v1  ;;  %v1279_v3 = vpop.f32.mrb[42].mxu0  ;;  %7852 = vst [vmem:[#allocation35_spill] sm:$0xff] %v5483_v48 }
 0x399   : > { %v1281_v21 = vpop.f32.mrb[43].mxu0  ;;  %v1406_v25 = vmul.f32 2.0, %v1279_v3  ;;  %7853 = vst [vmem:[#allocation36_spill] sm:$0xff] %v5486_v49 }
 0x39a   : > { %7846 = vst [vmem:[#allocation29_spill] sm:$0xff] %v5454_v41  ;;  %v1407_v28 = vmul.f32 2.0, %v1281_v21  ;;  %v1551_v32 = vmin.f32 %v5445_v35, %v5454_v41 }
 0x39b   : > { %v5469_v0 = vsub.f32 %v5322_v9, %v1406_v25  ;;  %v5489_v25 = vsub.f32 %v5322_v9, %v1396_v52  ;;  %v1536_v52 = vmin.f32 %v5483_v48, %v5486_v49 }
 0x39c   : > { %1549 = vmin.xlane.f32.xlu1 %v1548_v31  ;;  %1552 = vmin.xlane.f32.xlu0 %v1551_v32  ;;  %v1285_v34 = vpop.f32.mrb[44].mxu0  ;;  %v5472_v1 = vsub.f32 %v5324_v13, %v1407_v28  ;;  %v5492_v28 = vsub.f32 %v5324_v13, %v1397_v55 }
 0x39d   : > { %v1408_v56 = vmul.f32 2.0, %v1285_v34  ;;  %v1287_v57 = vpop.f32.mrb[45].mxu0  ;;  %7848 = vst [vmem:[#allocation31_spill] sm:$0xff] %v5469_v0  ;;  %7854 = vst [vmem:[#allocation37_spill] sm:$0xff] %v5489_v25 }
 0x39e   : > { %7849 = vst [vmem:[#allocation32_spill] sm:$0xff] %v5472_v1  ;;  %v1409_v3 = vmul.f32 2.0, %v1287_v57  ;;  %7855 = vst [vmem:[#allocation38_spill] sm:$0xff] %v5492_v28 }
 0x39f   : > { %v5477_v21 = vsub.f32 %v5322_v9, %v1408_v56 }
 0x3a0   : > { %v5480_v31 = vsub.f32 %v5324_v13, %v1409_v3  ;;  %1531 = vmin.xlane.f32.xlu1 %v1530_v50  ;;  %1534 = vmin.xlane.f32.xlu0 %v1533_v42  ;;  %v1291_v45 = vpop.f32.mrb[46].mxu0  ;;  %v1554_v50 = vmin.f32 %v5469_v0, %v5472_v1 }
 0x3a1   : > { %7850 = vst [vmem:[#allocation33_spill] sm:$0xff] %v5477_v21  ;;  %v1293_v32 = vpop.f32.mrb[47].mxu0  ;;  %v1410_v34 = vmul.f32 2.0, %v1291_v45 }
 0x3a2   : > { %7851 = vst [vmem:[#allocation34_spill] sm:$0xff] %v5480_v31  ;;  %v1411_v56 = vmul.f32 2.0, %v1293_v32  ;;  %v1557_v57 = vmin.f32 %v5477_v21, %v5480_v31  ;;  %v1539_v32 = vmin.f32 %v5489_v25, %v5492_v28 }
 0x3a3   : > { %v5501_v55 = vsub.f32 %v5322_v9, %v1410_v34 }
 0x3a4   : > { %1555 = vmin.xlane.f32.xlu1 %v1554_v50  ;;  %1558 = vmin.xlane.f32.xlu0 %v1557_v57  ;;  %v1297_v33 = vpop.f32.mrb[48].mxu0  ;;  %v5504_v42 = vsub.f32 %v5324_v13, %v1411_v56 }
 0x3a5   : > { %v1412_v51 = vmul.f32 2.0, %v1297_v33  ;;  %v1299_v3 = vpop.f32.mrb[49].mxu0  ;;  %7856 = vst [vmem:[#allocation39_spill] sm:$0xff] %v5501_v55 }
 0x3a6   : > { %7857 = vst [vmem:[#allocation40_spill] sm:$0xff] %v5504_v42  ;;  %v1413_v45 = vmul.f32 2.0, %v1299_v3  ;;  %v1560_v56 = vmin.f32 %v5501_v55, %v5504_v42 }
 0x3a7   : > { %v5509_v4 = vsub.f32 %v5322_v9, %v1412_v51 }
 0x3a8   : > { %v5512_v50 = vsub.f32 %v5324_v13, %v1413_v45  ;;  %1537 = vmin.xlane.f32.xlu1 %v1536_v52  ;;  %1540 = vmin.xlane.f32.xlu0 %v1539_v32  ;;  %v1303_v57 = vpop.f32.mrb[50].mxu0 }
 0x3a9   : > { %7858 = vst [vmem:[#allocation41_spill] sm:$0xff] %v5509_v4  ;;  %v1414_v33 = vmul.f32 2.0, %v1303_v57  ;;  %v1305_v11 = vpop.f32.mrb[51].mxu0 }
 0x3aa   : > { %7859 = vst [vmem:[#allocation42_spill] sm:$0xff] %v5512_v50  ;;  %v1415_v34 = vmul.f32 2.0, %v1305_v11  ;;  %v1563_v3 = vmin.f32 %v5509_v4, %v5512_v50 }
 0x3ab   : > { %v5519_v37 = vsub.f32 %v5322_v9, %v1414_v33 }
 0x3ac   : > { %v5522_v51 = vsub.f32 %v5324_v13, %v1415_v34  ;;  %1561 = vmin.xlane.f32.xlu1 %v1560_v56  ;;  %1564 = vmin.xlane.f32.xlu0 %v1563_v3  ;;  %v1309_v52 = vpop.f32.mrb[52].mxu0 }
 0x3ad   : > { %7860 = vst [vmem:[#allocation43_spill] sm:$0xff] %v5519_v37  ;;  %v1416_v45 = vmul.f32 2.0, %v1309_v52  ;;  %v1311_v32 = vpop.f32.mrb[53].mxu0 }
 0x3ae   : > { %7861 = vst [vmem:[#allocation44_spill] sm:$0xff] %v5522_v51  ;;  %v1417_v57 = vmul.f32 2.0, %v1311_v32  ;;  %v1566_v11 = vmin.f32 %v5519_v37, %v5522_v51 }
 0x3af   : > { %v5527_v43 = vsub.f32 %v5322_v9, %v1416_v45 }
 0x3b0   : > { %v5530_v44 = vsub.f32 %v5324_v13, %v1417_v57  ;;  %1567 = vmin.xlane.f32.xlu1 %v1566_v11  ;;  %v1315_v33 = vpop.f32.mrb[54].mxu0 }
 0x3b1   : > { %7862 = vst [vmem:[#allocation45_spill] sm:$0xff] %v5527_v43  ;;  %v1418_v16 = vmul.f32 2.0, %v1315_v33  ;;  %v1317_v34 = vpop.f32.mrb[55].mxu0 }
 0x3b2   : > { %7863 = vst [vmem:[#allocation46_spill] sm:$0xff] %v5530_v44  ;;  %v1419_v50 = vmul.f32 2.0, %v1317_v34  ;;  %v1569_v56 = vmin.f32 %v5527_v43, %v5530_v44 }
 0x3b3   : > { %v5535_v3 = vsub.f32 %v5322_v9, %v1418_v16 }
 0x3b4   : > { %v5538_v52 = vsub.f32 %v5324_v13, %v1419_v50  ;;  %1570 = vmin.xlane.f32.xlu0 %v1569_v56  ;;  %v1321_v45 = vpop.f32.mrb[56].mxu0 }
 0x3b5   : > { %7864 = vst [vmem:[#allocation47_spill] sm:$0xff] %v5535_v3  ;;  %v1420_v32 = vmul.f32 2.0, %v1321_v45  ;;  %v1323_v51 = vpop.f32.mrb[57].mxu0 }
 0x3b6   : > { %7865 = vst [vmem:[#allocation48_spill] sm:$0xff] %v5538_v52  ;;  %v1421_v57 = vmul.f32 2.0, %v1323_v51  ;;  %v1572_v11 = vmin.f32 %v5535_v3, %v5538_v52 }
 0x3b7   : > { %v5543_v33 = vsub.f32 %v5322_v9, %v1420_v32 }
 0x3b8   : > { %v5546_v34 = vsub.f32 %v5324_v13, %v1421_v57  ;;  %1573 = vmin.xlane.f32.xlu1 %v1572_v11  ;;  %v1327_v16 = vpop.f32.mrb[58].mxu0 }
 0x3b9   : > { %7866 = vst [vmem:[#allocation49_spill] sm:$0xff] %v5543_v33  ;;  %v1422_v44 = vmul.f32 2.0, %v1327_v16  ;;  %v1329_v43 = vpop.f32.mrb[59].mxu0 }
 0x3ba   : > { %7867 = vst [vmem:[#allocation50_spill] sm:$0xff] %v5546_v34  ;;  %v1423_v50 = vmul.f32 2.0, %v1329_v43  ;;  %v1575_v56 = vmin.f32 %v5543_v33, %v5546_v34 }
 0x3bb   : > { %v5551_v45 = vsub.f32 %v5322_v9, %v1422_v44 }
 0x3bc   : > { %v5554_v51 = vsub.f32 %v5324_v13, %v1423_v50  ;;  %1576 = vmin.xlane.f32.xlu0 %v1575_v56  ;;  %v1333_v32 = vpop.f32.mrb[60].mxu0 }
 0x3bd   : > { %7868 = vst [vmem:[#allocation51_spill] sm:$0xff] %v5551_v45  ;;  %v1424_v52 = vmul.f32 2.0, %v1333_v32  ;;  %v1335_v3 = vpop.f32.mrb[61].mxu0 }
 0x3be   : > { %7869 = vst [vmem:[#allocation52_spill] sm:$0xff] %v5554_v51  ;;  %v1425_v57 = vmul.f32 2.0, %v1335_v3  ;;  %v1578_v11 = vmin.f32 %v5551_v45, %v5554_v51 }
 0x3bf   : > { %v5559_v16 = vsub.f32 %v5322_v9, %v1424_v52 }
 0x3c0   : > { %v5562_v43 = vsub.f32 %v5324_v13, %v1425_v57  ;;  %1579 = vmin.xlane.f32.xlu1 %v1578_v11  ;;  %v1339_v44 = vpop.f32.mrb[62].mxu0 }
 0x3c1   : > { %v1426_v34 = vmul.f32 2.0, %v1339_v44  ;;  %v1341_v33 = vpop.f32.mrb[63].mxu0 }
 0x3c2   : > { %7870 = vst [vmem:[#allocation53_spill] sm:$0xff] %v5562_v43  ;;  %v1427_v50 = vmul.f32 2.0, %v1341_v33  ;;  %v1581_v56 = vmin.f32 %v5559_v16, %v5562_v43 }
 0x3c3   : > { %v5567_v32 = vsub.f32 %v5322_v9, %v1426_v34 }
 0x3c4   : > { %v5570_v3 = vsub.f32 %v5324_v13, %v1427_v50  ;;  %1582 = vmin.xlane.f32.xlu0 %v1581_v56  ;;  %v1345_v52 = vpop.f32.mrb[64].mxu0 }
 0x3c5   : > { %7871 = vst [vmem:[#allocation54_spill] sm:$0xff] %v5567_v32  ;;  %v1428_v51 = vmul.f32 2.0, %v1345_v52  ;;  %v1347_v45 = vpop.f32.mrb[65].mxu0 }
 0x3c6   : > { %7872 = vst [vmem:[#allocation55_spill] sm:$0xff] %v5570_v3  ;;  %v1429_v57 = vmul.f32 2.0, %v1347_v45  ;;  %v1584_v11 = vmin.f32 %v5567_v32, %v5570_v3 }
 0x3c7   : > { %v5575_v44 = vsub.f32 %v5322_v9, %v1428_v51 }
 0x3c8   : > { %v5578_v33 = vsub.f32 %v5324_v13, %v1429_v57  ;;  %1585 = vmin.xlane.f32.xlu1 %v1584_v11 }
 0x3c9   : > { %7873 = vst [vmem:[#allocation56_spill] sm:$0xff] %v5575_v44 }
 0x3ca   : > { %7874 = vst [vmem:[#allocation57_spill] sm:$0xff] %v5578_v33  ;;  %v1587_v34 = vmin.f32 %v5575_v44, %v5578_v33 }
 0x3cc   : > { %1588 = vmin.xlane.f32.xlu0 %v1587_v34 }
 0x3dd   : > { %v1496_v50 = vpop.xlane.xlu0 %1495 }
 0x3de   : > { %vm1590_vm10 = vcmp.le.f32.partialorder %v5327_v15, %v1496_v50  ;;  %vm1591_vm11 = vcmp.le.f32.partialorder %v5330_v17, %v1496_v50 }
 0x3df   : > { %v1654_v45 = vsel %vm1590_vm10, 1e+30, %v5327_v15  ;;  %v1655_v56 = vsel %vm1591_vm11, 1e+30, %v5330_v17 }
 0x3e0   : > { %v1718_v52 = vmin.f32 %v1654_v45, %v1655_v56 }
 0x3e1   : > { %v1499_v9 = vpop.xlane.xlu0 %1498 }
 0x3e2   : > { %1719 = vmin.xlane.f32.xlu1 %v1718_v52  ;;  %vm1592_vm12 = vcmp.le.f32.partialorder %v5335_v22, %v1499_v9  ;;  %vm1593_vm13 = vcmp.le.f32.partialorder %v5338_v23, %v1499_v9 }
 0x3e3   : > { %v1656_v13 = vsel %vm1592_vm12, 1e+30, %v5335_v22  ;;  %v1657_v51 = vsel %vm1593_vm13, 1e+30, %v5338_v23 }
 0x3e4   : > { %v1721_v57 = vmin.f32 %v1656_v13, %v1657_v51 }
 0x3e5   : > { %v1502_v11 = vpop.xlane.xlu1 %1501 }
 0x3e6   : > { %1722 = vmin.xlane.f32.xlu0 %v1721_v57  ;;  %vm1594_vm14 = vcmp.le.f32.partialorder %v5343_v29, %v1502_v11  ;;  %vm1595_vm15 = vcmp.le.f32.partialorder %v5346_v30, %v1502_v11 }
 0x3e7   : > { %v1658_v34 = vsel %vm1594_vm14, 1e+30, %v5343_v29  ;;  %v1659_v50 = vsel %vm1595_vm15, 1e+30, %v5346_v30 }
 0x3e8   : > { %v1724_v45 = vmin.f32 %v1658_v34, %v1659_v50 }
 0x3e9   : > { %v1505_v56 = vpop.xlane.xlu0 %1504 }
 0x3ea   : > { %1725 = vmin.xlane.f32.xlu1 %v1724_v45  ;;  %vm1596_vm0 = vcmp.le.f32.partialorder %v5351_v36, %v1505_v56  ;;  %vm1597_vm1 = vcmp.le.f32.partialorder %v5354_v38, %v1505_v56 }
 0x3eb   : > { %v1660_v52 = vsel %vm1596_vm0, 1e+30, %v5351_v36  ;;  %v1661_v9 = vsel %vm1597_vm1, 1e+30, %v5354_v38 }
 0x3ec   : > { %v1727_v13 = vmin.f32 %v1660_v52, %v1661_v9 }
 0x3ed   : > { %v1508_v51 = vpop.xlane.xlu1 %1507 }
 0x3ee   : > { %1728 = vmin.xlane.f32.xlu0 %v1727_v13  ;;  %vm1598_vm2 = vcmp.le.f32.partialorder %v5359_v46, %v1508_v51  ;;  %vm1599_vm3 = vcmp.le.f32.partialorder %v5362_v47, %v1508_v51 }
 0x3ef   : > { %v1662_v57 = vsel %vm1598_vm2, 1e+30, %v5359_v46  ;;  %v1663_v11 = vsel %vm1599_vm3, 1e+30, %v5362_v47 }
 0x3f0   : > { %v1730_v34 = vmin.f32 %v1662_v57, %v1663_v11 }
 0x3f1   : > { %v1511_v50 = vpop.xlane.xlu0 %1510 }
 0x3f2   : > { %1731 = vmin.xlane.f32.xlu1 %v1730_v34  ;;  %vm1600_vm4 = vcmp.le.f32.partialorder %v5367_v53, %v1511_v50  ;;  %vm1601_vm5 = vcmp.le.f32.partialorder %v5370_v54, %v1511_v50 }
 0x3f3   : > { %v1664_v45 = vsel %vm1600_vm4, 1e+30, %v5367_v53  ;;  %v1665_v56 = vsel %vm1601_vm5, 1e+30, %v5370_v54 }
 0x3f4   : > { %v1733_v52 = vmin.f32 %v1664_v45, %v1665_v56 }
 0x3f5   : > { %v1514_v9 = vpop.xlane.xlu1 %1513 }
 0x3f6   : > { %1734 = vmin.xlane.f32.xlu0 %v1733_v52  ;;  %vm1602_vm6 = vcmp.le.f32.partialorder %v5375_v60, %v1514_v9  ;;  %vm1603_vm7 = vcmp.le.f32.partialorder %v5378_v61, %v1514_v9 }
 0x3f7   : > { %v1666_v13 = vsel %vm1602_vm6, 1e+30, %v5375_v60  ;;  %v1667_v51 = vsel %vm1603_vm7, 1e+30, %v5378_v61 }
 0x3f8   : > { %v1736_v57 = vmin.f32 %v1666_v13, %v1667_v51 }
 0x3f9   : > { %v1517_v11 = vpop.xlane.xlu0 %1516 }
 0x3fa   : > { %1737 = vmin.xlane.f32.xlu1 %v1736_v57  ;;  %vm1604_vm10 = vcmp.le.f32.partialorder %v5383_v5, %v1517_v11  ;;  %vm1605_vm11 = vcmp.le.f32.partialorder %v5386_v6, %v1517_v11 }
 0x3fb   : > { %v1668_v34 = vsel %vm1604_vm10, 1e+30, %v5383_v5  ;;  %v1669_v50 = vsel %vm1605_vm11, 1e+30, %v5386_v6 }
 0x3fc   : > { %v1739_v45 = vmin.f32 %v1668_v34, %v1669_v50 }
 0x3fd   : > { %v1520_v56 = vpop.xlane.xlu1 %1519 }
 0x3fe   : > { %1740 = vmin.xlane.f32.xlu0 %v1739_v45  ;;  %vm1606_vm12 = vcmp.le.f32.partialorder %v5391_v18, %v1520_v56  ;;  %vm1607_vm13 = vcmp.le.f32.partialorder %v5394_v19, %v1520_v56 }
 0x3ff   : > { %v1670_v52 = vsel %vm1606_vm12, 1e+30, %v5391_v18  ;;  %v1671_v9 = vsel %vm1607_vm13, 1e+30, %v5394_v19 }
 0x400   : > { %v1742_v13 = vmin.f32 %v1670_v52, %v1671_v9 }
 0x401   : > { %v1523_v51 = vpop.xlane.xlu0 %1522 }
 0x402   : > { %1743 = vmin.xlane.f32.xlu1 %v1742_v13  ;;  %vm1608_vm14 = vcmp.le.f32.partialorder %v5399_v26, %v1523_v51  ;;  %vm1609_vm15 = vcmp.le.f32.partialorder %v5402_v27, %v1523_v51 }
 0x403   : > { %v1672_v57 = vsel %vm1608_vm14, 1e+30, %v5399_v26  ;;  %v1673_v11 = vsel %vm1609_vm15, 1e+30, %v5402_v27 }
 0x404   : > { %v1745_v34 = vmin.f32 %v1672_v57, %v1673_v11 }
 0x406   : > { %1746 = vmin.xlane.f32.xlu0 %v1745_v34 }
 0x41d   : > { %v1544_v50 = vpop.xlane.xlu0 %1543 }
 0x41e   : > { %vm1622_vm10 = vcmp.le.f32.partialorder %v5407_v58, %v1544_v50  ;;  %vm1623_vm11 = vcmp.le.f32.partialorder %v5410_v59, %v1544_v50 }
 0x421   : > { %v1529_v45 = vpop.xlane.xlu0 %1528  ;;  %v1547_v56 = vpop.xlane.xlu1 %1546 }
 0x422   : > { %vm1612_vm0 = vcmp.le.f32.partialorder %v5413_v7, %v1529_v45  ;;  %vm1613_vm1 = vcmp.le.f32.partialorder %v5416_v8, %v1529_v45  ;;  %vm1624_vm12 = vcmp.le.f32.partialorder %v5421_v14, %v1547_v56 }
 0x423   : > { %v1676_v52 = vsel %vm1612_vm0, 1e+30, %v5413_v7  ;;  %v1677_v9 = vsel %vm1613_vm1, 1e+30, %v5416_v8  ;;  %vm1625_vm1 = vcmp.le.f32.partialorder %v5424_v20, %v1547_v56 }
 0x424   : > { %v1751_v13 = vmin.f32 %v1676_v52, %v1677_v9 }
 0x425   : > { %v1526_v19 = vpop.xlane.xlu1 %1525 }
 0x426   : > { %1752 = vmin.xlane.f32.xlu0 %v1751_v13  ;;  %vm1610_vm2 = vcmp.le.f32.partialorder %v5427_v2, %v1526_v19  ;;  %vm1611_vm3 = vcmp.le.f32.partialorder %v5430_v24, %v1526_v19 }
 0x427   : > { %v1674_v51 = vsel %vm1610_vm2, 1e+30, %v5427_v2  ;;  %v1675_v57 = vsel %vm1611_vm3, 1e+30, %v5430_v24 }
 0x428   : > { %v1748_v11 = vmin.f32 %v1674_v51, %v1675_v57 }
 0x429   : > { %v1550_v34 = vpop.xlane.xlu1 %1549  ;;  %v1553_v27 = vpop.xlane.xlu0 %1552 }
 0x42a   : > { %1749 = vmin.xlane.f32.xlu1 %v1748_v11  ;;  %vm1626_vm2 = vcmp.le.f32.partialorder %v5437_v62, %v1550_v34  ;;  %vm1627_vm3 = vcmp.le.f32.partialorder %v5440_v63, %v1550_v34 }
 0x42d   : > { %v1532_v45 = vpop.xlane.xlu1 %1531  ;;  %v1535_v26 = vpop.xlane.xlu0 %1534 }
 0x42e   : > { %vm1614_vm4 = vcmp.le.f32.partialorder %v5448_v39, %v1532_v45  ;;  %vm1615_vm5 = vcmp.le.f32.partialorder %v5451_v40, %v1532_v45  ;;  %vm1616_vm6 = vcmp.le.f32.partialorder %v5457_v10, %v1535_v26  ;;  %vm1617_vm7 = vcmp.le.f32.partialorder %v5460_v12, %v1535_v26 }
 0x42f   : > { %v1678_v19 = vsel %vm1614_vm4, 1e+30, %v5448_v39  ;;  %v1679_v52 = vsel %vm1615_vm5, 1e+30, %v5451_v40  ;;  %v1680_v9 = vsel %vm1616_vm6, 1e+30, %v5457_v10  ;;  %vm1628_vm4 = vcmp.le.f32.partialorder %v5445_v35, %v1553_v27 }
 0x430   : > { %v1754_v13 = vmin.f32 %v1678_v19, %v1679_v52  ;;  %v1681_v51 = vsel %vm1617_vm7, 1e+30, %v5460_v12  ;;  %vm1629_vm5 = vcmp.le.f32.partialorder %v5454_v41, %v1553_v27 }
 0x431   : > { %v1556_v57 = vpop.xlane.xlu1 %1555  ;;  %v1559_v11 = vpop.xlane.xlu0 %1558  ;;  %v1757_v24 = vmin.f32 %v1680_v9, %v1681_v51  ;;  %v1688_v51 = vsel %vm1624_vm12, 1e+30, %v5421_v14 }
 0x432   : > { %1755 = vmin.xlane.f32.xlu1 %v1754_v13  ;;  %v1686_v13 = vsel %vm1622_vm10, 1e+30, %v5407_v58  ;;  %vm1630_vm6 = vcmp.le.f32.partialorder %v5469_v0, %v1556_v57  ;;  %vm1631_vm7 = vcmp.le.f32.partialorder %v5472_v1, %v1556_v57  ;;  %vm1632_vm10 = vcmp.le.f32.partialorder %v5477_v21, %v1559_v11 }
 0x433   : > { %1758 = vmin.xlane.f32.xlu0 %v1757_v24 }
 0x435   : > { %v1538_v2 = vpop.xlane.xlu1 %1537  ;;  %v1541_v45 = vpop.xlane.xlu0 %1540 }
 0x436   : > { %vm1618_vm13 = vcmp.le.f32.partialorder %v5483_v48, %v1538_v2  ;;  %vm1619_vm14 = vcmp.le.f32.partialorder %v5486_v49, %v1538_v2  ;;  %vm1620_vm15 = vcmp.le.f32.partialorder %v5489_v25, %v1541_v45  ;;  %vm1621_vm0 = vcmp.le.f32.partialorder %v5492_v28, %v1541_v45 }
 0x437   : > { %v1682_v26 = vsel %vm1618_vm13, 1e+30, %v5483_v48  ;;  %v1683_v24 = vsel %vm1619_vm14, 1e+30, %v5486_v49  ;;  %v1684_v19 = vsel %vm1620_vm15, 1e+30, %v5489_v25 }
 0x438   : > { %v1760_v52 = vmin.f32 %v1682_v26, %v1683_v24  ;;  %v1685_v50 = vsel %vm1621_vm0, 1e+30, %v5492_v28  ;;  %v1687_v2 = vsel %vm1623_vm11, 1e+30, %v5410_v59  ;;  %v1689_v45 = vsel %vm1625_vm1, 1e+30, %v5424_v20 }
 0x439   : > { %v1763_v9 = vmin.f32 %v1684_v19, %v1685_v50  ;;  %v1766_v56 = vmin.f32 %v1686_v13, %v1687_v2  ;;  %v1562_v26 = vpop.xlane.xlu1 %1561  ;;  %v1769_v24 = vmin.f32 %v1688_v51, %v1689_v45  ;;  %v1690_v19 = vsel %vm1626_vm2, 1e+30, %v5437_v62  ;;  %v1565_v27 = vpop.xlane.xlu0 %1564 }
 0x43a   : > { %1761 = vmin.xlane.f32.xlu1 %v1760_v52  ;;  %v1691_v52 = vsel %vm1627_vm3, 1e+30, %v5440_v63  ;;  %v1692_v50 = vsel %vm1628_vm4, 1e+30, %v5445_v35  ;;  %v1693_v20 = vsel %vm1629_vm5, 1e+30, %v5454_v41  ;;  %vm1633_vm11 = vcmp.le.f32.partialorder %v5480_v31, %v1559_v11 }
 0x43b   : > { %1764 = vmin.xlane.f32.xlu0 %v1763_v9  ;;  %v1772_v34 = vmin.f32 %v1690_v19, %v1691_v52  ;;  %v1775_v9 = vmin.f32 %v1692_v50, %v1693_v20  ;;  %v1694_v13 = vsel %vm1630_vm6, 1e+30, %v5469_v0  ;;  %v1695_v2 = vsel %vm1631_vm7, 1e+30, %v5472_v1  ;;  %v7875_v11 = vld [vmem:[#allocation42_spill] sm:$0xff] }
 0x43c   : > { %v1696_v51 = vsel %vm1632_vm10, 1e+30, %v5477_v21  ;;  %v1697_v45 = vsel %vm1633_vm11, 1e+30, %v5480_v31  ;;  %vm1634_vm12 = vcmp.le.f32.partialorder %v5501_v55, %v1562_v26  ;;  %vm1635_vm13 = vcmp.le.f32.partialorder %v5504_v42, %v1562_v26  ;;  %v7876_v26 = vld [vmem:[#allocation44_spill] sm:$0xff]  ;;  %v7877_v31 = vld [vmem:[#allocation45_spill] sm:$0xff] }
 0x43d   : > { %v1568_v57 = vpop.xlane.xlu1 %1567  ;;  %vm1636_vm14 = vcmp.le.f32.partialorder %v5509_v4, %v1565_v27  ;;  %vm1637_vm15 = vcmp.le.f32.partialorder %v7875_v11, %v1565_v27  ;;  %v1698_v19 = vsel %vm1634_vm12, 1e+30, %v5501_v55  ;;  %v1699_v52 = vsel %vm1635_vm13, 1e+30, %v5504_v42  ;;  %v7878_v27 = vld [vmem:[#allocation46_spill] sm:$0xff]  ;;  %v7879_v42 = vld [vmem:[#allocation47_spill] sm:$0xff] }
 0x43e   : > { %1767 = vmin.xlane.f32.xlu1 %v1766_v56  ;;  %v1778_v56 = vmin.f32 %v1694_v13, %v1695_v2  ;;  %v1700_v50 = vsel %vm1636_vm14, 1e+30, %v5509_v4  ;;  %vm1638_vm0 = vcmp.le.f32.partialorder %v5519_v37, %v1568_v57  ;;  %vm1639_vm1 = vcmp.le.f32.partialorder %v7876_v26, %v1568_v57  ;;  %v7880_v57 = vld [vmem:[#allocation48_spill] sm:$0xff] }
 0x43f   : > { %1770 = vmin.xlane.f32.xlu0 %v1769_v24  ;;  %v1781_v24 = vmin.f32 %v1696_v51, %v1697_v45  ;;  %v1784_v13 = vmin.f32 %v1698_v19, %v1699_v52  ;;  %v1702_v45 = vsel %vm1638_vm0, 1e+30, %v5519_v37 }
 0x441   : > { %v1571_v20 = vpop.xlane.xlu0 %1570 }
 0x442   : > { %1773 = vmin.xlane.f32.xlu1 %v1772_v34  ;;  %v1701_v34 = vsel %vm1637_vm15, 1e+30, %v7875_v11  ;;  %vm1640_vm2 = vcmp.le.f32.partialorder %v7877_v31, %v1571_v20  ;;  %vm1641_vm3 = vcmp.le.f32.partialorder %v7878_v27, %v1571_v20  ;;  %v7882_v20 = vld [vmem:[#allocation50_spill] sm:$0xff] }
 0x443   : > { %1776 = vmin.xlane.f32.xlu0 %v1775_v9  ;;  %v1787_v51 = vmin.f32 %v1700_v50, %v1701_v34  ;;  %v1704_v11 = vsel %vm1640_vm2, 1e+30, %v7877_v31  ;;  %v1705_v4 = vsel %vm1641_vm3, 1e+30, %v7878_v27 }
 0x444   : > { %v1793_v50 = vmin.f32 %v1704_v11, %v1705_v4 }
 0x445   : > { %v1574_v9 = vpop.xlane.xlu1 %1573 }
 0x446   : > { %1779 = vmin.xlane.f32.xlu1 %v1778_v56  ;;  %v1703_v56 = vsel %vm1639_vm1, 1e+30, %v7876_v26  ;;  %vm1642_vm4 = vcmp.le.f32.partialorder %v7879_v42, %v1574_v9  ;;  %vm1643_vm5 = vcmp.le.f32.partialorder %v7880_v57, %v1574_v9  ;;  %v7883_v26 = vld [vmem:[#allocation51_spill] sm:$0xff]  ;;  %v7884_v9 = vld [vmem:[#allocation52_spill] sm:$0xff] }
 0x447   : > { %1782 = vmin.xlane.f32.xlu0 %v1781_v24  ;;  %v7881_v24 = vld [vmem:[#allocation49_spill] sm:$0xff]  ;;  %v1790_v19 = vmin.f32 %v1702_v45, %v1703_v56  ;;  %v1706_v34 = vsel %vm1642_vm4, 1e+30, %v7879_v42 }
 0x449   : > { %v1577_v2 = vpop.xlane.xlu0 %1576 }
 0x44a   : > { %1785 = vmin.xlane.f32.xlu1 %v1784_v13  ;;  %vm1644_vm6 = vcmp.le.f32.partialorder %v7881_v24, %v1577_v2  ;;  %vm1645_vm7 = vcmp.le.f32.partialorder %v7882_v20, %v1577_v2  ;;  %v1707_v13 = vsel %vm1643_vm5, 1e+30, %v7880_v57 }
 0x44b   : > { %1788 = vmin.xlane.f32.xlu0 %v1787_v51  ;;  %v1708_v31 = vsel %vm1644_vm6, 1e+30, %v7881_v24  ;;  %v1709_v27 = vsel %vm1645_vm7, 1e+30, %v7882_v20  ;;  %v1796_v51 = vmin.f32 %v1706_v34, %v1707_v13 }
 0x44c   : > { %v1799_v2 = vmin.f32 %v1708_v31, %v1709_v27 }
 0x44d   : > { %v1580_v52 = vpop.xlane.xlu1 %1579 }
 0x44e   : > { %1791 = vmin.xlane.f32.xlu1 %v1790_v19  ;;  %vm1646_vm10 = vcmp.le.f32.partialorder %v7883_v26, %v1580_v52  ;;  %vm1647_vm11 = vcmp.le.f32.partialorder %v7884_v9, %v1580_v52 }
 0x44f   : > { %1794 = vmin.xlane.f32.xlu0 %v1793_v50  ;;  %v1710_v45 = vsel %vm1646_vm10, 1e+30, %v7883_v26  ;;  %v1711_v4 = vsel %vm1647_vm11, 1e+30, %v7884_v9 }
 0x450   : > { %v1802_v19 = vmin.f32 %v1710_v45, %v1711_v4 }
 0x451   : > { %v1583_v37 = vpop.xlane.xlu0 %1582 }
 0x452   : > { %1797 = vmin.xlane.f32.xlu1 %v1796_v51  ;;  %vm1648_vm12 = vcmp.le.f32.partialorder %v5559_v16, %v1583_v37  ;;  %vm1649_vm13 = vcmp.le.f32.partialorder %v5562_v43, %v1583_v37 }
 0x453   : > { %1800 = vmin.xlane.f32.xlu0 %v1799_v2  ;;  %v1712_v11 = vsel %vm1648_vm12, 1e+30, %v5559_v16  ;;  %v1713_v56 = vsel %vm1649_vm13, 1e+30, %v5562_v43 }
 0x454   : > { %v1805_v52 = vmin.f32 %v1712_v11, %v1713_v56 }
 0x455   : > { %v1586_v50 = vpop.xlane.xlu1 %1585 }
 0x456   : > { %1803 = vmin.xlane.f32.xlu1 %v1802_v19  ;;  %vm1650_vm14 = vcmp.le.f32.partialorder %v5567_v32, %v1586_v50  ;;  %vm1651_vm15 = vcmp.le.f32.partialorder %v5570_v3, %v1586_v50 }
 0x457   : > { %1806 = vmin.xlane.f32.xlu0 %v1805_v52  ;;  %v1714_v31 = vsel %vm1650_vm14, 1e+30, %v5567_v32  ;;  %v1715_v27 = vsel %vm1651_vm15, 1e+30, %v5570_v3 }
 0x458   : > { %v1808_v34 = vmin.f32 %v1714_v31, %v1715_v27 }
 0x459   : > { %v1589_v37 = vpop.xlane.xlu0 %1588 }
 0x45a   : > { %1809 = vmin.xlane.f32.xlu1 %v1808_v34  ;;  %vm1652_vm0 = vcmp.le.f32.partialorder %v5575_v44, %v1589_v37  ;;  %vm1653_vm1 = vcmp.le.f32.partialorder %v5578_v33, %v1589_v37 }
 0x45b   : > { %v1716_v13 = vsel %vm1652_vm0, 1e+30, %v5575_v44  ;;  %v1717_v51 = vsel %vm1653_vm1, 1e+30, %v5578_v33 }
 0x45c   : > { %v1811_v2 = vmin.f32 %v1716_v13, %v1717_v51 }
 0x45e   : > { %1812 = vmin.xlane.f32.xlu0 %v1811_v2 }
 0x46f   : > { %v1720_v45 = vpop.xlane.xlu1 %1719 }
 0x470   : > { %vm1814_vm2 = vcmp.le.f32.partialorder %v5327_v15, %v1720_v45  ;;  %vm1815_vm3 = vcmp.le.f32.partialorder %v5330_v17, %v1720_v45 }
 0x471   : > { %v1878_v4 = vsel %vm1814_vm2, 1e+30, %v5327_v15  ;;  %v1879_v11 = vsel %vm1815_vm3, 1e+30, %v5330_v17 }
 0x472   : > { %v1942_v56 = vmin.f32 %v1878_v4, %v1879_v11 }
 0x473   : > { %v1723_v19 = vpop.xlane.xlu0 %1722 }
 0x474   : > { %1943 = vmin.xlane.f32.xlu1 %v1942_v56  ;;  %vm1816_vm4 = vcmp.le.f32.partialorder %v5335_v22, %v1723_v19  ;;  %vm1817_vm5 = vcmp.le.f32.partialorder %v5338_v23, %v1723_v19 }
 0x475   : > { %v1880_v52 = vsel %vm1816_vm4, 1e+30, %v5335_v22  ;;  %v1881_v50 = vsel %vm1817_vm5, 1e+30, %v5338_v23 }
 0x476   : > { %v1945_v31 = vmin.f32 %v1880_v52, %v1881_v50 }
 0x477   : > { %v1726_v27 = vpop.xlane.xlu1 %1725 }
 0x478   : > { %1946 = vmin.xlane.f32.xlu0 %v1945_v31  ;;  %vm1818_vm6 = vcmp.le.f32.partialorder %v5343_v29, %v1726_v27  ;;  %vm1819_vm7 = vcmp.le.f32.partialorder %v5346_v30, %v1726_v27 }
 0x479   : > { %v1882_v34 = vsel %vm1818_vm6, 1e+30, %v5343_v29  ;;  %v1883_v37 = vsel %vm1819_vm7, 1e+30, %v5346_v30 }
 0x47a   : > { %v1948_v13 = vmin.f32 %v1882_v34, %v1883_v37 }
 0x47b   : > { %v1729_v51 = vpop.xlane.xlu0 %1728 }
 0x47c   : > { %1949 = vmin.xlane.f32.xlu1 %v1948_v13  ;;  %vm1820_vm10 = vcmp.le.f32.partialorder %v5351_v36, %v1729_v51  ;;  %vm1821_vm11 = vcmp.le.f32.partialorder %v5354_v38, %v1729_v51 }
 0x47d   : > { %v1884_v2 = vsel %vm1820_vm10, 1e+30, %v5351_v36  ;;  %v1885_v45 = vsel %vm1821_vm11, 1e+30, %v5354_v38 }
 0x47e   : > { %v1951_v4 = vmin.f32 %v1884_v2, %v1885_v45 }
 0x47f   : > { %v1732_v11 = vpop.xlane.xlu1 %1731 }
 0x480   : > { %1952 = vmin.xlane.f32.xlu0 %v1951_v4  ;;  %vm1822_vm12 = vcmp.le.f32.partialorder %v5359_v46, %v1732_v11  ;;  %vm1823_vm13 = vcmp.le.f32.partialorder %v5362_v47, %v1732_v11 }
 0x481   : > { %v1886_v56 = vsel %vm1822_vm12, 1e+30, %v5359_v46  ;;  %v1887_v19 = vsel %vm1823_vm13, 1e+30, %v5362_v47 }
 0x482   : > { %v1954_v52 = vmin.f32 %v1886_v56, %v1887_v19 }
 0x483   : > { %v1735_v50 = vpop.xlane.xlu0 %1734 }
 0x484   : > { %1955 = vmin.xlane.f32.xlu1 %v1954_v52  ;;  %vm1824_vm14 = vcmp.le.f32.partialorder %v5367_v53, %v1735_v50  ;;  %vm1825_vm15 = vcmp.le.f32.partialorder %v5370_v54, %v1735_v50  ;;  %v7885_v52 = vld [vmem:[#allocation14_spill] sm:$0xff] }
 0x485   : > { %v1888_v31 = vsel %vm1824_vm14, 1e+30, %v5367_v53  ;;  %v1889_v27 = vsel %vm1825_vm15, 1e+30, %v5370_v54 }
 0x486   : > { %v1957_v34 = vmin.f32 %v1888_v31, %v1889_v27 }
 0x487   : > { %v1738_v37 = vpop.xlane.xlu1 %1737 }
 0x488   : > { %1958 = vmin.xlane.f32.xlu0 %v1957_v34  ;;  %vm1826_vm0 = vcmp.le.f32.partialorder %v5375_v60, %v1738_v37  ;;  %vm1827_vm1 = vcmp.le.f32.partialorder %v5378_v61, %v1738_v37  ;;  %v7886_v37 = vld [vmem:[#allocation15_spill] sm:$0xff] }
 0x489   : > { %v1890_v13 = vsel %vm1826_vm0, 1e+30, %v5375_v60  ;;  %v1891_v51 = vsel %vm1827_vm1, 1e+30, %v5378_v61 }
 0x48a   : > { %v1960_v2 = vmin.f32 %v1890_v13, %v1891_v51  ;;  %v7887_v13 = vld [vmem:[#allocation16_spill] sm:$0xff] }
 0x48b   : > { %v1741_v45 = vpop.xlane.xlu0 %1740 }
 0x48c   : > { %1961 = vmin.xlane.f32.xlu1 %v1960_v2  ;;  %vm1828_vm2 = vcmp.le.f32.partialorder %v5383_v5, %v1741_v45  ;;  %vm1829_vm3 = vcmp.le.f32.partialorder %v5386_v6, %v1741_v45 }
 0x48d   : > { %v1892_v4 = vsel %vm1828_vm2, 1e+30, %v5383_v5  ;;  %v1893_v11 = vsel %vm1829_vm3, 1e+30, %v5386_v6 }
 0x48e   : > { %v1963_v56 = vmin.f32 %v1892_v4, %v1893_v11 }
 0x48f   : > { %v1744_v19 = vpop.xlane.xlu1 %1743 }
 0x490   : > { %1964 = vmin.xlane.f32.xlu0 %v1963_v56  ;;  %vm1830_vm4 = vcmp.le.f32.partialorder %v5391_v18, %v1744_v19  ;;  %vm1831_vm5 = vcmp.le.f32.partialorder %v7885_v52, %v1744_v19 }
 0x491   : > { %v1894_v50 = vsel %vm1830_vm4, 1e+30, %v5391_v18  ;;  %v1895_v31 = vsel %vm1831_vm5, 1e+30, %v7885_v52 }
 0x492   : > { %v1966_v27 = vmin.f32 %v1894_v50, %v1895_v31  ;;  %v7888_v31 = vld [vmem:[#allocation23_spill] sm:$0xff] }
 0x493   : > { %v1747_v34 = vpop.xlane.xlu0 %1746 }
 0x494   : > { %1967 = vmin.xlane.f32.xlu1 %v1966_v27  ;;  %vm1832_vm6 = vcmp.le.f32.partialorder %v7886_v37, %v1747_v34  ;;  %vm1833_vm7 = vcmp.le.f32.partialorder %v7887_v13, %v1747_v34  ;;  %v7889_v27 = vld [vmem:[#allocation24_spill] sm:$0xff] }
 0x495   : > { %v1896_v51 = vsel %vm1832_vm6, 1e+30, %v7886_v37  ;;  %v1897_v2 = vsel %vm1833_vm7, 1e+30, %v7887_v13 }
 0x496   : > { %v1969_v45 = vmin.f32 %v1896_v51, %v1897_v2 }
 0x498   : > { %1970 = vmin.xlane.f32.xlu0 %v1969_v45 }
 0x4b3   : > { %v1753_v4 = vpop.xlane.xlu0 %1752 }
 0x4b4   : > { %vm1836_vm10 = vcmp.le.f32.partialorder %v5413_v7, %v1753_v4  ;;  %vm1837_vm11 = vcmp.le.f32.partialorder %v5416_v8, %v1753_v4 }
 0x4b5   : > { %v1900_v11 = vsel %vm1836_vm10, 1e+30, %v5413_v7  ;;  %v1901_v56 = vsel %vm1837_vm11, 1e+30, %v5416_v8 }
 0x4b6   : > { %v1975_v19 = vmin.f32 %v1900_v11, %v1901_v56 }
 0x4b7   : > { %v1750_v50 = vpop.xlane.xlu1 %1749 }
 0x4b8   : > { %1976 = vmin.xlane.f32.xlu0 %v1975_v19  ;;  %vm1834_vm12 = vcmp.le.f32.partialorder %v7888_v31, %v1750_v50  ;;  %vm1835_vm13 = vcmp.le.f32.partialorder %v7889_v27, %v1750_v50 }
 0x4b9   : > { %v1898_v34 = vsel %vm1834_vm12, 1e+30, %v7888_v31  ;;  %v1899_v51 = vsel %vm1835_vm13, 1e+30, %v7889_v27 }
 0x4ba   : > { %v1972_v2 = vmin.f32 %v1898_v34, %v1899_v51 }
 0x4bc   : > { %1973 = vmin.xlane.f32.xlu1 %v1972_v2 }
 0x4bf   : > { %v1756_v45 = vpop.xlane.xlu1 %1755 }
 0x4c0   : > { %v1759_v13 = vpop.xlane.xlu0 %1758  ;;  %vm1838_vm14 = vcmp.le.f32.partialorder %v5448_v39, %v1756_v45  ;;  %vm1839_vm15 = vcmp.le.f32.partialorder %v5451_v40, %v1756_v45 }
 0x4c1   : > { %v1902_v4 = vsel %vm1838_vm14, 1e+30, %v5448_v39  ;;  %v1903_v11 = vsel %vm1839_vm15, 1e+30, %v5451_v40  ;;  %vm1840_vm0 = vcmp.le.f32.partialorder %v5457_v10, %v1759_v13  ;;  %vm1841_vm1 = vcmp.le.f32.partialorder %v5460_v12, %v1759_v13 }
 0x4c2   : > { %v1978_v56 = vmin.f32 %v1902_v4, %v1903_v11  ;;  %v1904_v19 = vsel %vm1840_vm0, 1e+30, %v5457_v10  ;;  %v1905_v50 = vsel %vm1841_vm1, 1e+30, %v5460_v12 }
 0x4c3   : > { %v1981_v34 = vmin.f32 %v1904_v19, %v1905_v50 }
 0x4c4   : > { %1979 = vmin.xlane.f32.xlu1 %v1978_v56 }
 0x4c5   : > { %1982 = vmin.xlane.f32.xlu0 %v1981_v34 }
 0x4c7   : > { %v1762_v51 = vpop.xlane.xlu1 %1761 }
 0x4c8   : > { %v1765_v2 = vpop.xlane.xlu0 %1764  ;;  %vm1842_vm2 = vcmp.le.f32.partialorder %v5483_v48, %v1762_v51  ;;  %vm1843_vm3 = vcmp.le.f32.partialorder %v5486_v49, %v1762_v51  ;;  %v7890_v51 = vld [vmem:[#allocation22_spill] sm:$0xff] }
 0x4c9   : > { %vm1844_vm4 = vcmp.le.f32.partialorder %v5489_v25, %v1765_v2  ;;  %vm1845_vm5 = vcmp.le.f32.partialorder %v5492_v28, %v1765_v2  ;;  %v1906_v13 = vsel %vm1842_vm2, 1e+30, %v5483_v48  ;;  %v1907_v45 = vsel %vm1843_vm3, 1e+30, %v5486_v49 }
 0x4ca   : > { %v1908_v4 = vsel %vm1844_vm4, 1e+30, %v5489_v25  ;;  %v1909_v11 = vsel %vm1845_vm5, 1e+30, %v5492_v28  ;;  %v1984_v56 = vmin.f32 %v1906_v13, %v1907_v45 }
 0x4cb   : > { %v1768_v19 = vpop.xlane.xlu1 %1767  ;;  %v1987_v50 = vmin.f32 %v1908_v4, %v1909_v11 }
 0x4cc   : > { %v1771_v34 = vpop.xlane.xlu0 %1770  ;;  %1985 = vmin.xlane.f32.xlu1 %v1984_v56  ;;  %vm1846_vm6 = vcmp.le.f32.partialorder %v5407_v58, %v1768_v19  ;;  %vm1847_vm7 = vcmp.le.f32.partialorder %v5410_v59, %v1768_v19 }
 0x4cd   : > { %vm1848_vm10 = vcmp.le.f32.partialorder %v5421_v14, %v1771_v34  ;;  %vm1849_vm11 = vcmp.le.f32.partialorder %v7890_v51, %v1771_v34  ;;  %1988 = vmin.xlane.f32.xlu0 %v1987_v50  ;;  %v1910_v2 = vsel %vm1846_vm6, 1e+30, %v5407_v58  ;;  %v1911_v25 = vsel %vm1847_vm7, 1e+30, %v5410_v59 }
 0x4ce   : > { %v1912_v28 = vsel %vm1848_vm10, 1e+30, %v5421_v14  ;;  %v1913_v13 = vsel %vm1849_vm11, 1e+30, %v7890_v51  ;;  %v1990_v45 = vmin.f32 %v1910_v2, %v1911_v25 }
 0x4cf   : > { %v1774_v4 = vpop.xlane.xlu1 %1773  ;;  %v1993_v11 = vmin.f32 %v1912_v28, %v1913_v13 }
 0x4d0   : > { %vm1850_vm12 = vcmp.le.f32.partialorder %v5437_v62, %v1774_v4  ;;  %vm1851_vm13 = vcmp.le.f32.partialorder %v5440_v63, %v1774_v4  ;;  %v1777_v56 = vpop.xlane.xlu0 %1776  ;;  %1991 = vmin.xlane.f32.xlu1 %v1990_v45 }
 0x4d1   : > { %v1914_v19 = vsel %vm1850_vm12, 1e+30, %v5437_v62  ;;  %v1915_v50 = vsel %vm1851_vm13, 1e+30, %v5440_v63  ;;  %vm1852_vm14 = vcmp.le.f32.partialorder %v5445_v35, %v1777_v56  ;;  %vm1853_vm15 = vcmp.le.f32.partialorder %v5454_v41, %v1777_v56  ;;  %1994 = vmin.xlane.f32.xlu0 %v1993_v11  ;;  %v7891_v11 = vld [vmem:[#allocation34_spill] sm:$0xff] }
 0x4d2   : > { %v1916_v34 = vsel %vm1852_vm14, 1e+30, %v5445_v35  ;;  %v1917_v25 = vsel %vm1853_vm15, 1e+30, %v5454_v41  ;;  %v1996_v28 = vmin.f32 %v1914_v19, %v1915_v50  ;;  %v7893_v41 = vld [vmem:[#allocation41_spill] sm:$0xff] }
 0x4d3   : > { %v1780_v2 = vpop.xlane.xlu1 %1779  ;;  %v1999_v13 = vmin.f32 %v1916_v34, %v1917_v25 }
 0x4d4   : > { %vm1854_vm0 = vcmp.le.f32.partialorder %v5469_v0, %v1780_v2  ;;  %vm1855_vm1 = vcmp.le.f32.partialorder %v5472_v1, %v1780_v2  ;;  %v1783_v45 = vpop.xlane.xlu0 %1782  ;;  %1997 = vmin.xlane.f32.xlu1 %v1996_v28  ;;  %v7892_v2 = vld [vmem:[#allocation40_spill] sm:$0xff] }
 0x4d5   : > { %v1918_v4 = vsel %vm1854_vm0, 1e+30, %v5469_v0  ;;  %v1919_v63 = vsel %vm1855_vm1, 1e+30, %v5472_v1  ;;  %vm1856_vm2 = vcmp.le.f32.partialorder %v5477_v21, %v1783_v45  ;;  %vm1857_vm3 = vcmp.le.f32.partialorder %v7891_v11, %v1783_v45  ;;  %2000 = vmin.xlane.f32.xlu0 %v1999_v13  ;;  %v7894_v13 = vld [vmem:[#allocation42_spill] sm:$0xff] }
 0x4d6   : > { %v1920_v56 = vsel %vm1856_vm2, 1e+30, %v5477_v21  ;;  %v1921_v19 = vsel %vm1857_vm3, 1e+30, %v7891_v11  ;;  %v2002_v50 = vmin.f32 %v1918_v4, %v1919_v63  ;;  %v7895_v11 = vld [vmem:[#allocation43_spill] sm:$0xff]  ;;  %v7897_v21 = vld [vmem:[#allocation45_spill] sm:$0xff] }
 0x4d7   : > { %v1786_v34 = vpop.xlane.xlu1 %1785  ;;  %v2005_v25 = vmin.f32 %v1920_v56, %v1921_v19 }
 0x4d8   : > { %vm1858_vm4 = vcmp.le.f32.partialorder %v5501_v55, %v1786_v34  ;;  %vm1859_vm5 = vcmp.le.f32.partialorder %v7892_v2, %v1786_v34  ;;  %v1789_v28 = vpop.xlane.xlu0 %1788  ;;  %2003 = vmin.xlane.f32.xlu1 %v2002_v50  ;;  %v7896_v34 = vld [vmem:[#allocation44_spill] sm:$0xff] }
 0x4d9   : > { %v1922_v1 = vsel %vm1858_vm4, 1e+30, %v5501_v55  ;;  %v1923_v0 = vsel %vm1859_vm5, 1e+30, %v7892_v2  ;;  %vm1860_vm6 = vcmp.le.f32.partialorder %v7893_v41, %v1789_v28  ;;  %vm1861_vm7 = vcmp.le.f32.partialorder %v7894_v13, %v1789_v28  ;;  %2006 = vmin.xlane.f32.xlu0 %v2005_v25  ;;  %v7898_v25 = vld [vmem:[#allocation46_spill] sm:$0xff] }
 0x4da   : > { %v1924_v45 = vsel %vm1860_vm6, 1e+30, %v7893_v41  ;;  %v1925_v63 = vsel %vm1861_vm7, 1e+30, %v7894_v13  ;;  %v2008_v4 = vmin.f32 %v1922_v1, %v1923_v0 }
 0x4db   : > { %v1792_v56 = vpop.xlane.xlu1 %1791  ;;  %v2011_v19 = vmin.f32 %v1924_v45, %v1925_v63 }
 0x4dc   : > { %vm1862_vm10 = vcmp.le.f32.partialorder %v7895_v11, %v1792_v56  ;;  %vm1863_vm11 = vcmp.le.f32.partialorder %v7896_v34, %v1792_v56  ;;  %v1795_v50 = vpop.xlane.xlu0 %1794  ;;  %2009 = vmin.xlane.f32.xlu1 %v2008_v4 }
 0x4dd   : > { %v1926_v2 = vsel %vm1862_vm10, 1e+30, %v7895_v11  ;;  %v1927_v55 = vsel %vm1863_vm11, 1e+30, %v7896_v34  ;;  %vm1864_vm12 = vcmp.le.f32.partialorder %v7897_v21, %v1795_v50  ;;  %vm1865_vm13 = vcmp.le.f32.partialorder %v7898_v25, %v1795_v50  ;;  %2012 = vmin.xlane.f32.xlu0 %v2011_v19 }
 0x4de   : > { %v1928_v28 = vsel %vm1864_vm12, 1e+30, %v7897_v21  ;;  %v1929_v0 = vsel %vm1865_vm13, 1e+30, %v7898_v25  ;;  %v2014_v1 = vmin.f32 %v1926_v2, %v1927_v55 }
 0x4df   : > { %v1798_v45 = vpop.xlane.xlu1 %1797  ;;  %v2017_v63 = vmin.f32 %v1928_v28, %v1929_v0 }
 0x4e0   : > { %vm1866_vm14 = vcmp.le.f32.partialorder %v7879_v42, %v1798_v45  ;;  %vm1867_vm15 = vcmp.le.f32.partialorder %v7880_v57, %v1798_v45  ;;  %v1801_v4 = vpop.xlane.xlu0 %1800  ;;  %2015 = vmin.xlane.f32.xlu1 %v2014_v1 }
 0x4e1   : > { %v1930_v56 = vsel %vm1866_vm14, 1e+30, %v7879_v42  ;;  %v1931_v34 = vsel %vm1867_vm15, 1e+30, %v7880_v57  ;;  %vm1868_vm0 = vcmp.le.f32.partialorder %v7881_v24, %v1801_v4  ;;  %vm1869_vm1 = vcmp.le.f32.partialorder %v7882_v20, %v1801_v4  ;;  %2018 = vmin.xlane.f32.xlu0 %v2017_v63 }
 0x4e2   : > { %v1932_v19 = vsel %vm1868_vm0, 1e+30, %v7881_v24  ;;  %v1933_v55 = vsel %vm1869_vm1, 1e+30, %v7882_v20  ;;  %v2020_v2 = vmin.f32 %v1930_v56, %v1931_v34 }
 0x4e3   : > { %v1804_v50 = vpop.xlane.xlu1 %1803  ;;  %v2023_v28 = vmin.f32 %v1932_v19, %v1933_v55 }
 0x4e4   : > { %vm1870_vm2 = vcmp.le.f32.partialorder %v7883_v26, %v1804_v50  ;;  %vm1871_vm3 = vcmp.le.f32.partialorder %v7884_v9, %v1804_v50  ;;  %v1807_v0 = vpop.xlane.xlu0 %1806  ;;  %2021 = vmin.xlane.f32.xlu1 %v2020_v2 }
 0x4e5   : > { %v1934_v1 = vsel %vm1870_vm2, 1e+30, %v7883_v26  ;;  %v1935_v45 = vsel %vm1871_vm3, 1e+30, %v7884_v9  ;;  %vm1872_vm4 = vcmp.le.f32.partialorder %v5559_v16, %v1807_v0  ;;  %vm1873_vm5 = vcmp.le.f32.partialorder %v5562_v43, %v1807_v0  ;;  %2024 = vmin.xlane.f32.xlu0 %v2023_v28 }
 0x4e6   : > { %v1936_v63 = vsel %vm1872_vm4, 1e+30, %v5559_v16  ;;  %v1937_v34 = vsel %vm1873_vm5, 1e+30, %v5562_v43  ;;  %v2026_v4 = vmin.f32 %v1934_v1, %v1935_v45 }
 0x4e7   : > { %v1810_v56 = vpop.xlane.xlu1 %1809  ;;  %v2029_v19 = vmin.f32 %v1936_v63, %v1937_v34 }
 0x4e8   : > { %vm1874_vm6 = vcmp.le.f32.partialorder %v5567_v32, %v1810_v56  ;;  %vm1875_vm7 = vcmp.le.f32.partialorder %v5570_v3, %v1810_v56  ;;  %2027 = vmin.xlane.f32.xlu1 %v2026_v4 }
 0x4e9   : > { %v1938_v55 = vsel %vm1874_vm6, 1e+30, %v5567_v32  ;;  %v1939_v2 = vsel %vm1875_vm7, 1e+30, %v5570_v3  ;;  %2030 = vmin.xlane.f32.xlu0 %v2029_v19 }
 0x4ea   : > { %v2032_v50 = vmin.f32 %v1938_v55, %v1939_v2 }
 0x4eb   : > { %v1813_v0 = vpop.xlane.xlu0 %1812 }
 0x4ec   : > { %vm1876_vm10 = vcmp.le.f32.partialorder %v5575_v44, %v1813_v0  ;;  %vm1877_vm11 = vcmp.le.f32.partialorder %v5578_v33, %v1813_v0  ;;  %2033 = vmin.xlane.f32.xlu1 %v2032_v50 }
 0x4ed   : > { %v1940_v28 = vsel %vm1876_vm10, 1e+30, %v5575_v44  ;;  %v1941_v1 = vsel %vm1877_vm11, 1e+30, %v5578_v33 }
 0x4ee   : > { %v2035_v45 = vmin.f32 %v1940_v28, %v1941_v1 }
 0x4f0   : > { %2036 = vmin.xlane.f32.xlu0 %v2035_v45 }
 0x501   : > { %v1944_v63 = vpop.xlane.xlu1 %1943 }
 0x502   : > { %vm2038_vm12 = vcmp.le.f32.partialorder %v5327_v15, %v1944_v63  ;;  %vm2039_vm13 = vcmp.le.f32.partialorder %v5330_v17, %v1944_v63 }
 0x503   : > { %v2102_v34 = vsel %vm2038_vm12, 1e+30, %v5327_v15  ;;  %v2103_v4 = vsel %vm2039_vm13, 1e+30, %v5330_v17 }
 0x504   : > { %v2166_v56 = vmin.f32 %v2102_v34, %v2103_v4 }
 0x505   : > { %v1947_v19 = vpop.xlane.xlu0 %1946 }
 0x506   : > { %vm2040_vm14 = vcmp.le.f32.partialorder %v5335_v22, %v1947_v19  ;;  %vm2041_vm15 = vcmp.le.f32.partialorder %v5338_v23, %v1947_v19  ;;  %2167 = vmin.xlane.f32.xlu1 %v2166_v56 }
 0x507   : > { %v2104_v55 = vsel %vm2040_vm14, 1e+30, %v5335_v22  ;;  %v2105_v2 = vsel %vm2041_vm15, 1e+30, %v5338_v23 }
 0x508   : > { %v2169_v50 = vmin.f32 %v2104_v55, %v2105_v2 }
 0x509   : > { %v1950_v0 = vpop.xlane.xlu1 %1949 }
 0x50a   : > { %vm2042_vm0 = vcmp.le.f32.partialorder %v5343_v29, %v1950_v0  ;;  %vm2043_vm1 = vcmp.le.f32.partialorder %v5346_v30, %v1950_v0  ;;  %2170 = vmin.xlane.f32.xlu0 %v2169_v50 }
 0x50b   : > { %v2106_v28 = vsel %vm2042_vm0, 1e+30, %v5343_v29  ;;  %v2107_v1 = vsel %vm2043_vm1, 1e+30, %v5346_v30 }
 0x50c   : > { %v2172_v45 = vmin.f32 %v2106_v28, %v2107_v1 }
 0x50d   : > { %v1953_v63 = vpop.xlane.xlu0 %1952 }
 0x50e   : > { %vm2044_vm2 = vcmp.le.f32.partialorder %v5351_v36, %v1953_v63  ;;  %vm2045_vm3 = vcmp.le.f32.partialorder %v5354_v38, %v1953_v63  ;;  %2173 = vmin.xlane.f32.xlu1 %v2172_v45 }
 0x50f   : > { %v2108_v34 = vsel %vm2044_vm2, 1e+30, %v5351_v36  ;;  %v2109_v4 = vsel %vm2045_vm3, 1e+30, %v5354_v38 }
 0x510   : > { %v2175_v56 = vmin.f32 %v2108_v34, %v2109_v4 }
 0x511   : > { %v1956_v19 = vpop.xlane.xlu1 %1955 }
 0x512   : > { %vm2046_vm4 = vcmp.le.f32.partialorder %v5359_v46, %v1956_v19  ;;  %vm2047_vm5 = vcmp.le.f32.partialorder %v5362_v47, %v1956_v19  ;;  %2176 = vmin.xlane.f32.xlu0 %v2175_v56 }
 0x513   : > { %v2110_v55 = vsel %vm2046_vm4, 1e+30, %v5359_v46  ;;  %v2111_v2 = vsel %vm2047_vm5, 1e+30, %v5362_v47 }
 0x514   : > { %v2178_v50 = vmin.f32 %v2110_v55, %v2111_v2 }
 0x515   : > { %v1959_v0 = vpop.xlane.xlu0 %1958 }
 0x516   : > { %vm2048_vm6 = vcmp.le.f32.partialorder %v5367_v53, %v1959_v0  ;;  %vm2049_vm7 = vcmp.le.f32.partialorder %v5370_v54, %v1959_v0  ;;  %2179 = vmin.xlane.f32.xlu1 %v2178_v50 }
 0x517   : > { %v2112_v28 = vsel %vm2048_vm6, 1e+30, %v5367_v53  ;;  %v2113_v1 = vsel %vm2049_vm7, 1e+30, %v5370_v54 }
 0x518   : > { %v2181_v45 = vmin.f32 %v2112_v28, %v2113_v1 }
 0x519   : > { %v1962_v63 = vpop.xlane.xlu1 %1961 }
 0x51a   : > { %vm2050_vm10 = vcmp.le.f32.partialorder %v5375_v60, %v1962_v63  ;;  %vm2051_vm11 = vcmp.le.f32.partialorder %v5378_v61, %v1962_v63  ;;  %2182 = vmin.xlane.f32.xlu0 %v2181_v45 }
 0x51b   : > { %v2114_v34 = vsel %vm2050_vm10, 1e+30, %v5375_v60  ;;  %v2115_v4 = vsel %vm2051_vm11, 1e+30, %v5378_v61 }
 0x51c   : > { %v2184_v56 = vmin.f32 %v2114_v34, %v2115_v4  ;;  %v7899_v34 = vld [vmem:[#allocation16_spill] sm:$0xff] }
 0x51d   : > { %v1965_v19 = vpop.xlane.xlu0 %1964 }
 0x51e   : > { %vm2052_vm12 = vcmp.le.f32.partialorder %v5383_v5, %v1965_v19  ;;  %vm2053_vm13 = vcmp.le.f32.partialorder %v5386_v6, %v1965_v19  ;;  %2185 = vmin.xlane.f32.xlu1 %v2184_v56 }
 0x51f   : > { %v2116_v55 = vsel %vm2052_vm12, 1e+30, %v5383_v5  ;;  %v2117_v2 = vsel %vm2053_vm13, 1e+30, %v5386_v6 }
 0x520   : > { %v2187_v50 = vmin.f32 %v2116_v55, %v2117_v2 }
 0x521   : > { %v1968_v0 = vpop.xlane.xlu1 %1967 }
 0x522   : > { %vm2054_vm14 = vcmp.le.f32.partialorder %v5391_v18, %v1968_v0  ;;  %vm2055_vm15 = vcmp.le.f32.partialorder %v7885_v52, %v1968_v0  ;;  %2188 = vmin.xlane.f32.xlu0 %v2187_v50 }
 0x523   : > { %v2118_v28 = vsel %vm2054_vm14, 1e+30, %v5391_v18  ;;  %v2119_v1 = vsel %vm2055_vm15, 1e+30, %v7885_v52 }
 0x524   : > { %v2190_v45 = vmin.f32 %v2118_v28, %v2119_v1 }
 0x525   : > { %v1971_v63 = vpop.xlane.xlu0 %1970 }
 0x526   : > { %vm2056_vm0 = vcmp.le.f32.partialorder %v7886_v37, %v1971_v63  ;;  %vm2057_vm1 = vcmp.le.f32.partialorder %v7899_v34, %v1971_v63  ;;  %2191 = vmin.xlane.f32.xlu1 %v2190_v45 }
 0x527   : > { %v2120_v4 = vsel %vm2056_vm0, 1e+30, %v7886_v37  ;;  %v2121_v56 = vsel %vm2057_vm1, 1e+30, %v7899_v34 }
 0x528   : > { %v2193_v19 = vmin.f32 %v2120_v4, %v2121_v56 }
 0x52a   : > { %2194 = vmin.xlane.f32.xlu0 %v2193_v19 }
 0x545   : > { %v1977_v55 = vpop.xlane.xlu0 %1976 }
 0x546   : > { %vm2060_vm2 = vcmp.le.f32.partialorder %v5413_v7, %v1977_v55  ;;  %vm2061_vm3 = vcmp.le.f32.partialorder %v5416_v8, %v1977_v55 }
 0x547   : > { %v2124_v2 = vsel %vm2060_vm2, 1e+30, %v5413_v7  ;;  %v2125_v50 = vsel %vm2061_vm3, 1e+30, %v5416_v8 }
 0x548   : > { %v2199_v0 = vmin.f32 %v2124_v2, %v2125_v50 }
 0x549   : > { %v1974_v28 = vpop.xlane.xlu1 %1973 }
 0x54a   : > { %vm2058_vm4 = vcmp.le.f32.partialorder %v7888_v31, %v1974_v28  ;;  %vm2059_vm5 = vcmp.le.f32.partialorder %v7889_v27, %v1974_v28  ;;  %2200 = vmin.xlane.f32.xlu0 %v2199_v0 }
 0x54b   : > { %v2122_v1 = vsel %vm2058_vm4, 1e+30, %v7888_v31  ;;  %v2123_v45 = vsel %vm2059_vm5, 1e+30, %v7889_v27 }
 0x54c   : > { %v2196_v63 = vmin.f32 %v2122_v1, %v2123_v45 }
 0x54e   : > { %2197 = vmin.xlane.f32.xlu1 %v2196_v63 }
 0x551   : > { %v1980_v4 = vpop.xlane.xlu1 %1979 }
 0x552   : > { %vm2062_vm6 = vcmp.le.f32.partialorder %v5448_v39, %v1980_v4  ;;  %vm2063_vm7 = vcmp.le.f32.partialorder %v5451_v40, %v1980_v4  ;;  %v1983_v56 = vpop.xlane.xlu0 %1982 }
 0x553   : > { %v2126_v19 = vsel %vm2062_vm6, 1e+30, %v5448_v39  ;;  %v2127_v55 = vsel %vm2063_vm7, 1e+30, %v5451_v40  ;;  %vm2064_vm10 = vcmp.le.f32.partialorder %v5457_v10, %v1983_v56  ;;  %vm2065_vm11 = vcmp.le.f32.partialorder %v5460_v12, %v1983_v56  ;;  %v7900_v40 = vld [vmem:[#allocation37_spill] sm:$0xff]  ;;  %v7901_v56 = vld [vmem:[#allocation38_spill] sm:$0xff] }
 0x554   : > { %v2128_v2 = vsel %vm2064_vm10, 1e+30, %v5457_v10  ;;  %v2129_v50 = vsel %vm2065_vm11, 1e+30, %v5460_v12  ;;  %v2202_v0 = vmin.f32 %v2126_v19, %v2127_v55 }
 0x555   : > { %v2205_v28 = vmin.f32 %v2128_v2, %v2129_v50 }
 0x556   : > { %2203 = vmin.xlane.f32.xlu1 %v2202_v0 }
 0x557   : > { %2206 = vmin.xlane.f32.xlu0 %v2205_v28 }
 0x559   : > { %v1986_v1 = vpop.xlane.xlu1 %1985 }
 0x55a   : > { %vm2066_vm12 = vcmp.le.f32.partialorder %v5483_v48, %v1986_v1  ;;  %vm2067_vm13 = vcmp.le.f32.partialorder %v5486_v49, %v1986_v1  ;;  %v1989_v45 = vpop.xlane.xlu0 %1988 }
 0x55b   : > { %v2130_v63 = vsel %vm2066_vm12, 1e+30, %v5483_v48  ;;  %v2131_v4 = vsel %vm2067_vm13, 1e+30, %v5486_v49  ;;  %vm2068_vm14 = vcmp.le.f32.partialorder %v7900_v40, %v1989_v45  ;;  %vm2069_vm15 = vcmp.le.f32.partialorder %v7901_v56, %v1989_v45 }
 0x55c   : > { %v2132_v12 = vsel %vm2068_vm14, 1e+30, %v7900_v40  ;;  %v2133_v19 = vsel %vm2069_vm15, 1e+30, %v7901_v56  ;;  %v2208_v55 = vmin.f32 %v2130_v63, %v2131_v4 }
 0x55d   : > { %v1992_v2 = vpop.xlane.xlu1 %1991  ;;  %v2211_v50 = vmin.f32 %v2132_v12, %v2133_v19 }
 0x55e   : > { %vm2070_vm0 = vcmp.le.f32.partialorder %v5407_v58, %v1992_v2  ;;  %vm2071_vm1 = vcmp.le.f32.partialorder %v5410_v59, %v1992_v2  ;;  %v1995_v0 = vpop.xlane.xlu0 %1994  ;;  %2209 = vmin.xlane.f32.xlu1 %v2208_v55  ;;  %v7902_v2 = vld [vmem:[#allocation26_spill] sm:$0xff] }
 0x55f   : > { %v2134_v28 = vsel %vm2070_vm0, 1e+30, %v5407_v58  ;;  %v2135_v1 = vsel %vm2071_vm1, 1e+30, %v5410_v59  ;;  %vm2072_vm2 = vcmp.le.f32.partialorder %v5421_v14, %v1995_v0  ;;  %vm2073_vm3 = vcmp.le.f32.partialorder %v7890_v51, %v1995_v0  ;;  %2212 = vmin.xlane.f32.xlu0 %v2211_v50  ;;  %v7903_v50 = vld [vmem:[#allocation29_spill] sm:$0xff] }
 0x560   : > { %v2136_v45 = vsel %vm2072_vm2, 1e+30, %v5421_v14  ;;  %v2137_v63 = vsel %vm2073_vm3, 1e+30, %v7890_v51  ;;  %v2214_v12 = vmin.f32 %v2134_v28, %v2135_v1  ;;  %v7904_v51 = vld [vmem:[#allocation31_spill] sm:$0xff]  ;;  %v7906_v14 = vld [vmem:[#allocation33_spill] sm:$0xff] }
 0x561   : > { %v1998_v4 = vpop.xlane.xlu1 %1997  ;;  %v2217_v19 = vmin.f32 %v2136_v45, %v2137_v63 }
 0x562   : > { %vm2074_vm4 = vcmp.le.f32.partialorder %v5437_v62, %v1998_v4  ;;  %vm2075_vm5 = vcmp.le.f32.partialorder %v7902_v2, %v1998_v4  ;;  %v2001_v55 = vpop.xlane.xlu0 %2000  ;;  %2215 = vmin.xlane.f32.xlu1 %v2214_v12  ;;  %v7905_v4 = vld [vmem:[#allocation32_spill] sm:$0xff] }
 0x563   : > { %v2138_v59 = vsel %vm2074_vm4, 1e+30, %v5437_v62  ;;  %v2139_v58 = vsel %vm2075_vm5, 1e+30, %v7902_v2  ;;  %vm2076_vm6 = vcmp.le.f32.partialorder %v5445_v35, %v2001_v55  ;;  %vm2077_vm7 = vcmp.le.f32.partialorder %v7903_v50, %v2001_v55  ;;  %2218 = vmin.xlane.f32.xlu0 %v2217_v19  ;;  %v7907_v19 = vld [vmem:[#allocation34_spill] sm:$0xff] }
 0x564   : > { %v2140_v0 = vsel %vm2076_vm6, 1e+30, %v5445_v35  ;;  %v2141_v28 = vsel %vm2077_vm7, 1e+30, %v7903_v50  ;;  %v2220_v1 = vmin.f32 %v2138_v59, %v2139_v58  ;;  %v7908_v50 = vld [vmem:[#allocation39_spill] sm:$0xff] }
 0x565   : > { %v2004_v45 = vpop.xlane.xlu1 %2003  ;;  %v2223_v63 = vmin.f32 %v2140_v0, %v2141_v28 }
 0x566   : > { %vm2078_vm10 = vcmp.le.f32.partialorder %v7904_v51, %v2004_v45  ;;  %vm2079_vm11 = vcmp.le.f32.partialorder %v7905_v4, %v2004_v45  ;;  %v2007_v12 = vpop.xlane.xlu0 %2006  ;;  %2221 = vmin.xlane.f32.xlu1 %v2220_v1  ;;  %v7909_v45 = vld [vmem:[#allocation40_spill] sm:$0xff] }
 0x567   : > { %v2142_v2 = vsel %vm2078_vm10, 1e+30, %v7904_v51  ;;  %v2143_v62 = vsel %vm2079_vm11, 1e+30, %v7905_v4  ;;  %vm2080_vm12 = vcmp.le.f32.partialorder %v7906_v14, %v2007_v12  ;;  %vm2081_vm13 = vcmp.le.f32.partialorder %v7907_v19, %v2007_v12  ;;  %2224 = vmin.xlane.f32.xlu0 %v2223_v63 }
 0x568   : > { %v2144_v55 = vsel %vm2080_vm12, 1e+30, %v7906_v14  ;;  %v2145_v58 = vsel %vm2081_vm13, 1e+30, %v7907_v19  ;;  %v2226_v59 = vmin.f32 %v2142_v2, %v2143_v62 }
 0x569   : > { %v2010_v0 = vpop.xlane.xlu1 %2009  ;;  %v2229_v28 = vmin.f32 %v2144_v55, %v2145_v58  ;;  %v7910_v58 = vld [vmem:[#allocation44_spill] sm:$0xff] }
 0x56a   : > { %vm2082_vm14 = vcmp.le.f32.partialorder %v7908_v50, %v2010_v0  ;;  %vm2083_vm15 = vcmp.le.f32.partialorder %v7909_v45, %v2010_v0  ;;  %v2013_v1 = vpop.xlane.xlu0 %2012  ;;  %2227 = vmin.xlane.f32.xlu1 %v2226_v59 }
 0x56b   : > { %v2146_v4 = vsel %vm2082_vm14, 1e+30, %v7908_v50  ;;  %v2147_v51 = vsel %vm2083_vm15, 1e+30, %v7909_v45  ;;  %vm2084_vm0 = vcmp.le.f32.partialorder %v7893_v41, %v2013_v1  ;;  %vm2085_vm1 = vcmp.le.f32.partialorder %v7894_v13, %v2013_v1  ;;  %2230 = vmin.xlane.f32.xlu0 %v2229_v28 }
 0x56c   : > { %v2148_v63 = vsel %vm2084_vm0, 1e+30, %v7893_v41  ;;  %v2149_v62 = vsel %vm2085_vm1, 1e+30, %v7894_v13  ;;  %v2232_v2 = vmin.f32 %v2146_v4, %v2147_v51 }
 0x56d   : > { %v2016_v12 = vpop.xlane.xlu1 %2015  ;;  %v2235_v55 = vmin.f32 %v2148_v63, %v2149_v62 }
 0x56e   : > { %vm2086_vm2 = vcmp.le.f32.partialorder %v7895_v11, %v2016_v12  ;;  %vm2087_vm3 = vcmp.le.f32.partialorder %v7910_v58, %v2016_v12  ;;  %v2019_v59 = vpop.xlane.xlu0 %2018  ;;  %2233 = vmin.xlane.f32.xlu1 %v2232_v2 }
 0x56f   : > { %v2150_v0 = vsel %vm2086_vm2, 1e+30, %v7895_v11  ;;  %v2151_v45 = vsel %vm2087_vm3, 1e+30, %v7910_v58  ;;  %vm2088_vm4 = vcmp.le.f32.partialorder %v7897_v21, %v2019_v59  ;;  %vm2089_vm5 = vcmp.le.f32.partialorder %v7898_v25, %v2019_v59  ;;  %2236 = vmin.xlane.f32.xlu0 %v2235_v55 }
 0x570   : > { %v2152_v28 = vsel %vm2088_vm4, 1e+30, %v7897_v21  ;;  %v2153_v51 = vsel %vm2089_vm5, 1e+30, %v7898_v25  ;;  %v2238_v4 = vmin.f32 %v2150_v0, %v2151_v45 }
 0x571   : > { %v2022_v1 = vpop.xlane.xlu1 %2021  ;;  %v2241_v63 = vmin.f32 %v2152_v28, %v2153_v51 }
 0x572   : > { %vm2090_vm6 = vcmp.le.f32.partialorder %v7879_v42, %v2022_v1  ;;  %vm2091_vm7 = vcmp.le.f32.partialorder %v7880_v57, %v2022_v1  ;;  %v2025_v62 = vpop.xlane.xlu0 %2024  ;;  %2239 = vmin.xlane.f32.xlu1 %v2238_v4 }
 0x573   : > { %v2154_v2 = vsel %vm2090_vm6, 1e+30, %v7879_v42  ;;  %v2155_v12 = vsel %vm2091_vm7, 1e+30, %v7880_v57  ;;  %vm2092_vm10 = vcmp.le.f32.partialorder %v7881_v24, %v2025_v62  ;;  %vm2093_vm11 = vcmp.le.f32.partialorder %v7882_v20, %v2025_v62  ;;  %2242 = vmin.xlane.f32.xlu0 %v2241_v63 }
 0x574   : > { %v2156_v55 = vsel %vm2092_vm10, 1e+30, %v7881_v24  ;;  %v2157_v45 = vsel %vm2093_vm11, 1e+30, %v7882_v20  ;;  %v2244_v59 = vmin.f32 %v2154_v2, %v2155_v12 }
 0x575   : > { %v2028_v0 = vpop.xlane.xlu1 %2027  ;;  %v2247_v28 = vmin.f32 %v2156_v55, %v2157_v45 }
 0x576   : > { %vm2094_vm12 = vcmp.le.f32.partialorder %v7883_v26, %v2028_v0  ;;  %vm2095_vm13 = vcmp.le.f32.partialorder %v7884_v9, %v2028_v0  ;;  %v2031_v51 = vpop.xlane.xlu0 %2030  ;;  %2245 = vmin.xlane.f32.xlu1 %v2244_v59 }
 0x577   : > { %v2158_v4 = vsel %vm2094_vm12, 1e+30, %v7883_v26  ;;  %v2159_v1 = vsel %vm2095_vm13, 1e+30, %v7884_v9  ;;  %vm2096_vm14 = vcmp.le.f32.partialorder %v5559_v16, %v2031_v51  ;;  %vm2097_vm15 = vcmp.le.f32.partialorder %v5562_v43, %v2031_v51  ;;  %2248 = vmin.xlane.f32.xlu0 %v2247_v28 }
 0x578   : > { %v2160_v63 = vsel %vm2096_vm14, 1e+30, %v5559_v16  ;;  %v2161_v62 = vsel %vm2097_vm15, 1e+30, %v5562_v43  ;;  %v2250_v2 = vmin.f32 %v2158_v4, %v2159_v1 }
 0x579   : > { %v2034_v12 = vpop.xlane.xlu1 %2033  ;;  %v2253_v55 = vmin.f32 %v2160_v63, %v2161_v62 }
 0x57a   : > { %vm2098_vm0 = vcmp.le.f32.partialorder %v5567_v32, %v2034_v12  ;;  %vm2099_vm1 = vcmp.le.f32.partialorder %v5570_v3, %v2034_v12  ;;  %2251 = vmin.xlane.f32.xlu1 %v2250_v2 }
 0x57b   : > { %v2162_v45 = vsel %vm2098_vm0, 1e+30, %v5567_v32  ;;  %v2163_v59 = vsel %vm2099_vm1, 1e+30, %v5570_v3  ;;  %2254 = vmin.xlane.f32.xlu0 %v2253_v55 }
 0x57c   : > { %v2256_v0 = vmin.f32 %v2162_v45, %v2163_v59 }
 0x57d   : > { %v2037_v51 = vpop.xlane.xlu0 %2036 }
 0x57e   : > { %vm2100_vm2 = vcmp.le.f32.partialorder %v5575_v44, %v2037_v51  ;;  %vm2101_vm3 = vcmp.le.f32.partialorder %v5578_v33, %v2037_v51  ;;  %2257 = vmin.xlane.f32.xlu1 %v2256_v0 }
 0x57f   : > { %v2164_v28 = vsel %vm2100_vm2, 1e+30, %v5575_v44  ;;  %v2165_v4 = vsel %vm2101_vm3, 1e+30, %v5578_v33 }
 0x580   : > { %v2259_v1 = vmin.f32 %v2164_v28, %v2165_v4 }
 0x582   : > { %2260 = vmin.xlane.f32.xlu0 %v2259_v1 }
 0x593   : > { %v2168_v63 = vpop.xlane.xlu1 %2167 }
 0x594   : > { %vm2262_vm4 = vcmp.le.f32.partialorder %v5327_v15, %v2168_v63  ;;  %vm2263_vm5 = vcmp.le.f32.partialorder %v5330_v17, %v2168_v63 }
 0x595   : > { %v2326_v62 = vsel %vm2262_vm4, 1e+30, %v5327_v15  ;;  %v2327_v2 = vsel %vm2263_vm5, 1e+30, %v5330_v17 }
 0x596   : > { %v2390_v12 = vmin.f32 %v2326_v62, %v2327_v2 }
 0x597   : > { %v2171_v55 = vpop.xlane.xlu0 %2170 }
 0x598   : > { %vm2264_vm6 = vcmp.le.f32.partialorder %v5335_v22, %v2171_v55  ;;  %vm2265_vm7 = vcmp.le.f32.partialorder %v5338_v23, %v2171_v55  ;;  %2391 = vmin.xlane.f32.xlu1 %v2390_v12 }
 0x599   : > { %v2328_v45 = vsel %vm2264_vm6, 1e+30, %v5335_v22  ;;  %v2329_v59 = vsel %vm2265_vm7, 1e+30, %v5338_v23 }
 0x59a   : > { %v2393_v0 = vmin.f32 %v2328_v45, %v2329_v59 }
 0x59b   : > { %v2174_v51 = vpop.xlane.xlu1 %2173 }
 0x59c   : > { %vm2266_vm10 = vcmp.le.f32.partialorder %v5343_v29, %v2174_v51  ;;  %vm2267_vm11 = vcmp.le.f32.partialorder %v5346_v30, %v2174_v51  ;;  %2394 = vmin.xlane.f32.xlu0 %v2393_v0 }
 0x59d   : > { %v2330_v28 = vsel %vm2266_vm10, 1e+30, %v5343_v29  ;;  %v2331_v4 = vsel %vm2267_vm11, 1e+30, %v5346_v30 }
 0x59e   : > { %v2396_v1 = vmin.f32 %v2330_v28, %v2331_v4 }
 0x59f   : > { %v2177_v63 = vpop.xlane.xlu0 %2176 }
 0x5a0   : > { %vm2268_vm12 = vcmp.le.f32.partialorder %v5351_v36, %v2177_v63  ;;  %vm2269_vm13 = vcmp.le.f32.partialorder %v5354_v38, %v2177_v63  ;;  %2397 = vmin.xlane.f32.xlu1 %v2396_v1 }
 0x5a1   : > { %v2332_v62 = vsel %vm2268_vm12, 1e+30, %v5351_v36  ;;  %v2333_v2 = vsel %vm2269_vm13, 1e+30, %v5354_v38 }
 0x5a2   : > { %v2399_v12 = vmin.f32 %v2332_v62, %v2333_v2 }
 0x5a3   : > { %v2180_v55 = vpop.xlane.xlu1 %2179 }
 0x5a4   : > { %vm2270_vm14 = vcmp.le.f32.partialorder %v5359_v46, %v2180_v55  ;;  %vm2271_vm15 = vcmp.le.f32.partialorder %v5362_v47, %v2180_v55  ;;  %2400 = vmin.xlane.f32.xlu0 %v2399_v12 }
 0x5a5   : > { %v2334_v45 = vsel %vm2270_vm14, 1e+30, %v5359_v46  ;;  %v2335_v59 = vsel %vm2271_vm15, 1e+30, %v5362_v47 }
 0x5a6   : > { %v2402_v0 = vmin.f32 %v2334_v45, %v2335_v59 }
 0x5a7   : > { %v2183_v51 = vpop.xlane.xlu0 %2182 }
 0x5a8   : > { %vm2272_vm0 = vcmp.le.f32.partialorder %v5367_v53, %v2183_v51  ;;  %vm2273_vm1 = vcmp.le.f32.partialorder %v5370_v54, %v2183_v51  ;;  %2403 = vmin.xlane.f32.xlu1 %v2402_v0 }
 0x5a9   : > { %v2336_v28 = vsel %vm2272_vm0, 1e+30, %v5367_v53  ;;  %v2337_v4 = vsel %vm2273_vm1, 1e+30, %v5370_v54 }
 0x5aa   : > { %v2405_v1 = vmin.f32 %v2336_v28, %v2337_v4 }
 0x5ab   : > { %v2186_v63 = vpop.xlane.xlu1 %2185 }
 0x5ac   : > { %vm2274_vm2 = vcmp.le.f32.partialorder %v5375_v60, %v2186_v63  ;;  %vm2275_vm3 = vcmp.le.f32.partialorder %v5378_v61, %v2186_v63  ;;  %2406 = vmin.xlane.f32.xlu0 %v2405_v1 }
 0x5ad   : > { %v2338_v62 = vsel %vm2274_vm2, 1e+30, %v5375_v60  ;;  %v2339_v2 = vsel %vm2275_vm3, 1e+30, %v5378_v61 }
 0x5ae   : > { %v2408_v12 = vmin.f32 %v2338_v62, %v2339_v2 }
 0x5af   : > { %v2189_v55 = vpop.xlane.xlu0 %2188 }
 0x5b0   : > { %vm2276_vm4 = vcmp.le.f32.partialorder %v5383_v5, %v2189_v55  ;;  %vm2277_vm5 = vcmp.le.f32.partialorder %v5386_v6, %v2189_v55  ;;  %2409 = vmin.xlane.f32.xlu1 %v2408_v12 }
 0x5b1   : > { %v2340_v45 = vsel %vm2276_vm4, 1e+30, %v5383_v5  ;;  %v2341_v59 = vsel %vm2277_vm5, 1e+30, %v5386_v6 }
 0x5b2   : > { %v2411_v0 = vmin.f32 %v2340_v45, %v2341_v59 }
 0x5b3   : > { %v2192_v51 = vpop.xlane.xlu1 %2191 }
 0x5b4   : > { %vm2278_vm6 = vcmp.le.f32.partialorder %v5391_v18, %v2192_v51  ;;  %vm2279_vm7 = vcmp.le.f32.partialorder %v7885_v52, %v2192_v51  ;;  %2412 = vmin.xlane.f32.xlu0 %v2411_v0 }
 0x5b5   : > { %v2342_v28 = vsel %vm2278_vm6, 1e+30, %v5391_v18  ;;  %v2343_v4 = vsel %vm2279_vm7, 1e+30, %v7885_v52 }
 0x5b6   : > { %v2414_v1 = vmin.f32 %v2342_v28, %v2343_v4 }
 0x5b7   : > { %v2195_v63 = vpop.xlane.xlu0 %2194 }
 0x5b8   : > { %vm2280_vm10 = vcmp.le.f32.partialorder %v7886_v37, %v2195_v63  ;;  %vm2281_vm11 = vcmp.le.f32.partialorder %v7899_v34, %v2195_v63  ;;  %2415 = vmin.xlane.f32.xlu1 %v2414_v1 }
 0x5b9   : > { %v2344_v62 = vsel %vm2280_vm10, 1e+30, %v7886_v37  ;;  %v2345_v2 = vsel %vm2281_vm11, 1e+30, %v7899_v34 }
 0x5ba   : > { %v2417_v12 = vmin.f32 %v2344_v62, %v2345_v2  ;;  %v7911_v62 = vld [vmem:[#allocation28_spill] sm:$0xff] }
 0x5bc   : > { %2418 = vmin.xlane.f32.xlu0 %v2417_v12 }
 0x5d7   : > { %v2201_v55 = vpop.xlane.xlu0 %2200 }
 0x5d8   : > { %vm2284_vm12 = vcmp.le.f32.partialorder %v5413_v7, %v2201_v55  ;;  %vm2285_vm13 = vcmp.le.f32.partialorder %v5416_v8, %v2201_v55 }
 0x5d9   : > { %v2348_v45 = vsel %vm2284_vm12, 1e+30, %v5413_v7  ;;  %v2349_v59 = vsel %vm2285_vm13, 1e+30, %v5416_v8 }
 0x5da   : > { %v2423_v0 = vmin.f32 %v2348_v45, %v2349_v59  ;;  %v7912_v45 = vld [vmem:[#allocation30_spill] sm:$0xff] }
 0x5db   : > { %v2198_v51 = vpop.xlane.xlu1 %2197 }
 0x5dc   : > { %vm2282_vm14 = vcmp.le.f32.partialorder %v7888_v31, %v2198_v51  ;;  %vm2283_vm15 = vcmp.le.f32.partialorder %v7889_v27, %v2198_v51  ;;  %2424 = vmin.xlane.f32.xlu0 %v2423_v0 }
 0x5dd   : > { %v2346_v28 = vsel %vm2282_vm14, 1e+30, %v7888_v31  ;;  %v2347_v4 = vsel %vm2283_vm15, 1e+30, %v7889_v27 }
 0x5de   : > { %v2420_v1 = vmin.f32 %v2346_v28, %v2347_v4 }
 0x5e0   : > { %2421 = vmin.xlane.f32.xlu1 %v2420_v1 }
 0x5e3   : > { %v2204_v63 = vpop.xlane.xlu1 %2203 }
 0x5e4   : > { %vm2286_vm0 = vcmp.le.f32.partialorder %v5448_v39, %v2204_v63  ;;  %vm2287_vm1 = vcmp.le.f32.partialorder %v7911_v62, %v2204_v63  ;;  %v2207_v2 = vpop.xlane.xlu0 %2206 }
 0x5e5   : > { %v2350_v12 = vsel %vm2286_vm0, 1e+30, %v5448_v39  ;;  %v2351_v55 = vsel %vm2287_vm1, 1e+30, %v7911_v62  ;;  %vm2288_vm2 = vcmp.le.f32.partialorder %v5457_v10, %v2207_v2  ;;  %vm2289_vm3 = vcmp.le.f32.partialorder %v7912_v45, %v2207_v2 }
 0x5e6   : > { %v2352_v59 = vsel %vm2288_vm2, 1e+30, %v5457_v10  ;;  %v2353_v0 = vsel %vm2289_vm3, 1e+30, %v7912_v45  ;;  %v2426_v51 = vmin.f32 %v2350_v12, %v2351_v55  ;;  %v7915_v45 = vld [vmem:[#allocation21_spill] sm:$0xff] }
 0x5e7   : > { %v2429_v28 = vmin.f32 %v2352_v59, %v2353_v0 }
 0x5e8   : > { %2427 = vmin.xlane.f32.xlu1 %v2426_v51  ;;  %v7913_v51 = vld [vmem:[#allocation17_spill] sm:$0xff] }
 0x5e9   : > { %2430 = vmin.xlane.f32.xlu0 %v2429_v28  ;;  %v7914_v28 = vld [vmem:[#allocation18_spill] sm:$0xff] }
 0x5eb   : > { %v2210_v4 = vpop.xlane.xlu1 %2209 }
 0x5ec   : > { %vm2290_vm4 = vcmp.le.f32.partialorder %v5483_v48, %v2210_v4  ;;  %vm2291_vm5 = vcmp.le.f32.partialorder %v5486_v49, %v2210_v4  ;;  %v2213_v1 = vpop.xlane.xlu0 %2212 }
 0x5ed   : > { %v2354_v63 = vsel %vm2290_vm4, 1e+30, %v5483_v48  ;;  %v2355_v62 = vsel %vm2291_vm5, 1e+30, %v5486_v49  ;;  %vm2292_vm6 = vcmp.le.f32.partialorder %v7900_v40, %v2213_v1  ;;  %vm2293_vm7 = vcmp.le.f32.partialorder %v7901_v56, %v2213_v1  ;;  %v7916_v1 = vld [vmem:[#allocation22_spill] sm:$0xff] }
 0x5ee   : > { %v2356_v2 = vsel %vm2292_vm6, 1e+30, %v7900_v40  ;;  %v2357_v12 = vsel %vm2293_vm7, 1e+30, %v7901_v56  ;;  %v2432_v55 = vmin.f32 %v2354_v63, %v2355_v62  ;;  %v7917_v40 = vld [vmem:[#allocation25_spill] sm:$0xff] }
 0x5ef   : > { %v2216_v59 = vpop.xlane.xlu1 %2215  ;;  %v2435_v0 = vmin.f32 %v2356_v2, %v2357_v12 }
 0x5f0   : > { %vm2294_vm10 = vcmp.le.f32.partialorder %v7913_v51, %v2216_v59  ;;  %vm2295_vm11 = vcmp.le.f32.partialorder %v7914_v28, %v2216_v59  ;;  %v2219_v4 = vpop.xlane.xlu0 %2218  ;;  %2433 = vmin.xlane.f32.xlu1 %v2432_v55  ;;  %v7918_v59 = vld [vmem:[#allocation26_spill] sm:$0xff] }
 0x5f1   : > { %v2358_v48 = vsel %vm2294_vm10, 1e+30, %v7913_v51  ;;  %v2359_v49 = vsel %vm2295_vm11, 1e+30, %v7914_v28  ;;  %vm2296_vm12 = vcmp.le.f32.partialorder %v7915_v45, %v2219_v4  ;;  %vm2297_vm13 = vcmp.le.f32.partialorder %v7916_v1, %v2219_v4  ;;  %2436 = vmin.xlane.f32.xlu0 %v2435_v0  ;;  %v7919_v0 = vld [vmem:[#allocation29_spill] sm:$0xff] }
 0x5f2   : > { %v2360_v56 = vsel %vm2296_vm12, 1e+30, %v7915_v45  ;;  %v2361_v62 = vsel %vm2297_vm13, 1e+30, %v7916_v1  ;;  %v2438_v63 = vmin.f32 %v2358_v48, %v2359_v49  ;;  %v7920_v1 = vld [vmem:[#allocation31_spill] sm:$0xff] }
 0x5f3   : > { %v2222_v2 = vpop.xlane.xlu1 %2221  ;;  %v2441_v12 = vmin.f32 %v2360_v56, %v2361_v62 }
 0x5f4   : > { %vm2298_vm14 = vcmp.le.f32.partialorder %v7917_v40, %v2222_v2  ;;  %vm2299_vm15 = vcmp.le.f32.partialorder %v7918_v59, %v2222_v2  ;;  %v2225_v55 = vpop.xlane.xlu0 %2224  ;;  %2439 = vmin.xlane.f32.xlu1 %v2438_v63  ;;  %v7921_v2 = vld [vmem:[#allocation32_spill] sm:$0xff] }
 0x5f5   : > { %v2362_v28 = vsel %vm2298_vm14, 1e+30, %v7917_v40  ;;  %v2363_v51 = vsel %vm2299_vm15, 1e+30, %v7918_v59  ;;  %vm2300_vm0 = vcmp.le.f32.partialorder %v5445_v35, %v2225_v55  ;;  %vm2301_vm1 = vcmp.le.f32.partialorder %v7919_v0, %v2225_v55  ;;  %2442 = vmin.xlane.f32.xlu0 %v2441_v12 }
 0x5f6   : > { %v2364_v4 = vsel %vm2300_vm0, 1e+30, %v5445_v35  ;;  %v2365_v48 = vsel %vm2301_vm1, 1e+30, %v7919_v0  ;;  %v2444_v49 = vmin.f32 %v2362_v28, %v2363_v51 }
 0x5f7   : > { %v2228_v56 = vpop.xlane.xlu1 %2227  ;;  %v2447_v62 = vmin.f32 %v2364_v4, %v2365_v48  ;;  %v7922_v48 = vld [vmem:[#allocation40_spill] sm:$0xff] }
 0x5f8   : > { %vm2302_vm2 = vcmp.le.f32.partialorder %v7920_v1, %v2228_v56  ;;  %vm2303_vm3 = vcmp.le.f32.partialorder %v7921_v2, %v2228_v56  ;;  %v2231_v63 = vpop.xlane.xlu0 %2230  ;;  %2445 = vmin.xlane.f32.xlu1 %v2444_v49 }
 0x5f9   : > { %v2366_v59 = vsel %vm2302_vm2, 1e+30, %v7920_v1  ;;  %v2367_v40 = vsel %vm2303_vm3, 1e+30, %v7921_v2  ;;  %vm2304_vm4 = vcmp.le.f32.partialorder %v7906_v14, %v2231_v63  ;;  %vm2305_vm5 = vcmp.le.f32.partialorder %v7907_v19, %v2231_v63  ;;  %2448 = vmin.xlane.f32.xlu0 %v2447_v62 }
 0x5fa   : > { %v2368_v12 = vsel %vm2304_vm4, 1e+30, %v7906_v14  ;;  %v2369_v51 = vsel %vm2305_vm5, 1e+30, %v7907_v19  ;;  %v2450_v28 = vmin.f32 %v2366_v59, %v2367_v40 }
 0x5fb   : > { %v2234_v55 = vpop.xlane.xlu1 %2233  ;;  %v2453_v4 = vmin.f32 %v2368_v12, %v2369_v51 }
 0x5fc   : > { %vm2306_vm6 = vcmp.le.f32.partialorder %v7908_v50, %v2234_v55  ;;  %vm2307_vm7 = vcmp.le.f32.partialorder %v7922_v48, %v2234_v55  ;;  %v2237_v49 = vpop.xlane.xlu0 %2236  ;;  %2451 = vmin.xlane.f32.xlu1 %v2450_v28 }
 0x5fd   : > { %v2370_v56 = vsel %vm2306_vm6, 1e+30, %v7908_v50  ;;  %v2371_v2 = vsel %vm2307_vm7, 1e+30, %v7922_v48  ;;  %vm2308_vm10 = vcmp.le.f32.partialorder %v7893_v41, %v2237_v49  ;;  %vm2309_vm11 = vcmp.le.f32.partialorder %v7894_v13, %v2237_v49  ;;  %2454 = vmin.xlane.f32.xlu0 %v2453_v4 }
 0x5fe   : > { %v2372_v62 = vsel %vm2308_vm10, 1e+30, %v7893_v41  ;;  %v2373_v40 = vsel %vm2309_vm11, 1e+30, %v7894_v13  ;;  %v2456_v59 = vmin.f32 %v2370_v56, %v2371_v2 }
 0x5ff   : > { %v2240_v63 = vpop.xlane.xlu1 %2239  ;;  %v2459_v12 = vmin.f32 %v2372_v62, %v2373_v40 }
 0x600   : > { %vm2310_vm12 = vcmp.le.f32.partialorder %v7895_v11, %v2240_v63  ;;  %vm2311_vm13 = vcmp.le.f32.partialorder %v7910_v58, %v2240_v63  ;;  %v2243_v51 = vpop.xlane.xlu0 %2242  ;;  %2457 = vmin.xlane.f32.xlu1 %v2456_v59 }
 0x601   : > { %v2374_v28 = vsel %vm2310_vm12, 1e+30, %v7895_v11  ;;  %v2375_v55 = vsel %vm2311_vm13, 1e+30, %v7910_v58  ;;  %vm2312_vm14 = vcmp.le.f32.partialorder %v7897_v21, %v2243_v51  ;;  %vm2313_vm15 = vcmp.le.f32.partialorder %v7898_v25, %v2243_v51  ;;  %2460 = vmin.xlane.f32.xlu0 %v2459_v12 }
 0x602   : > { %v2376_v4 = vsel %vm2312_vm14, 1e+30, %v7897_v21  ;;  %v2377_v2 = vsel %vm2313_vm15, 1e+30, %v7898_v25  ;;  %v2462_v49 = vmin.f32 %v2374_v28, %v2375_v55 }
 0x603   : > { %v2246_v56 = vpop.xlane.xlu1 %2245  ;;  %v2465_v62 = vmin.f32 %v2376_v4, %v2377_v2 }
 0x604   : > { %vm2314_vm0 = vcmp.le.f32.partialorder %v7879_v42, %v2246_v56  ;;  %vm2315_vm1 = vcmp.le.f32.partialorder %v7880_v57, %v2246_v56  ;;  %v2249_v40 = vpop.xlane.xlu0 %2248  ;;  %2463 = vmin.xlane.f32.xlu1 %v2462_v49 }
 0x605   : > { %v2378_v59 = vsel %vm2314_vm0, 1e+30, %v7879_v42  ;;  %v2379_v63 = vsel %vm2315_vm1, 1e+30, %v7880_v57  ;;  %vm2316_vm2 = vcmp.le.f32.partialorder %v7881_v24, %v2249_v40  ;;  %vm2317_vm3 = vcmp.le.f32.partialorder %v7882_v20, %v2249_v40  ;;  %2466 = vmin.xlane.f32.xlu0 %v2465_v62 }
 0x606   : > { %v2380_v12 = vsel %vm2316_vm2, 1e+30, %v7881_v24  ;;  %v2381_v51 = vsel %vm2317_vm3, 1e+30, %v7882_v20  ;;  %v2468_v28 = vmin.f32 %v2378_v59, %v2379_v63 }
 0x607   : > { %v2252_v55 = vpop.xlane.xlu1 %2251  ;;  %v2471_v4 = vmin.f32 %v2380_v12, %v2381_v51 }
 0x608   : > { %vm2318_vm4 = vcmp.le.f32.partialorder %v7883_v26, %v2252_v55  ;;  %vm2319_vm5 = vcmp.le.f32.partialorder %v7884_v9, %v2252_v55  ;;  %v2255_v2 = vpop.xlane.xlu0 %2254  ;;  %2469 = vmin.xlane.f32.xlu1 %v2468_v28 }
 0x609   : > { %v2382_v49 = vsel %vm2318_vm4, 1e+30, %v7883_v26  ;;  %v2383_v56 = vsel %vm2319_vm5, 1e+30, %v7884_v9  ;;  %vm2320_vm6 = vcmp.le.f32.partialorder %v5559_v16, %v2255_v2  ;;  %vm2321_vm7 = vcmp.le.f32.partialorder %v5562_v43, %v2255_v2  ;;  %2472 = vmin.xlane.f32.xlu0 %v2471_v4 }
 0x60a   : > { %v2384_v62 = vsel %vm2320_vm6, 1e+30, %v5559_v16  ;;  %v2385_v40 = vsel %vm2321_vm7, 1e+30, %v5562_v43  ;;  %v2474_v59 = vmin.f32 %v2382_v49, %v2383_v56 }
 0x60b   : > { %v2258_v63 = vpop.xlane.xlu1 %2257  ;;  %v2477_v12 = vmin.f32 %v2384_v62, %v2385_v40 }
 0x60c   : > { %vm2322_vm10 = vcmp.le.f32.partialorder %v5567_v32, %v2258_v63  ;;  %vm2323_vm11 = vcmp.le.f32.partialorder %v5570_v3, %v2258_v63  ;;  %2475 = vmin.xlane.f32.xlu1 %v2474_v59 }
 0x60d   : > { %v2386_v51 = vsel %vm2322_vm10, 1e+30, %v5567_v32  ;;  %v2387_v28 = vsel %vm2323_vm11, 1e+30, %v5570_v3  ;;  %2478 = vmin.xlane.f32.xlu0 %v2477_v12 }
 0x60e   : > { %v2480_v55 = vmin.f32 %v2386_v51, %v2387_v28 }
 0x60f   : > { %v2261_v2 = vpop.xlane.xlu0 %2260 }
 0x610   : > { %vm2324_vm12 = vcmp.le.f32.partialorder %v5575_v44, %v2261_v2  ;;  %vm2325_vm13 = vcmp.le.f32.partialorder %v5578_v33, %v2261_v2  ;;  %2481 = vmin.xlane.f32.xlu1 %v2480_v55 }
 0x611   : > { %v2388_v4 = vsel %vm2324_vm12, 1e+30, %v5575_v44  ;;  %v2389_v49 = vsel %vm2325_vm13, 1e+30, %v5578_v33 }
 0x612   : > { %v2483_v56 = vmin.f32 %v2388_v4, %v2389_v49 }
 0x614   : > { %2484 = vmin.xlane.f32.xlu0 %v2483_v56 }
 0x625   : > { %v2392_v62 = vpop.xlane.xlu1 %2391 }
 0x626   : > { %vm2486_vm14 = vcmp.le.f32.partialorder %v5327_v15, %v2392_v62  ;;  %vm2487_vm15 = vcmp.le.f32.partialorder %v5330_v17, %v2392_v62 }
 0x627   : > { %v2550_v40 = vsel %vm2486_vm14, 1e+30, %v5327_v15  ;;  %v2551_v59 = vsel %vm2487_vm15, 1e+30, %v5330_v17 }
 0x628   : > { %v2614_v63 = vmin.f32 %v2550_v40, %v2551_v59 }
 0x629   : > { %v2395_v12 = vpop.xlane.xlu0 %2394 }
 0x62a   : > { %vm2488_vm0 = vcmp.le.f32.partialorder %v5335_v22, %v2395_v12  ;;  %vm2489_vm1 = vcmp.le.f32.partialorder %v5338_v23, %v2395_v12  ;;  %2615 = vmin.xlane.f32.xlu1 %v2614_v63 }
 0x62b   : > { %v2552_v51 = vsel %vm2488_vm0, 1e+30, %v5335_v22  ;;  %v2553_v28 = vsel %vm2489_vm1, 1e+30, %v5338_v23 }
 0x62c   : > { %v2617_v55 = vmin.f32 %v2552_v51, %v2553_v28 }
 0x62d   : > { %v2398_v2 = vpop.xlane.xlu1 %2397 }
 0x62e   : > { %vm2490_vm2 = vcmp.le.f32.partialorder %v5343_v29, %v2398_v2  ;;  %vm2491_vm3 = vcmp.le.f32.partialorder %v5346_v30, %v2398_v2  ;;  %2618 = vmin.xlane.f32.xlu0 %v2617_v55 }
 0x62f   : > { %v2554_v4 = vsel %vm2490_vm2, 1e+30, %v5343_v29  ;;  %v2555_v49 = vsel %vm2491_vm3, 1e+30, %v5346_v30 }
 0x630   : > { %v2620_v56 = vmin.f32 %v2554_v4, %v2555_v49 }
 0x631   : > { %v2401_v62 = vpop.xlane.xlu0 %2400 }
 0x632   : > { %vm2492_vm4 = vcmp.le.f32.partialorder %v5351_v36, %v2401_v62  ;;  %vm2493_vm5 = vcmp.le.f32.partialorder %v5354_v38, %v2401_v62  ;;  %2621 = vmin.xlane.f32.xlu1 %v2620_v56 }
 0x633   : > { %v2556_v40 = vsel %vm2492_vm4, 1e+30, %v5351_v36  ;;  %v2557_v59 = vsel %vm2493_vm5, 1e+30, %v5354_v38 }
 0x634   : > { %v2623_v63 = vmin.f32 %v2556_v40, %v2557_v59 }
 0x635   : > { %v2404_v12 = vpop.xlane.xlu1 %2403 }
 0x636   : > { %vm2494_vm6 = vcmp.le.f32.partialorder %v5359_v46, %v2404_v12  ;;  %vm2495_vm7 = vcmp.le.f32.partialorder %v5362_v47, %v2404_v12  ;;  %2624 = vmin.xlane.f32.xlu0 %v2623_v63 }
 0x637   : > { %v2558_v51 = vsel %vm2494_vm6, 1e+30, %v5359_v46  ;;  %v2559_v28 = vsel %vm2495_vm7, 1e+30, %v5362_v47 }
 0x638   : > { %v2626_v55 = vmin.f32 %v2558_v51, %v2559_v28 }
 0x639   : > { %v2407_v2 = vpop.xlane.xlu0 %2406 }
 0x63a   : > { %vm2496_vm10 = vcmp.le.f32.partialorder %v5367_v53, %v2407_v2  ;;  %vm2497_vm11 = vcmp.le.f32.partialorder %v5370_v54, %v2407_v2  ;;  %2627 = vmin.xlane.f32.xlu1 %v2626_v55 }
 0x63b   : > { %v2560_v4 = vsel %vm2496_vm10, 1e+30, %v5367_v53  ;;  %v2561_v49 = vsel %vm2497_vm11, 1e+30, %v5370_v54 }
 0x63c   : > { %v2629_v56 = vmin.f32 %v2560_v4, %v2561_v49 }
 0x63d   : > { %v2410_v62 = vpop.xlane.xlu1 %2409 }
 0x63e   : > { %vm2498_vm12 = vcmp.le.f32.partialorder %v5375_v60, %v2410_v62  ;;  %vm2499_vm13 = vcmp.le.f32.partialorder %v5378_v61, %v2410_v62  ;;  %2630 = vmin.xlane.f32.xlu0 %v2629_v56 }
 0x63f   : > { %v2562_v40 = vsel %vm2498_vm12, 1e+30, %v5375_v60  ;;  %v2563_v59 = vsel %vm2499_vm13, 1e+30, %v5378_v61 }
 0x640   : > { %v2632_v63 = vmin.f32 %v2562_v40, %v2563_v59 }
 0x641   : > { %v2413_v12 = vpop.xlane.xlu0 %2412 }
 0x642   : > { %vm2500_vm14 = vcmp.le.f32.partialorder %v5383_v5, %v2413_v12  ;;  %vm2501_vm15 = vcmp.le.f32.partialorder %v5386_v6, %v2413_v12  ;;  %2633 = vmin.xlane.f32.xlu1 %v2632_v63 }
 0x643   : > { %v2564_v51 = vsel %vm2500_vm14, 1e+30, %v5383_v5  ;;  %v2565_v28 = vsel %vm2501_vm15, 1e+30, %v5386_v6 }
 0x644   : > { %v2635_v55 = vmin.f32 %v2564_v51, %v2565_v28 }
 0x645   : > { %v2416_v2 = vpop.xlane.xlu1 %2415 }
 0x646   : > { %vm2502_vm0 = vcmp.le.f32.partialorder %v5391_v18, %v2416_v2  ;;  %vm2503_vm1 = vcmp.le.f32.partialorder %v7885_v52, %v2416_v2  ;;  %2636 = vmin.xlane.f32.xlu0 %v2635_v55 }
 0x647   : > { %v2566_v4 = vsel %vm2502_vm0, 1e+30, %v5391_v18  ;;  %v2567_v49 = vsel %vm2503_vm1, 1e+30, %v7885_v52 }
 0x648   : > { %v2638_v56 = vmin.f32 %v2566_v4, %v2567_v49 }
 0x649   : > { %v2419_v62 = vpop.xlane.xlu0 %2418 }
 0x64a   : > { %vm2504_vm2 = vcmp.le.f32.partialorder %v7886_v37, %v2419_v62  ;;  %vm2505_vm3 = vcmp.le.f32.partialorder %v7899_v34, %v2419_v62  ;;  %2639 = vmin.xlane.f32.xlu1 %v2638_v56 }
 0x64b   : > { %v2568_v40 = vsel %vm2504_vm2, 1e+30, %v7886_v37  ;;  %v2569_v59 = vsel %vm2505_vm3, 1e+30, %v7899_v34 }
 0x64c   : > { %v2641_v63 = vmin.f32 %v2568_v40, %v2569_v59  ;;  %v7923_v40 = vld [vmem:[#allocation28_spill] sm:$0xff] }
 0x64e   : > { %2642 = vmin.xlane.f32.xlu0 %v2641_v63 }
 0x669   : > { %v2425_v12 = vpop.xlane.xlu0 %2424 }
 0x66a   : > { %vm2508_vm4 = vcmp.le.f32.partialorder %v5413_v7, %v2425_v12  ;;  %vm2509_vm5 = vcmp.le.f32.partialorder %v5416_v8, %v2425_v12 }
 0x66b   : > { %v2572_v51 = vsel %vm2508_vm4, 1e+30, %v5413_v7  ;;  %v2573_v28 = vsel %vm2509_vm5, 1e+30, %v5416_v8 }
 0x66c   : > { %v2647_v55 = vmin.f32 %v2572_v51, %v2573_v28  ;;  %v7924_v51 = vld [vmem:[#allocation30_spill] sm:$0xff] }
 0x66d   : > { %v2422_v2 = vpop.xlane.xlu1 %2421 }
 0x66e   : > { %vm2506_vm6 = vcmp.le.f32.partialorder %v7888_v31, %v2422_v2  ;;  %vm2507_vm7 = vcmp.le.f32.partialorder %v7889_v27, %v2422_v2  ;;  %2648 = vmin.xlane.f32.xlu0 %v2647_v55 }
 0x66f   : > { %v2570_v4 = vsel %vm2506_vm6, 1e+30, %v7888_v31  ;;  %v2571_v49 = vsel %vm2507_vm7, 1e+30, %v7889_v27  ;;  %v7927_v31 = vld [vmem:[#allocation37_spill] sm:$0xff] }
 0x670   : > { %v2644_v56 = vmin.f32 %v2570_v4, %v2571_v49 }
 0x672   : > { %2645 = vmin.xlane.f32.xlu1 %v2644_v56  ;;  %v7925_v56 = vld [vmem:[#allocation35_spill] sm:$0xff] }
 0x675   : > { %v2428_v62 = vpop.xlane.xlu1 %2427 }
 0x676   : > { %vm2510_vm10 = vcmp.le.f32.partialorder %v5448_v39, %v2428_v62  ;;  %vm2511_vm11 = vcmp.le.f32.partialorder %v7923_v40, %v2428_v62  ;;  %v2431_v59 = vpop.xlane.xlu0 %2430  ;;  %v7926_v62 = vld [vmem:[#allocation36_spill] sm:$0xff] }
 0x677   : > { %v2574_v63 = vsel %vm2510_vm10, 1e+30, %v5448_v39  ;;  %v2575_v12 = vsel %vm2511_vm11, 1e+30, %v7923_v40  ;;  %vm2512_vm12 = vcmp.le.f32.partialorder %v5457_v10, %v2431_v59  ;;  %vm2513_vm13 = vcmp.le.f32.partialorder %v7924_v51, %v2431_v59  ;;  %v7928_v59 = vld [vmem:[#allocation38_spill] sm:$0xff] }
 0x678   : > { %v2576_v28 = vsel %vm2512_vm12, 1e+30, %v5457_v10  ;;  %v2577_v55 = vsel %vm2513_vm13, 1e+30, %v7924_v51  ;;  %v2650_v2 = vmin.f32 %v2574_v63, %v2575_v12 }
 0x679   : > { %v2653_v4 = vmin.f32 %v2576_v28, %v2577_v55 }
 0x67a   : > { %2651 = vmin.xlane.f32.xlu1 %v2650_v2  ;;  %v7929_v2 = vld [vmem:[#allocation17_spill] sm:$0xff] }
 0x67b   : > { %2654 = vmin.xlane.f32.xlu0 %v2653_v4  ;;  %v7930_v4 = vld [vmem:[#allocation18_spill] sm:$0xff] }
 0x67d   : > { %v2434_v49 = vpop.xlane.xlu1 %2433 }
 0x67e   : > { %vm2514_vm14 = vcmp.le.f32.partialorder %v7925_v56, %v2434_v49  ;;  %vm2515_vm15 = vcmp.le.f32.partialorder %v7926_v62, %v2434_v49  ;;  %v2437_v39 = vpop.xlane.xlu0 %2436 }
 0x67f   : > { %v2578_v40 = vsel %vm2514_vm14, 1e+30, %v7925_v56  ;;  %v2579_v27 = vsel %vm2515_vm15, 1e+30, %v7926_v62  ;;  %vm2516_vm0 = vcmp.le.f32.partialorder %v7927_v31, %v2437_v39  ;;  %vm2517_vm1 = vcmp.le.f32.partialorder %v7928_v59, %v2437_v39  ;;  %v7931_v39 = vld [vmem:[#allocation22_spill] sm:$0xff] }
 0x680   : > { %v2580_v51 = vsel %vm2516_vm0, 1e+30, %v7927_v31  ;;  %v2581_v63 = vsel %vm2517_vm1, 1e+30, %v7928_v59  ;;  %v2656_v12 = vmin.f32 %v2578_v40, %v2579_v27  ;;  %v7932_v31 = vld [vmem:[#allocation25_spill] sm:$0xff] }
 0x681   : > { %v2440_v28 = vpop.xlane.xlu1 %2439  ;;  %v2659_v55 = vmin.f32 %v2580_v51, %v2581_v63 }
 0x682   : > { %vm2518_vm2 = vcmp.le.f32.partialorder %v7929_v2, %v2440_v28  ;;  %vm2519_vm3 = vcmp.le.f32.partialorder %v7930_v4, %v2440_v28  ;;  %v2443_v49 = vpop.xlane.xlu0 %2442  ;;  %2657 = vmin.xlane.f32.xlu1 %v2656_v12  ;;  %v7933_v28 = vld [vmem:[#allocation26_spill] sm:$0xff] }
 0x683   : > { %v2582_v56 = vsel %vm2518_vm2, 1e+30, %v7929_v2  ;;  %v2583_v62 = vsel %vm2519_vm3, 1e+30, %v7930_v4  ;;  %vm2520_vm4 = vcmp.le.f32.partialorder %v7915_v45, %v2443_v49  ;;  %vm2521_vm5 = vcmp.le.f32.partialorder %v7931_v39, %v2443_v49  ;;  %2660 = vmin.xlane.f32.xlu0 %v2659_v55 }
 0x684   : > { %v2584_v59 = vsel %vm2520_vm4, 1e+30, %v7915_v45  ;;  %v2585_v27 = vsel %vm2521_vm5, 1e+30, %v7931_v39  ;;  %v2662_v40 = vmin.f32 %v2582_v56, %v2583_v62 }
 0x685   : > { %v2446_v51 = vpop.xlane.xlu1 %2445  ;;  %v2665_v63 = vmin.f32 %v2584_v59, %v2585_v27  ;;  %v7934_v27 = vld [vmem:[#allocation32_spill] sm:$0xff] }
 0x686   : > { %vm2522_vm6 = vcmp.le.f32.partialorder %v7932_v31, %v2446_v51  ;;  %vm2523_vm7 = vcmp.le.f32.partialorder %v7933_v28, %v2446_v51  ;;  %v2449_v12 = vpop.xlane.xlu0 %2448  ;;  %2663 = vmin.xlane.f32.xlu1 %v2662_v40 }
 0x687   : > { %v2586_v4 = vsel %vm2522_vm6, 1e+30, %v7932_v31  ;;  %v2587_v2 = vsel %vm2523_vm7, 1e+30, %v7933_v28  ;;  %vm2524_vm10 = vcmp.le.f32.partialorder %v5445_v35, %v2449_v12  ;;  %vm2525_vm11 = vcmp.le.f32.partialorder %v7919_v0, %v2449_v12  ;;  %2666 = vmin.xlane.f32.xlu0 %v2665_v63 }
 0x688   : > { %v2588_v55 = vsel %vm2524_vm10, 1e+30, %v5445_v35  ;;  %v2589_v56 = vsel %vm2525_vm11, 1e+30, %v7919_v0  ;;  %v2668_v62 = vmin.f32 %v2586_v4, %v2587_v2 }
 0x689   : > { %v2452_v59 = vpop.xlane.xlu1 %2451  ;;  %v2671_v49 = vmin.f32 %v2588_v55, %v2589_v56 }
 0x68a   : > { %vm2526_vm12 = vcmp.le.f32.partialorder %v7920_v1, %v2452_v59  ;;  %vm2527_vm13 = vcmp.le.f32.partialorder %v7934_v27, %v2452_v59  ;;  %v2455_v40 = vpop.xlane.xlu0 %2454  ;;  %2669 = vmin.xlane.f32.xlu1 %v2668_v62 }
 0x68b   : > { %v2590_v51 = vsel %vm2526_vm12, 1e+30, %v7920_v1  ;;  %v2591_v28 = vsel %vm2527_vm13, 1e+30, %v7934_v27  ;;  %vm2528_vm14 = vcmp.le.f32.partialorder %v7906_v14, %v2455_v40  ;;  %vm2529_vm15 = vcmp.le.f32.partialorder %v7907_v19, %v2455_v40  ;;  %2672 = vmin.xlane.f32.xlu0 %v2671_v49 }
 0x68c   : > { %v2592_v63 = vsel %vm2528_vm14, 1e+30, %v7906_v14  ;;  %v2593_v2 = vsel %vm2529_vm15, 1e+30, %v7907_v19  ;;  %v2674_v4 = vmin.f32 %v2590_v51, %v2591_v28 }
 0x68d   : > { %v2458_v12 = vpop.xlane.xlu1 %2457  ;;  %v2677_v55 = vmin.f32 %v2592_v63, %v2593_v2 }
 0x68e   : > { %vm2530_vm0 = vcmp.le.f32.partialorder %v7908_v50, %v2458_v12  ;;  %vm2531_vm1 = vcmp.le.f32.partialorder %v7922_v48, %v2458_v12  ;;  %v2461_v56 = vpop.xlane.xlu0 %2460  ;;  %2675 = vmin.xlane.f32.xlu1 %v2674_v4 }
 0x68f   : > { %v2594_v62 = vsel %vm2530_vm0, 1e+30, %v7908_v50  ;;  %v2595_v59 = vsel %vm2531_vm1, 1e+30, %v7922_v48  ;;  %vm2532_vm2 = vcmp.le.f32.partialorder %v7893_v41, %v2461_v56  ;;  %vm2533_vm3 = vcmp.le.f32.partialorder %v7894_v13, %v2461_v56  ;;  %2678 = vmin.xlane.f32.xlu0 %v2677_v55 }
 0x690   : > { %v2596_v49 = vsel %vm2532_vm2, 1e+30, %v7893_v41  ;;  %v2597_v28 = vsel %vm2533_vm3, 1e+30, %v7894_v13  ;;  %v2680_v40 = vmin.f32 %v2594_v62, %v2595_v59 }
 0x691   : > { %v2464_v51 = vpop.xlane.xlu1 %2463  ;;  %v2683_v63 = vmin.f32 %v2596_v49, %v2597_v28 }
 0x692   : > { %vm2534_vm4 = vcmp.le.f32.partialorder %v7895_v11, %v2464_v51  ;;  %vm2535_vm5 = vcmp.le.f32.partialorder %v7910_v58, %v2464_v51  ;;  %v2467_v2 = vpop.xlane.xlu0 %2466  ;;  %2681 = vmin.xlane.f32.xlu1 %v2680_v40 }
 0x693   : > { %v2598_v4 = vsel %vm2534_vm4, 1e+30, %v7895_v11  ;;  %v2599_v12 = vsel %vm2535_vm5, 1e+30, %v7910_v58  ;;  %vm2536_vm6 = vcmp.le.f32.partialorder %v7897_v21, %v2467_v2  ;;  %vm2537_vm7 = vcmp.le.f32.partialorder %v7898_v25, %v2467_v2  ;;  %2684 = vmin.xlane.f32.xlu0 %v2683_v63 }
 0x694   : > { %v2600_v55 = vsel %vm2536_vm6, 1e+30, %v7897_v21  ;;  %v2601_v56 = vsel %vm2537_vm7, 1e+30, %v7898_v25  ;;  %v2686_v62 = vmin.f32 %v2598_v4, %v2599_v12 }
 0x695   : > { %v2470_v59 = vpop.xlane.xlu1 %2469  ;;  %v2689_v49 = vmin.f32 %v2600_v55, %v2601_v56 }
 0x696   : > { %vm2538_vm10 = vcmp.le.f32.partialorder %v7879_v42, %v2470_v59  ;;  %vm2539_vm11 = vcmp.le.f32.partialorder %v7880_v57, %v2470_v59  ;;  %v2473_v28 = vpop.xlane.xlu0 %2472  ;;  %2687 = vmin.xlane.f32.xlu1 %v2686_v62 }
 0x697   : > { %v2602_v40 = vsel %vm2538_vm10, 1e+30, %v7879_v42  ;;  %v2603_v51 = vsel %vm2539_vm11, 1e+30, %v7880_v57  ;;  %vm2540_vm12 = vcmp.le.f32.partialorder %v7881_v24, %v2473_v28  ;;  %vm2541_vm13 = vcmp.le.f32.partialorder %v7882_v20, %v2473_v28  ;;  %2690 = vmin.xlane.f32.xlu0 %v2689_v49 }
 0x698   : > { %v2604_v63 = vsel %vm2540_vm12, 1e+30, %v7881_v24  ;;  %v2605_v2 = vsel %vm2541_vm13, 1e+30, %v7882_v20  ;;  %v2692_v4 = vmin.f32 %v2602_v40, %v2603_v51 }
 0x699   : > { %v2476_v12 = vpop.xlane.xlu1 %2475  ;;  %v2695_v55 = vmin.f32 %v2604_v63, %v2605_v2 }
 0x69a   : > { %vm2542_vm14 = vcmp.le.f32.partialorder %v7883_v26, %v2476_v12  ;;  %vm2543_vm15 = vcmp.le.f32.partialorder %v7884_v9, %v2476_v12  ;;  %v2479_v56 = vpop.xlane.xlu0 %2478  ;;  %2693 = vmin.xlane.f32.xlu1 %v2692_v4 }
 0x69b   : > { %v2606_v62 = vsel %vm2542_vm14, 1e+30, %v7883_v26  ;;  %v2607_v59 = vsel %vm2543_vm15, 1e+30, %v7884_v9  ;;  %vm2544_vm0 = vcmp.le.f32.partialorder %v5559_v16, %v2479_v56  ;;  %vm2545_vm1 = vcmp.le.f32.partialorder %v5562_v43, %v2479_v56  ;;  %2696 = vmin.xlane.f32.xlu0 %v2695_v55 }
 0x69c   : > { %v2608_v49 = vsel %vm2544_vm0, 1e+30, %v5559_v16  ;;  %v2609_v28 = vsel %vm2545_vm1, 1e+30, %v5562_v43  ;;  %v2698_v40 = vmin.f32 %v2606_v62, %v2607_v59 }
 0x69d   : > { %v2482_v51 = vpop.xlane.xlu1 %2481  ;;  %v2701_v63 = vmin.f32 %v2608_v49, %v2609_v28 }
 0x69e   : > { %vm2546_vm2 = vcmp.le.f32.partialorder %v5567_v32, %v2482_v51  ;;  %vm2547_vm3 = vcmp.le.f32.partialorder %v5570_v3, %v2482_v51  ;;  %2699 = vmin.xlane.f32.xlu1 %v2698_v40 }
 0x69f   : > { %v2610_v2 = vsel %vm2546_vm2, 1e+30, %v5567_v32  ;;  %v2611_v4 = vsel %vm2547_vm3, 1e+30, %v5570_v3  ;;  %2702 = vmin.xlane.f32.xlu0 %v2701_v63 }
 0x6a0   : > { %v2704_v12 = vmin.f32 %v2610_v2, %v2611_v4 }
 0x6a1   : > { %v2485_v56 = vpop.xlane.xlu0 %2484 }
 0x6a2   : > { %vm2548_vm4 = vcmp.le.f32.partialorder %v5575_v44, %v2485_v56  ;;  %vm2549_vm5 = vcmp.le.f32.partialorder %v5578_v33, %v2485_v56  ;;  %2705 = vmin.xlane.f32.xlu1 %v2704_v12 }
 0x6a3   : > { %v2612_v55 = vsel %vm2548_vm4, 1e+30, %v5575_v44  ;;  %v2613_v62 = vsel %vm2549_vm5, 1e+30, %v5578_v33 }
 0x6a4   : > { %v2707_v59 = vmin.f32 %v2612_v55, %v2613_v62 }
 0x6a6   : > { %2708 = vmin.xlane.f32.xlu0 %v2707_v59 }
 0x6b7   : > { %v2616_v49 = vpop.xlane.xlu1 %2615 }
 0x6b8   : > { %vm2710_vm6 = vcmp.le.f32.partialorder %v5327_v15, %v2616_v49  ;;  %vm2711_vm7 = vcmp.le.f32.partialorder %v5330_v17, %v2616_v49 }
 0x6b9   : > { %v2774_v28 = vsel %vm2710_vm6, 1e+30, %v5327_v15  ;;  %v2775_v40 = vsel %vm2711_vm7, 1e+30, %v5330_v17 }
 0x6ba   : > { %v2838_v51 = vmin.f32 %v2774_v28, %v2775_v40 }
 0x6bb   : > { %v2619_v63 = vpop.xlane.xlu0 %2618 }
 0x6bc   : > { %vm2712_vm10 = vcmp.le.f32.partialorder %v5335_v22, %v2619_v63  ;;  %vm2713_vm11 = vcmp.le.f32.partialorder %v5338_v23, %v2619_v63  ;;  %2839 = vmin.xlane.f32.xlu1 %v2838_v51 }
 0x6bd   : > { %v2776_v2 = vsel %vm2712_vm10, 1e+30, %v5335_v22  ;;  %v2777_v4 = vsel %vm2713_vm11, 1e+30, %v5338_v23 }
 0x6be   : > { %v2841_v12 = vmin.f32 %v2776_v2, %v2777_v4 }
 0x6bf   : > { %v2622_v56 = vpop.xlane.xlu1 %2621 }
 0x6c0   : > { %vm2714_vm12 = vcmp.le.f32.partialorder %v5343_v29, %v2622_v56  ;;  %vm2715_vm13 = vcmp.le.f32.partialorder %v5346_v30, %v2622_v56  ;;  %2842 = vmin.xlane.f32.xlu0 %v2841_v12 }
 0x6c1   : > { %v2778_v55 = vsel %vm2714_vm12, 1e+30, %v5343_v29  ;;  %v2779_v62 = vsel %vm2715_vm13, 1e+30, %v5346_v30 }
 0x6c2   : > { %v2844_v59 = vmin.f32 %v2778_v55, %v2779_v62 }
 0x6c3   : > { %v2625_v49 = vpop.xlane.xlu0 %2624 }
 0x6c4   : > { %vm2716_vm14 = vcmp.le.f32.partialorder %v5351_v36, %v2625_v49  ;;  %vm2717_vm15 = vcmp.le.f32.partialorder %v5354_v38, %v2625_v49  ;;  %2845 = vmin.xlane.f32.xlu1 %v2844_v59 }
 0x6c5   : > { %v2780_v28 = vsel %vm2716_vm14, 1e+30, %v5351_v36  ;;  %v2781_v40 = vsel %vm2717_vm15, 1e+30, %v5354_v38 }
 0x6c6   : > { %v2847_v51 = vmin.f32 %v2780_v28, %v2781_v40 }
 0x6c7   : > { %v2628_v63 = vpop.xlane.xlu1 %2627 }
 0x6c8   : > { %vm2718_vm0 = vcmp.le.f32.partialorder %v5359_v46, %v2628_v63  ;;  %vm2719_vm1 = vcmp.le.f32.partialorder %v5362_v47, %v2628_v63  ;;  %2848 = vmin.xlane.f32.xlu0 %v2847_v51 }
 0x6c9   : > { %v2782_v2 = vsel %vm2718_vm0, 1e+30, %v5359_v46  ;;  %v2783_v4 = vsel %vm2719_vm1, 1e+30, %v5362_v47 }
 0x6ca   : > { %v2850_v12 = vmin.f32 %v2782_v2, %v2783_v4 }
 0x6cb   : > { %v2631_v56 = vpop.xlane.xlu0 %2630 }
 0x6cc   : > { %vm2720_vm2 = vcmp.le.f32.partialorder %v5367_v53, %v2631_v56  ;;  %vm2721_vm3 = vcmp.le.f32.partialorder %v5370_v54, %v2631_v56  ;;  %2851 = vmin.xlane.f32.xlu1 %v2850_v12 }
 0x6cd   : > { %v2784_v55 = vsel %vm2720_vm2, 1e+30, %v5367_v53  ;;  %v2785_v62 = vsel %vm2721_vm3, 1e+30, %v5370_v54 }
 0x6ce   : > { %v2853_v59 = vmin.f32 %v2784_v55, %v2785_v62 }
 0x6cf   : > { %v2634_v49 = vpop.xlane.xlu1 %2633 }
 0x6d0   : > { %vm2722_vm4 = vcmp.le.f32.partialorder %v5375_v60, %v2634_v49  ;;  %vm2723_vm5 = vcmp.le.f32.partialorder %v5378_v61, %v2634_v49  ;;  %2854 = vmin.xlane.f32.xlu0 %v2853_v59 }
 0x6d1   : > { %v2786_v28 = vsel %vm2722_vm4, 1e+30, %v5375_v60  ;;  %v2787_v40 = vsel %vm2723_vm5, 1e+30, %v5378_v61 }
 0x6d2   : > { %v2856_v51 = vmin.f32 %v2786_v28, %v2787_v40 }
 0x6d3   : > { %v2637_v63 = vpop.xlane.xlu0 %2636 }
 0x6d4   : > { %vm2724_vm6 = vcmp.le.f32.partialorder %v5383_v5, %v2637_v63  ;;  %vm2725_vm7 = vcmp.le.f32.partialorder %v5386_v6, %v2637_v63  ;;  %2857 = vmin.xlane.f32.xlu1 %v2856_v51 }
 0x6d5   : > { %v2788_v2 = vsel %vm2724_vm6, 1e+30, %v5383_v5  ;;  %v2789_v4 = vsel %vm2725_vm7, 1e+30, %v5386_v6 }
 0x6d6   : > { %v2859_v12 = vmin.f32 %v2788_v2, %v2789_v4 }
 0x6d7   : > { %v2640_v56 = vpop.xlane.xlu1 %2639 }
 0x6d8   : > { %vm2726_vm10 = vcmp.le.f32.partialorder %v5391_v18, %v2640_v56  ;;  %vm2727_vm11 = vcmp.le.f32.partialorder %v7885_v52, %v2640_v56  ;;  %2860 = vmin.xlane.f32.xlu0 %v2859_v12 }
 0x6d9   : > { %v2790_v55 = vsel %vm2726_vm10, 1e+30, %v5391_v18  ;;  %v2791_v62 = vsel %vm2727_vm11, 1e+30, %v7885_v52 }
 0x6da   : > { %v2862_v59 = vmin.f32 %v2790_v55, %v2791_v62  ;;  %v7935_v55 = vld [vmem:[#allocation23_spill] sm:$0xff]  ;;  %v7936_v62 = vld [vmem:[#allocation24_spill] sm:$0xff] }
 0x6db   : > { %v2643_v49 = vpop.xlane.xlu0 %2642 }
 0x6dc   : > { %vm2728_vm12 = vcmp.le.f32.partialorder %v7886_v37, %v2643_v49  ;;  %vm2729_vm13 = vcmp.le.f32.partialorder %v7899_v34, %v2643_v49  ;;  %2863 = vmin.xlane.f32.xlu1 %v2862_v59 }
 0x6dd   : > { %v2792_v28 = vsel %vm2728_vm12, 1e+30, %v7886_v37  ;;  %v2793_v40 = vsel %vm2729_vm13, 1e+30, %v7899_v34  ;;  %v7942_v34 = vld [vmem:[#allocation37_spill] sm:$0xff] }
 0x6de   : > { %v2865_v51 = vmin.f32 %v2792_v28, %v2793_v40 }
 0x6e0   : > { %2866 = vmin.xlane.f32.xlu0 %v2865_v51  ;;  %v7937_v51 = vld [vmem:[#allocation27_spill] sm:$0xff] }
 0x6fb   : > { %v2649_v63 = vpop.xlane.xlu0 %2648 }
 0x6fc   : > { %vm2732_vm14 = vcmp.le.f32.partialorder %v5413_v7, %v2649_v63  ;;  %vm2733_vm15 = vcmp.le.f32.partialorder %v5416_v8, %v2649_v63  ;;  %v7938_v63 = vld [vmem:[#allocation28_spill] sm:$0xff] }
 0x6fd   : > { %v2796_v2 = vsel %vm2732_vm14, 1e+30, %v5413_v7  ;;  %v2797_v4 = vsel %vm2733_vm15, 1e+30, %v5416_v8 }
 0x6fe   : > { %v2871_v12 = vmin.f32 %v2796_v2, %v2797_v4 }
 0x6ff   : > { %v2646_v56 = vpop.xlane.xlu1 %2645 }
 0x700   : > { %vm2730_vm0 = vcmp.le.f32.partialorder %v7935_v55, %v2646_v56  ;;  %vm2731_vm1 = vcmp.le.f32.partialorder %v7936_v62, %v2646_v56  ;;  %2872 = vmin.xlane.f32.xlu0 %v2871_v12  ;;  %v7939_v56 = vld [vmem:[#allocation30_spill] sm:$0xff] }
 0x701   : > { %v2794_v59 = vsel %vm2730_vm0, 1e+30, %v7935_v55  ;;  %v2795_v49 = vsel %vm2731_vm1, 1e+30, %v7936_v62  ;;  %v7940_v55 = vld [vmem:[#allocation35_spill] sm:$0xff] }
 0x702   : > { %v2868_v28 = vmin.f32 %v2794_v59, %v2795_v49 }
 0x704   : > { %2869 = vmin.xlane.f32.xlu1 %v2868_v28 }
 0x707   : > { %v2652_v40 = vpop.xlane.xlu1 %2651 }
 0x708   : > { %vm2734_vm2 = vcmp.le.f32.partialorder %v7937_v51, %v2652_v40  ;;  %vm2735_vm3 = vcmp.le.f32.partialorder %v7938_v63, %v2652_v40  ;;  %v2655_v7 = vpop.xlane.xlu0 %2654  ;;  %v7941_v40 = vld [vmem:[#allocation36_spill] sm:$0xff] }
 0x709   : > { %v2798_v2 = vsel %vm2734_vm2, 1e+30, %v7937_v51  ;;  %v2799_v4 = vsel %vm2735_vm3, 1e+30, %v7938_v63  ;;  %vm2736_vm4 = vcmp.le.f32.partialorder %v5457_v10, %v2655_v7  ;;  %vm2737_vm5 = vcmp.le.f32.partialorder %v7939_v56, %v2655_v7  ;;  %v7943_v7 = vld [vmem:[#allocation38_spill] sm:$0xff] }
 0x70a   : > { %v2800_v12 = vsel %vm2736_vm4, 1e+30, %v5457_v10  ;;  %v2801_v62 = vsel %vm2737_vm5, 1e+30, %v7939_v56  ;;  %v2874_v59 = vmin.f32 %v2798_v2, %v2799_v4 }
 0x70b   : > { %v2877_v49 = vmin.f32 %v2800_v12, %v2801_v62 }
 0x70c   : > { %2875 = vmin.xlane.f32.xlu1 %v2874_v59  ;;  %v7944_v59 = vld [vmem:[#allocation17_spill] sm:$0xff] }
 0x70d   : > { %2878 = vmin.xlane.f32.xlu0 %v2877_v49  ;;  %v7945_v49 = vld [vmem:[#allocation18_spill] sm:$0xff] }
 0x70f   : > { %v2658_v28 = vpop.xlane.xlu1 %2657 }
 0x710   : > { %vm2738_vm6 = vcmp.le.f32.partialorder %v7940_v55, %v2658_v28  ;;  %vm2739_vm7 = vcmp.le.f32.partialorder %v7941_v40, %v2658_v28  ;;  %v2661_v51 = vpop.xlane.xlu0 %2660 }
 0x711   : > { %v2802_v63 = vsel %vm2738_vm6, 1e+30, %v7940_v55  ;;  %v2803_v8 = vsel %vm2739_vm7, 1e+30, %v7941_v40  ;;  %vm2740_vm10 = vcmp.le.f32.partialorder %v7942_v34, %v2661_v51  ;;  %vm2741_vm11 = vcmp.le.f32.partialorder %v7943_v7, %v2661_v51 }
 0x712   : > { %v2804_v56 = vsel %vm2740_vm10, 1e+30, %v7942_v34  ;;  %v2805_v62 = vsel %vm2741_vm11, 1e+30, %v7943_v7  ;;  %v2880_v2 = vmin.f32 %v2802_v63, %v2803_v8 }
 0x713   : > { %v2664_v4 = vpop.xlane.xlu1 %2663  ;;  %v2883_v12 = vmin.f32 %v2804_v56, %v2805_v62 }
 0x714   : > { %vm2742_vm12 = vcmp.le.f32.partialorder %v7944_v59, %v2664_v4  ;;  %vm2743_vm13 = vcmp.le.f32.partialorder %v7945_v49, %v2664_v4  ;;  %v2667_v28 = vpop.xlane.xlu0 %2666  ;;  %2881 = vmin.xlane.f32.xlu1 %v2880_v2  ;;  %v7946_v4 = vld [vmem:[#allocation26_spill] sm:$0xff] }
 0x715   : > { %v2806_v55 = vsel %vm2742_vm12, 1e+30, %v7944_v59  ;;  %v2807_v40 = vsel %vm2743_vm13, 1e+30, %v7945_v49  ;;  %vm2744_vm14 = vcmp.le.f32.partialorder %v7915_v45, %v2667_v28  ;;  %vm2745_vm15 = vcmp.le.f32.partialorder %v7931_v39, %v2667_v28  ;;  %2884 = vmin.xlane.f32.xlu0 %v2883_v12 }
 0x716   : > { %v2808_v51 = vsel %vm2744_vm14, 1e+30, %v7915_v45  ;;  %v2809_v8 = vsel %vm2745_vm15, 1e+30, %v7931_v39  ;;  %v2886_v63 = vmin.f32 %v2806_v55, %v2807_v40 }
 0x717   : > { %v2670_v56 = vpop.xlane.xlu1 %2669  ;;  %v2889_v62 = vmin.f32 %v2808_v51, %v2809_v8 }
 0x718   : > { %vm2746_vm0 = vcmp.le.f32.partialorder %v7932_v31, %v2670_v56  ;;  %vm2747_vm1 = vcmp.le.f32.partialorder %v7946_v4, %v2670_v56  ;;  %v2673_v2 = vpop.xlane.xlu0 %2672  ;;  %2887 = vmin.xlane.f32.xlu1 %v2886_v63 }
 0x719   : > { %v2810_v49 = vsel %vm2746_vm0, 1e+30, %v7932_v31  ;;  %v2811_v59 = vsel %vm2747_vm1, 1e+30, %v7946_v4  ;;  %vm2748_vm2 = vcmp.le.f32.partialorder %v5445_v35, %v2673_v2  ;;  %vm2749_vm3 = vcmp.le.f32.partialorder %v7919_v0, %v2673_v2  ;;  %2890 = vmin.xlane.f32.xlu0 %v2889_v62 }
 0x71a   : > { %v2812_v12 = vsel %vm2748_vm2, 1e+30, %v5445_v35  ;;  %v2813_v55 = vsel %vm2749_vm3, 1e+30, %v7919_v0  ;;  %v2892_v40 = vmin.f32 %v2810_v49, %v2811_v59 }
 0x71b   : > { %v2676_v28 = vpop.xlane.xlu1 %2675  ;;  %v2895_v51 = vmin.f32 %v2812_v12, %v2813_v55 }
 0x71c   : > { %vm2750_vm4 = vcmp.le.f32.partialorder %v7920_v1, %v2676_v28  ;;  %vm2751_vm5 = vcmp.le.f32.partialorder %v7934_v27, %v2676_v28  ;;  %v2679_v8 = vpop.xlane.xlu0 %2678  ;;  %2893 = vmin.xlane.f32.xlu1 %v2892_v40 }
 0x71d   : > { %v2814_v63 = vsel %vm2750_vm4, 1e+30, %v7920_v1  ;;  %v2815_v56 = vsel %vm2751_vm5, 1e+30, %v7934_v27  ;;  %vm2752_vm6 = vcmp.le.f32.partialorder %v7906_v14, %v2679_v8  ;;  %vm2753_vm7 = vcmp.le.f32.partialorder %v7907_v19, %v2679_v8  ;;  %2896 = vmin.xlane.f32.xlu0 %v2895_v51 }
 0x71e   : > { %v2816_v62 = vsel %vm2752_vm6, 1e+30, %v7906_v14  ;;  %v2817_v59 = vsel %vm2753_vm7, 1e+30, %v7907_v19  ;;  %v2898_v49 = vmin.f32 %v2814_v63, %v2815_v56 }
 0x71f   : > { %v2682_v2 = vpop.xlane.xlu1 %2681  ;;  %v2901_v12 = vmin.f32 %v2816_v62, %v2817_v59 }
 0x720   : > { %vm2754_vm10 = vcmp.le.f32.partialorder %v7908_v50, %v2682_v2  ;;  %vm2755_vm11 = vcmp.le.f32.partialorder %v7922_v48, %v2682_v2  ;;  %v2685_v55 = vpop.xlane.xlu0 %2684  ;;  %2899 = vmin.xlane.f32.xlu1 %v2898_v49 }
 0x721   : > { %v2818_v40 = vsel %vm2754_vm10, 1e+30, %v7908_v50  ;;  %v2819_v28 = vsel %vm2755_vm11, 1e+30, %v7922_v48  ;;  %vm2756_vm12 = vcmp.le.f32.partialorder %v7893_v41, %v2685_v55  ;;  %vm2757_vm13 = vcmp.le.f32.partialorder %v7894_v13, %v2685_v55  ;;  %2902 = vmin.xlane.f32.xlu0 %v2901_v12 }
 0x722   : > { %v2820_v51 = vsel %vm2756_vm12, 1e+30, %v7893_v41  ;;  %v2821_v8 = vsel %vm2757_vm13, 1e+30, %v7894_v13  ;;  %v2904_v63 = vmin.f32 %v2818_v40, %v2819_v28 }
 0x723   : > { %v2688_v56 = vpop.xlane.xlu1 %2687  ;;  %v2907_v62 = vmin.f32 %v2820_v51, %v2821_v8 }
 0x724   : > { %vm2758_vm14 = vcmp.le.f32.partialorder %v7895_v11, %v2688_v56  ;;  %vm2759_vm15 = vcmp.le.f32.partialorder %v7910_v58, %v2688_v56  ;;  %v2691_v59 = vpop.xlane.xlu0 %2690  ;;  %2905 = vmin.xlane.f32.xlu1 %v2904_v63 }
 0x725   : > { %v2822_v49 = vsel %vm2758_vm14, 1e+30, %v7895_v11  ;;  %v2823_v2 = vsel %vm2759_vm15, 1e+30, %v7910_v58  ;;  %vm2760_vm0 = vcmp.le.f32.partialorder %v7897_v21, %v2691_v59  ;;  %vm2761_vm1 = vcmp.le.f32.partialorder %v7898_v25, %v2691_v59  ;;  %2908 = vmin.xlane.f32.xlu0 %v2907_v62 }
 0x726   : > { %v2824_v12 = vsel %vm2760_vm0, 1e+30, %v7897_v21  ;;  %v2825_v55 = vsel %vm2761_vm1, 1e+30, %v7898_v25  ;;  %v2910_v40 = vmin.f32 %v2822_v49, %v2823_v2 }
 0x727   : > { %v2694_v28 = vpop.xlane.xlu1 %2693  ;;  %v2913_v51 = vmin.f32 %v2824_v12, %v2825_v55 }
 0x728   : > { %vm2762_vm2 = vcmp.le.f32.partialorder %v7879_v42, %v2694_v28  ;;  %vm2763_vm3 = vcmp.le.f32.partialorder %v7880_v57, %v2694_v28  ;;  %v2697_v8 = vpop.xlane.xlu0 %2696  ;;  %2911 = vmin.xlane.f32.xlu1 %v2910_v40 }
 0x729   : > { %v2826_v63 = vsel %vm2762_vm2, 1e+30, %v7879_v42  ;;  %v2827_v56 = vsel %vm2763_vm3, 1e+30, %v7880_v57  ;;  %vm2764_vm4 = vcmp.le.f32.partialorder %v7881_v24, %v2697_v8  ;;  %vm2765_vm5 = vcmp.le.f32.partialorder %v7882_v20, %v2697_v8  ;;  %2914 = vmin.xlane.f32.xlu0 %v2913_v51 }
 0x72a   : > { %v2828_v62 = vsel %vm2764_vm4, 1e+30, %v7881_v24  ;;  %v2829_v59 = vsel %vm2765_vm5, 1e+30, %v7882_v20  ;;  %v2916_v49 = vmin.f32 %v2826_v63, %v2827_v56 }
 0x72b   : > { %v2700_v2 = vpop.xlane.xlu1 %2699  ;;  %v2919_v12 = vmin.f32 %v2828_v62, %v2829_v59 }
 0x72c   : > { %vm2766_vm6 = vcmp.le.f32.partialorder %v7883_v26, %v2700_v2  ;;  %vm2767_vm7 = vcmp.le.f32.partialorder %v7884_v9, %v2700_v2  ;;  %v2703_v55 = vpop.xlane.xlu0 %2702  ;;  %2917 = vmin.xlane.f32.xlu1 %v2916_v49 }
 0x72d   : > { %v2830_v40 = vsel %vm2766_vm6, 1e+30, %v7883_v26  ;;  %v2831_v28 = vsel %vm2767_vm7, 1e+30, %v7884_v9  ;;  %vm2768_vm10 = vcmp.le.f32.partialorder %v5559_v16, %v2703_v55  ;;  %vm2769_vm11 = vcmp.le.f32.partialorder %v5562_v43, %v2703_v55  ;;  %2920 = vmin.xlane.f32.xlu0 %v2919_v12 }
 0x72e   : > { %v2832_v51 = vsel %vm2768_vm10, 1e+30, %v5559_v16  ;;  %v2833_v8 = vsel %vm2769_vm11, 1e+30, %v5562_v43  ;;  %v2922_v63 = vmin.f32 %v2830_v40, %v2831_v28 }
 0x72f   : > { %v2706_v56 = vpop.xlane.xlu1 %2705  ;;  %v2925_v62 = vmin.f32 %v2832_v51, %v2833_v8 }
 0x730   : > { %vm2770_vm12 = vcmp.le.f32.partialorder %v5567_v32, %v2706_v56  ;;  %vm2771_vm13 = vcmp.le.f32.partialorder %v5570_v3, %v2706_v56  ;;  %2923 = vmin.xlane.f32.xlu1 %v2922_v63 }
 0x731   : > { %v2834_v59 = vsel %vm2770_vm12, 1e+30, %v5567_v32  ;;  %v2835_v49 = vsel %vm2771_vm13, 1e+30, %v5570_v3  ;;  %2926 = vmin.xlane.f32.xlu0 %v2925_v62 }
 0x732   : > { %v2928_v2 = vmin.f32 %v2834_v59, %v2835_v49 }
 0x733   : > { %v2709_v55 = vpop.xlane.xlu0 %2708 }
 0x734   : > { %vm2772_vm14 = vcmp.le.f32.partialorder %v5575_v44, %v2709_v55  ;;  %vm2773_vm15 = vcmp.le.f32.partialorder %v5578_v33, %v2709_v55  ;;  %2929 = vmin.xlane.f32.xlu1 %v2928_v2 }
 0x735   : > { %v2836_v12 = vsel %vm2772_vm14, 1e+30, %v5575_v44  ;;  %v2837_v40 = vsel %vm2773_vm15, 1e+30, %v5578_v33 }
 0x736   : > { %v2931_v28 = vmin.f32 %v2836_v12, %v2837_v40 }
 0x738   : > { %2932 = vmin.xlane.f32.xlu0 %v2931_v28 }
 0x749   : > { %v2840_v51 = vpop.xlane.xlu1 %2839 }
 0x74a   : > { %vm2934_vm0 = vcmp.le.f32.partialorder %v5327_v15, %v2840_v51  ;;  %vm2935_vm1 = vcmp.le.f32.partialorder %v5330_v17, %v2840_v51 }
 0x74b   : > { %v2998_v8 = vsel %vm2934_vm0, 1e+30, %v5327_v15  ;;  %v2999_v63 = vsel %vm2935_vm1, 1e+30, %v5330_v17 }
 0x74c   : > { %v3062_v56 = vmin.f32 %v2998_v8, %v2999_v63 }
 0x74d   : > { %v2843_v62 = vpop.xlane.xlu0 %2842 }
 0x74e   : > { %vm2936_vm2 = vcmp.le.f32.partialorder %v5335_v22, %v2843_v62  ;;  %vm2937_vm3 = vcmp.le.f32.partialorder %v5338_v23, %v2843_v62  ;;  %3063 = vmin.xlane.f32.xlu1 %v3062_v56 }
 0x74f   : > { %v3000_v59 = vsel %vm2936_vm2, 1e+30, %v5335_v22  ;;  %v3001_v49 = vsel %vm2937_vm3, 1e+30, %v5338_v23 }
 0x750   : > { %v3065_v2 = vmin.f32 %v3000_v59, %v3001_v49 }
 0x751   : > { %v2846_v55 = vpop.xlane.xlu1 %2845 }
 0x752   : > { %vm2938_vm4 = vcmp.le.f32.partialorder %v5343_v29, %v2846_v55  ;;  %vm2939_vm5 = vcmp.le.f32.partialorder %v5346_v30, %v2846_v55  ;;  %3066 = vmin.xlane.f32.xlu0 %v3065_v2 }
 0x753   : > { %v3002_v12 = vsel %vm2938_vm4, 1e+30, %v5343_v29  ;;  %v3003_v40 = vsel %vm2939_vm5, 1e+30, %v5346_v30 }
 0x754   : > { %v3068_v28 = vmin.f32 %v3002_v12, %v3003_v40 }
 0x755   : > { %v2849_v51 = vpop.xlane.xlu0 %2848 }
 0x756   : > { %vm2940_vm6 = vcmp.le.f32.partialorder %v5351_v36, %v2849_v51  ;;  %vm2941_vm7 = vcmp.le.f32.partialorder %v5354_v38, %v2849_v51  ;;  %3069 = vmin.xlane.f32.xlu1 %v3068_v28 }
 0x757   : > { %v3004_v8 = vsel %vm2940_vm6, 1e+30, %v5351_v36  ;;  %v3005_v63 = vsel %vm2941_vm7, 1e+30, %v5354_v38 }
 0x758   : > { %v3071_v56 = vmin.f32 %v3004_v8, %v3005_v63 }
 0x759   : > { %v2852_v62 = vpop.xlane.xlu1 %2851 }
 0x75a   : > { %vm2942_vm10 = vcmp.le.f32.partialorder %v5359_v46, %v2852_v62  ;;  %vm2943_vm11 = vcmp.le.f32.partialorder %v5362_v47, %v2852_v62  ;;  %3072 = vmin.xlane.f32.xlu0 %v3071_v56 }
 0x75b   : > { %v3006_v59 = vsel %vm2942_vm10, 1e+30, %v5359_v46  ;;  %v3007_v49 = vsel %vm2943_vm11, 1e+30, %v5362_v47 }
 0x75c   : > { %v3074_v2 = vmin.f32 %v3006_v59, %v3007_v49 }
 0x75d   : > { %v2855_v55 = vpop.xlane.xlu0 %2854 }
 0x75e   : > { %vm2944_vm12 = vcmp.le.f32.partialorder %v5367_v53, %v2855_v55  ;;  %vm2945_vm13 = vcmp.le.f32.partialorder %v5370_v54, %v2855_v55  ;;  %3075 = vmin.xlane.f32.xlu1 %v3074_v2 }
 0x75f   : > { %v3008_v12 = vsel %vm2944_vm12, 1e+30, %v5367_v53  ;;  %v3009_v40 = vsel %vm2945_vm13, 1e+30, %v5370_v54 }
 0x760   : > { %v3077_v28 = vmin.f32 %v3008_v12, %v3009_v40 }
 0x761   : > { %v2858_v51 = vpop.xlane.xlu1 %2857 }
 0x762   : > { %vm2946_vm14 = vcmp.le.f32.partialorder %v5375_v60, %v2858_v51  ;;  %vm2947_vm15 = vcmp.le.f32.partialorder %v5378_v61, %v2858_v51  ;;  %3078 = vmin.xlane.f32.xlu0 %v3077_v28 }
 0x763   : > { %v3010_v8 = vsel %vm2946_vm14, 1e+30, %v5375_v60  ;;  %v3011_v63 = vsel %vm2947_vm15, 1e+30, %v5378_v61 }
 0x764   : > { %v3080_v56 = vmin.f32 %v3010_v8, %v3011_v63  ;;  %v7947_v8 = vld [vmem:[#allocation16_spill] sm:$0xff] }
 0x765   : > { %v2861_v62 = vpop.xlane.xlu0 %2860 }
 0x766   : > { %vm2948_vm0 = vcmp.le.f32.partialorder %v5383_v5, %v2861_v62  ;;  %vm2949_vm1 = vcmp.le.f32.partialorder %v5386_v6, %v2861_v62  ;;  %3081 = vmin.xlane.f32.xlu1 %v3080_v56 }
 0x767   : > { %v3012_v59 = vsel %vm2948_vm0, 1e+30, %v5383_v5  ;;  %v3013_v49 = vsel %vm2949_vm1, 1e+30, %v5386_v6 }
 0x768   : > { %v3083_v2 = vmin.f32 %v3012_v59, %v3013_v49  ;;  %v7948_v49 = vld [vmem:[#allocation19_spill] sm:$0xff] }
 0x769   : > { %v2864_v55 = vpop.xlane.xlu1 %2863 }
 0x76a   : > { %vm2950_vm2 = vcmp.le.f32.partialorder %v5391_v18, %v2864_v55  ;;  %vm2951_vm3 = vcmp.le.f32.partialorder %v7885_v52, %v2864_v55  ;;  %3084 = vmin.xlane.f32.xlu0 %v3083_v2  ;;  %v7949_v2 = vld [vmem:[#allocation20_spill] sm:$0xff] }
 0x76b   : > { %v3014_v12 = vsel %vm2950_vm2, 1e+30, %v5391_v18  ;;  %v3015_v40 = vsel %vm2951_vm3, 1e+30, %v7885_v52  ;;  %v7950_v18 = vld [vmem:[#allocation23_spill] sm:$0xff] }
 0x76c   : > { %v3086_v28 = vmin.f32 %v3014_v12, %v3015_v40 }
 0x76d   : > { %v2867_v51 = vpop.xlane.xlu0 %2866 }
 0x76e   : > { %vm2952_vm4 = vcmp.le.f32.partialorder %v7886_v37, %v2867_v51  ;;  %vm2953_vm5 = vcmp.le.f32.partialorder %v7947_v8, %v2867_v51  ;;  %3087 = vmin.xlane.f32.xlu1 %v3086_v28  ;;  %v7951_v28 = vld [vmem:[#allocation24_spill] sm:$0xff] }
 0x76f   : > { %v3016_v63 = vsel %vm2952_vm4, 1e+30, %v7886_v37  ;;  %v3017_v56 = vsel %vm2953_vm5, 1e+30, %v7947_v8  ;;  %v7952_v8 = vld [vmem:[#allocation27_spill] sm:$0xff] }
 0x770   : > { %v3089_v62 = vmin.f32 %v3016_v63, %v3017_v56 }
 0x772   : > { %3090 = vmin.xlane.f32.xlu0 %v3089_v62 }
 0x78d   : > { %v2873_v59 = vpop.xlane.xlu0 %2872 }
 0x78e   : > { %vm2956_vm6 = vcmp.le.f32.partialorder %v7948_v49, %v2873_v59  ;;  %vm2957_vm7 = vcmp.le.f32.partialorder %v7949_v2, %v2873_v59  ;;  %v7953_v59 = vld [vmem:[#allocation28_spill] sm:$0xff] }
 0x78f   : > { %v3020_v55 = vsel %vm2956_vm6, 1e+30, %v7948_v49  ;;  %v3021_v12 = vsel %vm2957_vm7, 1e+30, %v7949_v2 }
 0x790   : > { %v3095_v40 = vmin.f32 %v3020_v55, %v3021_v12 }
 0x791   : > { %v2870_v52 = vpop.xlane.xlu1 %2869 }
 0x792   : > { %vm2954_vm10 = vcmp.le.f32.partialorder %v7950_v18, %v2870_v52  ;;  %vm2955_vm11 = vcmp.le.f32.partialorder %v7951_v28, %v2870_v52  ;;  %3096 = vmin.xlane.f32.xlu0 %v3095_v40  ;;  %v7954_v52 = vld [vmem:[#allocation30_spill] sm:$0xff] }
 0x793   : > { %v3018_v51 = vsel %vm2954_vm10, 1e+30, %v7950_v18  ;;  %v3019_v63 = vsel %vm2955_vm11, 1e+30, %v7951_v28  ;;  %v7955_v18 = vld [vmem:[#allocation35_spill] sm:$0xff] }
 0x794   : > { %v3092_v56 = vmin.f32 %v3018_v51, %v3019_v63 }
 0x796   : > { %3093 = vmin.xlane.f32.xlu1 %v3092_v56 }
 0x799   : > { %v2876_v62 = vpop.xlane.xlu1 %2875 }
 0x79a   : > { %vm2958_vm12 = vcmp.le.f32.partialorder %v7952_v8, %v2876_v62  ;;  %vm2959_vm13 = vcmp.le.f32.partialorder %v7953_v59, %v2876_v62  ;;  %v2879_v49 = vpop.xlane.xlu0 %2878  ;;  %v7956_v62 = vld [vmem:[#allocation36_spill] sm:$0xff] }
 0x79b   : > { %v3022_v55 = vsel %vm2958_vm12, 1e+30, %v7952_v8  ;;  %v3023_v12 = vsel %vm2959_vm13, 1e+30, %v7953_v59  ;;  %vm2960_vm14 = vcmp.le.f32.partialorder %v5457_v10, %v2879_v49  ;;  %vm2961_vm15 = vcmp.le.f32.partialorder %v7954_v52, %v2879_v49 }
 0x79c   : > { %v3024_v40 = vsel %vm2960_vm14, 1e+30, %v5457_v10  ;;  %v3025_v28 = vsel %vm2961_vm15, 1e+30, %v7954_v52  ;;  %v3098_v51 = vmin.f32 %v3022_v55, %v3023_v12 }
 0x79d   : > { %v3101_v63 = vmin.f32 %v3024_v40, %v3025_v28 }
 0x79e   : > { %3099 = vmin.xlane.f32.xlu1 %v3098_v51  ;;  %v7957_v51 = vld [vmem:[#allocation17_spill] sm:$0xff] }
 0x79f   : > { %3102 = vmin.xlane.f32.xlu0 %v3101_v63  ;;  %v7958_v63 = vld [vmem:[#allocation18_spill] sm:$0xff] }
 0x7a1   : > { %v2882_v56 = vpop.xlane.xlu1 %2881 }
 0x7a2   : > { %vm2962_vm0 = vcmp.le.f32.partialorder %v7955_v18, %v2882_v56  ;;  %vm2963_vm1 = vcmp.le.f32.partialorder %v7956_v62, %v2882_v56  ;;  %v2885_v8 = vpop.xlane.xlu0 %2884 }
 0x7a3   : > { %v3026_v59 = vsel %vm2962_vm0, 1e+30, %v7955_v18  ;;  %v3027_v2 = vsel %vm2963_vm1, 1e+30, %v7956_v62  ;;  %vm2964_vm2 = vcmp.le.f32.partialorder %v7942_v34, %v2885_v8  ;;  %vm2965_vm3 = vcmp.le.f32.partialorder %v7943_v7, %v2885_v8 }
 0x7a4   : > { %v3028_v49 = vsel %vm2964_vm2, 1e+30, %v7942_v34  ;;  %v3029_v28 = vsel %vm2965_vm3, 1e+30, %v7943_v7  ;;  %v3104_v55 = vmin.f32 %v3026_v59, %v3027_v2 }
 0x7a5   : > { %v2888_v12 = vpop.xlane.xlu1 %2887  ;;  %v3107_v40 = vmin.f32 %v3028_v49, %v3029_v28 }
 0x7a6   : > { %vm2966_vm4 = vcmp.le.f32.partialorder %v7957_v51, %v2888_v12  ;;  %vm2967_vm5 = vcmp.le.f32.partialorder %v7958_v63, %v2888_v12  ;;  %v2891_v56 = vpop.xlane.xlu0 %2890  ;;  %3105 = vmin.xlane.f32.xlu1 %v3104_v55 }
 0x7a7   : > { %v3030_v18 = vsel %vm2966_vm4, 1e+30, %v7957_v51  ;;  %v3031_v62 = vsel %vm2967_vm5, 1e+30, %v7958_v63  ;;  %vm2968_vm6 = vcmp.le.f32.partialorder %v7915_v45, %v2891_v56  ;;  %vm2969_vm7 = vcmp.le.f32.partialorder %v7931_v39, %v2891_v56  ;;  %3108 = vmin.xlane.f32.xlu0 %v3107_v40 }
 0x7a8   : > { %v3032_v8 = vsel %vm2968_vm6, 1e+30, %v7915_v45  ;;  %v3033_v2 = vsel %vm2969_vm7, 1e+30, %v7931_v39  ;;  %v3110_v59 = vmin.f32 %v3030_v18, %v3031_v62 }
 0x7a9   : > { %v2894_v49 = vpop.xlane.xlu1 %2893  ;;  %v3113_v28 = vmin.f32 %v3032_v8, %v3033_v2 }
 0x7aa   : > { %vm2970_vm10 = vcmp.le.f32.partialorder %v7932_v31, %v2894_v49  ;;  %vm2971_vm11 = vcmp.le.f32.partialorder %v7946_v4, %v2894_v49  ;;  %v2897_v55 = vpop.xlane.xlu0 %2896  ;;  %3111 = vmin.xlane.f32.xlu1 %v3110_v59 }
 0x7ab   : > { %v3034_v12 = vsel %vm2970_vm10, 1e+30, %v7932_v31  ;;  %v3035_v63 = vsel %vm2971_vm11, 1e+30, %v7946_v4  ;;  %vm2972_vm12 = vcmp.le.f32.partialorder %v5445_v35, %v2897_v55  ;;  %vm2973_vm13 = vcmp.le.f32.partialorder %v7919_v0, %v2897_v55  ;;  %3114 = vmin.xlane.f32.xlu0 %v3113_v28 }
 0x7ac   : > { %v3036_v40 = vsel %vm2972_vm12, 1e+30, %v5445_v35  ;;  %v3037_v18 = vsel %vm2973_vm13, 1e+30, %v7919_v0  ;;  %v3116_v62 = vmin.f32 %v3034_v12, %v3035_v63 }
 0x7ad   : > { %v2900_v56 = vpop.xlane.xlu1 %2899  ;;  %v3119_v8 = vmin.f32 %v3036_v40, %v3037_v18 }
 0x7ae   : > { %vm2974_vm14 = vcmp.le.f32.partialorder %v7920_v1, %v2900_v56  ;;  %vm2975_vm15 = vcmp.le.f32.partialorder %v7934_v27, %v2900_v56  ;;  %v2903_v2 = vpop.xlane.xlu0 %2902  ;;  %3117 = vmin.xlane.f32.xlu1 %v3116_v62 }
 0x7af   : > { %v3038_v59 = vsel %vm2974_vm14, 1e+30, %v7920_v1  ;;  %v3039_v49 = vsel %vm2975_vm15, 1e+30, %v7934_v27  ;;  %vm2976_vm0 = vcmp.le.f32.partialorder %v7906_v14, %v2903_v2  ;;  %vm2977_vm1 = vcmp.le.f32.partialorder %v7907_v19, %v2903_v2  ;;  %3120 = vmin.xlane.f32.xlu0 %v3119_v8 }
 0x7b0   : > { %v3040_v28 = vsel %vm2976_vm0, 1e+30, %v7906_v14  ;;  %v3041_v63 = vsel %vm2977_vm1, 1e+30, %v7907_v19  ;;  %v3122_v55 = vmin.f32 %v3038_v59, %v3039_v49 }
 0x7b1   : > { %v2906_v12 = vpop.xlane.xlu1 %2905  ;;  %v3125_v40 = vmin.f32 %v3040_v28, %v3041_v63 }
 0x7b2   : > { %vm2978_vm2 = vcmp.le.f32.partialorder %v7908_v50, %v2906_v12  ;;  %vm2979_vm3 = vcmp.le.f32.partialorder %v7922_v48, %v2906_v12  ;;  %v2909_v18 = vpop.xlane.xlu0 %2908  ;;  %3123 = vmin.xlane.f32.xlu1 %v3122_v55 }
 0x7b3   : > { %v3042_v62 = vsel %vm2978_vm2, 1e+30, %v7908_v50  ;;  %v3043_v56 = vsel %vm2979_vm3, 1e+30, %v7922_v48  ;;  %vm2980_vm4 = vcmp.le.f32.partialorder %v7893_v41, %v2909_v18  ;;  %vm2981_vm5 = vcmp.le.f32.partialorder %v7894_v13, %v2909_v18  ;;  %3126 = vmin.xlane.f32.xlu0 %v3125_v40 }
 0x7b4   : > { %v3044_v8 = vsel %vm2980_vm4, 1e+30, %v7893_v41  ;;  %v3045_v2 = vsel %vm2981_vm5, 1e+30, %v7894_v13  ;;  %v3128_v59 = vmin.f32 %v3042_v62, %v3043_v56 }
 0x7b5   : > { %v2912_v49 = vpop.xlane.xlu1 %2911  ;;  %v3131_v28 = vmin.f32 %v3044_v8, %v3045_v2 }
 0x7b6   : > { %vm2982_vm6 = vcmp.le.f32.partialorder %v7895_v11, %v2912_v49  ;;  %vm2983_vm7 = vcmp.le.f32.partialorder %v7910_v58, %v2912_v49  ;;  %v2915_v63 = vpop.xlane.xlu0 %2914  ;;  %3129 = vmin.xlane.f32.xlu1 %v3128_v59 }
 0x7b7   : > { %v3046_v55 = vsel %vm2982_vm6, 1e+30, %v7895_v11  ;;  %v3047_v12 = vsel %vm2983_vm7, 1e+30, %v7910_v58  ;;  %vm2984_vm10 = vcmp.le.f32.partialorder %v7897_v21, %v2915_v63  ;;  %vm2985_vm11 = vcmp.le.f32.partialorder %v7898_v25, %v2915_v63  ;;  %3132 = vmin.xlane.f32.xlu0 %v3131_v28 }
 0x7b8   : > { %v3048_v40 = vsel %vm2984_vm10, 1e+30, %v7897_v21  ;;  %v3049_v18 = vsel %vm2985_vm11, 1e+30, %v7898_v25  ;;  %v3134_v62 = vmin.f32 %v3046_v55, %v3047_v12 }
 0x7b9   : > { %v2918_v56 = vpop.xlane.xlu1 %2917  ;;  %v3137_v8 = vmin.f32 %v3048_v40, %v3049_v18 }
 0x7ba   : > { %vm2986_vm12 = vcmp.le.f32.partialorder %v7879_v42, %v2918_v56  ;;  %vm2987_vm13 = vcmp.le.f32.partialorder %v7880_v57, %v2918_v56  ;;  %v2921_v2 = vpop.xlane.xlu0 %2920  ;;  %3135 = vmin.xlane.f32.xlu1 %v3134_v62 }
 0x7bb   : > { %v3050_v59 = vsel %vm2986_vm12, 1e+30, %v7879_v42  ;;  %v3051_v49 = vsel %vm2987_vm13, 1e+30, %v7880_v57  ;;  %vm2988_vm14 = vcmp.le.f32.partialorder %v7881_v24, %v2921_v2  ;;  %vm2989_vm15 = vcmp.le.f32.partialorder %v7882_v20, %v2921_v2  ;;  %3138 = vmin.xlane.f32.xlu0 %v3137_v8 }
 0x7bc   : > { %v3052_v28 = vsel %vm2988_vm14, 1e+30, %v7881_v24  ;;  %v3053_v63 = vsel %vm2989_vm15, 1e+30, %v7882_v20  ;;  %v3140_v55 = vmin.f32 %v3050_v59, %v3051_v49 }
 0x7bd   : > { %v2924_v12 = vpop.xlane.xlu1 %2923  ;;  %v3143_v40 = vmin.f32 %v3052_v28, %v3053_v63 }
 0x7be   : > { %vm2990_vm0 = vcmp.le.f32.partialorder %v7883_v26, %v2924_v12  ;;  %vm2991_vm1 = vcmp.le.f32.partialorder %v7884_v9, %v2924_v12  ;;  %v2927_v18 = vpop.xlane.xlu0 %2926  ;;  %3141 = vmin.xlane.f32.xlu1 %v3140_v55 }
 0x7bf   : > { %v3054_v62 = vsel %vm2990_vm0, 1e+30, %v7883_v26  ;;  %v3055_v56 = vsel %vm2991_vm1, 1e+30, %v7884_v9  ;;  %vm2992_vm2 = vcmp.le.f32.partialorder %v5559_v16, %v2927_v18  ;;  %vm2993_vm3 = vcmp.le.f32.partialorder %v5562_v43, %v2927_v18  ;;  %3144 = vmin.xlane.f32.xlu0 %v3143_v40 }
 0x7c0   : > { %v3056_v8 = vsel %vm2992_vm2, 1e+30, %v5559_v16  ;;  %v3057_v2 = vsel %vm2993_vm3, 1e+30, %v5562_v43  ;;  %v3146_v59 = vmin.f32 %v3054_v62, %v3055_v56 }
 0x7c1   : > { %v2930_v49 = vpop.xlane.xlu1 %2929  ;;  %v3149_v28 = vmin.f32 %v3056_v8, %v3057_v2 }
 0x7c2   : > { %vm2994_vm4 = vcmp.le.f32.partialorder %v5567_v32, %v2930_v49  ;;  %vm2995_vm5 = vcmp.le.f32.partialorder %v5570_v3, %v2930_v49  ;;  %3147 = vmin.xlane.f32.xlu1 %v3146_v59 }
 0x7c3   : > { %v3058_v63 = vsel %vm2994_vm4, 1e+30, %v5567_v32  ;;  %v3059_v55 = vsel %vm2995_vm5, 1e+30, %v5570_v3  ;;  %3150 = vmin.xlane.f32.xlu0 %v3149_v28 }
 0x7c4   : > { %v3152_v12 = vmin.f32 %v3058_v63, %v3059_v55 }
 0x7c5   : > { %v2933_v18 = vpop.xlane.xlu0 %2932 }
 0x7c6   : > { %vm2996_vm6 = vcmp.le.f32.partialorder %v5575_v44, %v2933_v18  ;;  %vm2997_vm7 = vcmp.le.f32.partialorder %v5578_v33, %v2933_v18  ;;  %3153 = vmin.xlane.f32.xlu1 %v3152_v12 }
 0x7c7   : > { %v3060_v40 = vsel %vm2996_vm6, 1e+30, %v5575_v44  ;;  %v3061_v62 = vsel %vm2997_vm7, 1e+30, %v5578_v33 }
 0x7c8   : > { %v3155_v56 = vmin.f32 %v3060_v40, %v3061_v62 }
 0x7ca   : > { %3156 = vmin.xlane.f32.xlu0 %v3155_v56 }
 0x7db   : > { %v3064_v8 = vpop.xlane.xlu1 %3063 }
 0x7dc   : > { %vm3158_vm10 = vcmp.le.f32.partialorder %v5327_v15, %v3064_v8  ;;  %vm3159_vm11 = vcmp.le.f32.partialorder %v5330_v17, %v3064_v8 }
 0x7dd   : > { %v3222_v2 = vsel %vm3158_vm10, 1e+30, %v5327_v15  ;;  %v3223_v59 = vsel %vm3159_vm11, 1e+30, %v5330_v17 }
 0x7de   : > { %v3286_v49 = vmin.f32 %v3222_v2, %v3223_v59 }
 0x7df   : > { %v3067_v28 = vpop.xlane.xlu0 %3066 }
 0x7e0   : > { %vm3160_vm12 = vcmp.le.f32.partialorder %v5335_v22, %v3067_v28  ;;  %vm3161_vm13 = vcmp.le.f32.partialorder %v5338_v23, %v3067_v28  ;;  %3287 = vmin.xlane.f32.xlu1 %v3286_v49 }
 0x7e1   : > { %v3224_v63 = vsel %vm3160_vm12, 1e+30, %v5335_v22  ;;  %v3225_v55 = vsel %vm3161_vm13, 1e+30, %v5338_v23 }
 0x7e2   : > { %v3289_v12 = vmin.f32 %v3224_v63, %v3225_v55 }
 0x7e3   : > { %v3070_v18 = vpop.xlane.xlu1 %3069 }
 0x7e4   : > { %vm3162_vm14 = vcmp.le.f32.partialorder %v5343_v29, %v3070_v18  ;;  %vm3163_vm15 = vcmp.le.f32.partialorder %v5346_v30, %v3070_v18  ;;  %3290 = vmin.xlane.f32.xlu0 %v3289_v12 }
 0x7e5   : > { %v3226_v40 = vsel %vm3162_vm14, 1e+30, %v5343_v29  ;;  %v3227_v62 = vsel %vm3163_vm15, 1e+30, %v5346_v30 }
 0x7e6   : > { %v3292_v56 = vmin.f32 %v3226_v40, %v3227_v62 }
 0x7e7   : > { %v3073_v8 = vpop.xlane.xlu0 %3072 }
 0x7e8   : > { %vm3164_vm0 = vcmp.le.f32.partialorder %v5351_v36, %v3073_v8  ;;  %vm3165_vm1 = vcmp.le.f32.partialorder %v5354_v38, %v3073_v8  ;;  %3293 = vmin.xlane.f32.xlu1 %v3292_v56 }
 0x7e9   : > { %v3228_v2 = vsel %vm3164_vm0, 1e+30, %v5351_v36  ;;  %v3229_v59 = vsel %vm3165_vm1, 1e+30, %v5354_v38 }
 0x7ea   : > { %v3295_v49 = vmin.f32 %v3228_v2, %v3229_v59 }
 0x7eb   : > { %v3076_v28 = vpop.xlane.xlu1 %3075 }
 0x7ec   : > { %vm3166_vm2 = vcmp.le.f32.partialorder %v5359_v46, %v3076_v28  ;;  %vm3167_vm3 = vcmp.le.f32.partialorder %v5362_v47, %v3076_v28  ;;  %3296 = vmin.xlane.f32.xlu0 %v3295_v49 }
 0x7ed   : > { %v3230_v63 = vsel %vm3166_vm2, 1e+30, %v5359_v46  ;;  %v3231_v55 = vsel %vm3167_vm3, 1e+30, %v5362_v47 }
 0x7ee   : > { %v3298_v12 = vmin.f32 %v3230_v63, %v3231_v55 }
 0x7ef   : > { %v3079_v18 = vpop.xlane.xlu0 %3078 }
 0x7f0   : > { %vm3168_vm4 = vcmp.le.f32.partialorder %v5367_v53, %v3079_v18  ;;  %vm3169_vm5 = vcmp.le.f32.partialorder %v5370_v54, %v3079_v18  ;;  %3299 = vmin.xlane.f32.xlu1 %v3298_v12 }
 0x7f1   : > { %v3232_v40 = vsel %vm3168_vm4, 1e+30, %v5367_v53  ;;  %v3233_v62 = vsel %vm3169_vm5, 1e+30, %v5370_v54 }
 0x7f2   : > { %v3301_v56 = vmin.f32 %v3232_v40, %v3233_v62  ;;  %v7959_v40 = vld [vmem:[#allocation13_spill] sm:$0xff]  ;;  %v7960_v62 = vld [vmem:[#allocation14_spill] sm:$0xff] }
 0x7f3   : > { %v3082_v8 = vpop.xlane.xlu1 %3081 }
 0x7f4   : > { %vm3170_vm6 = vcmp.le.f32.partialorder %v5375_v60, %v3082_v8  ;;  %vm3171_vm7 = vcmp.le.f32.partialorder %v5378_v61, %v3082_v8  ;;  %3302 = vmin.xlane.f32.xlu0 %v3301_v56 }
 0x7f5   : > { %v3234_v2 = vsel %vm3170_vm6, 1e+30, %v5375_v60  ;;  %v3235_v59 = vsel %vm3171_vm7, 1e+30, %v5378_v61 }
 0x7f6   : > { %v3304_v49 = vmin.f32 %v3234_v2, %v3235_v59 }
 0x7f7   : > { %v3085_v28 = vpop.xlane.xlu0 %3084 }
 0x7f8   : > { %vm3172_vm10 = vcmp.le.f32.partialorder %v5383_v5, %v3085_v28  ;;  %vm3173_vm11 = vcmp.le.f32.partialorder %v5386_v6, %v3085_v28  ;;  %3305 = vmin.xlane.f32.xlu1 %v3304_v49  ;;  %v7961_v49 = vld [vmem:[#allocation16_spill] sm:$0xff] }
 0x7f9   : > { %v3236_v63 = vsel %vm3172_vm10, 1e+30, %v5383_v5  ;;  %v3237_v55 = vsel %vm3173_vm11, 1e+30, %v5386_v6  ;;  %v7964_v5 = vld [vmem:[#allocation23_spill] sm:$0xff] }
 0x7fa   : > { %v3307_v12 = vmin.f32 %v3236_v63, %v3237_v55 }
 0x7fb   : > { %v3088_v18 = vpop.xlane.xlu1 %3087 }
 0x7fc   : > { %vm3174_vm12 = vcmp.le.f32.partialorder %v7959_v40, %v3088_v18  ;;  %vm3175_vm13 = vcmp.le.f32.partialorder %v7960_v62, %v3088_v18  ;;  %3308 = vmin.xlane.f32.xlu0 %v3307_v12  ;;  %v7962_v18 = vld [vmem:[#allocation19_spill] sm:$0xff]  ;;  %v7963_v12 = vld [vmem:[#allocation20_spill] sm:$0xff] }
 0x7fd   : > { %v3238_v56 = vsel %vm3174_vm12, 1e+30, %v7959_v40  ;;  %v3239_v8 = vsel %vm3175_vm13, 1e+30, %v7960_v62 }
 0x7fe   : > { %v3310_v2 = vmin.f32 %v3238_v56, %v3239_v8 }
 0x7ff   : > { %v3091_v59 = vpop.xlane.xlu0 %3090 }
 0x800   : > { %vm3176_vm14 = vcmp.le.f32.partialorder %v7886_v37, %v3091_v59  ;;  %vm3177_vm15 = vcmp.le.f32.partialorder %v7961_v49, %v3091_v59  ;;  %3311 = vmin.xlane.f32.xlu1 %v3310_v2  ;;  %v7965_v2 = vld [vmem:[#allocation24_spill] sm:$0xff] }
 0x801   : > { %v3240_v28 = vsel %vm3176_vm14, 1e+30, %v7886_v37  ;;  %v3241_v63 = vsel %vm3177_vm15, 1e+30, %v7961_v49  ;;  %v7966_v49 = vld [vmem:[#allocation27_spill] sm:$0xff] }
 0x802   : > { %v3313_v55 = vmin.f32 %v3240_v28, %v3241_v63 }
 0x804   : > { %3314 = vmin.xlane.f32.xlu0 %v3313_v55 }
 0x81f   : > { %v3097_v6 = vpop.xlane.xlu0 %3096 }
 0x820   : > { %vm3180_vm0 = vcmp.le.f32.partialorder %v7962_v18, %v3097_v6  ;;  %vm3181_vm1 = vcmp.le.f32.partialorder %v7963_v12, %v3097_v6  ;;  %v7967_v6 = vld [vmem:[#allocation28_spill] sm:$0xff] }
 0x821   : > { %v3244_v62 = vsel %vm3180_vm0, 1e+30, %v7962_v18  ;;  %v3245_v56 = vsel %vm3181_vm1, 1e+30, %v7963_v12 }
 0x822   : > { %v3319_v8 = vmin.f32 %v3244_v62, %v3245_v56 }
 0x823   : > { %v3094_v40 = vpop.xlane.xlu1 %3093 }
 0x824   : > { %vm3178_vm2 = vcmp.le.f32.partialorder %v7964_v5, %v3094_v40  ;;  %vm3179_vm3 = vcmp.le.f32.partialorder %v7965_v2, %v3094_v40  ;;  %3320 = vmin.xlane.f32.xlu0 %v3319_v8 }
 0x825   : > { %v3242_v59 = vsel %vm3178_vm2, 1e+30, %v7964_v5  ;;  %v3243_v28 = vsel %vm3179_vm3, 1e+30, %v7965_v2  ;;  %v7968_v2 = vld [vmem:[#allocation35_spill] sm:$0xff] }
 0x826   : > { %v3316_v63 = vmin.f32 %v3242_v59, %v3243_v28 }
 0x828   : > { %3317 = vmin.xlane.f32.xlu1 %v3316_v63 }
 0x82b   : > { %v3100_v55 = vpop.xlane.xlu1 %3099 }
 0x82c   : > { %vm3182_vm4 = vcmp.le.f32.partialorder %v7966_v49, %v3100_v55  ;;  %vm3183_vm5 = vcmp.le.f32.partialorder %v7967_v6, %v3100_v55  ;;  %v3103_v18 = vpop.xlane.xlu0 %3102  ;;  %v7969_v55 = vld [vmem:[#allocation36_spill] sm:$0xff] }
 0x82d   : > { %v3246_v62 = vsel %vm3182_vm4, 1e+30, %v7966_v49  ;;  %v3247_v56 = vsel %vm3183_vm5, 1e+30, %v7967_v6  ;;  %vm3184_vm6 = vcmp.le.f32.partialorder %v5457_v10, %v3103_v18  ;;  %vm3185_vm7 = vcmp.le.f32.partialorder %v7954_v52, %v3103_v18 }
 0x82e   : > { %v3248_v40 = vsel %vm3184_vm6, 1e+30, %v5457_v10  ;;  %v3249_v8 = vsel %vm3185_vm7, 1e+30, %v7954_v52  ;;  %v3322_v59 = vmin.f32 %v3246_v62, %v3247_v56 }
 0x82f   : > { %v3325_v28 = vmin.f32 %v3248_v40, %v3249_v8 }
 0x830   : > { %3323 = vmin.xlane.f32.xlu1 %v3322_v59  ;;  %v7970_v59 = vld [vmem:[#allocation18_spill] sm:$0xff] }
 0x831   : > { %3326 = vmin.xlane.f32.xlu0 %v3325_v28 }
 0x833   : > { %v3106_v63 = vpop.xlane.xlu1 %3105 }
 0x834   : > { %vm3186_vm10 = vcmp.le.f32.partialorder %v7968_v2, %v3106_v63  ;;  %vm3187_vm11 = vcmp.le.f32.partialorder %v7969_v55, %v3106_v63  ;;  %v3109_v49 = vpop.xlane.xlu0 %3108 }
 0x835   : > { %v3250_v6 = vsel %vm3186_vm10, 1e+30, %v7968_v2  ;;  %v3251_v5 = vsel %vm3187_vm11, 1e+30, %v7969_v55  ;;  %vm3188_vm12 = vcmp.le.f32.partialorder %v7942_v34, %v3109_v49  ;;  %vm3189_vm13 = vcmp.le.f32.partialorder %v7943_v7, %v3109_v49 }
 0x836   : > { %v3252_v18 = vsel %vm3188_vm12, 1e+30, %v7942_v34  ;;  %v3253_v62 = vsel %vm3189_vm13, 1e+30, %v7943_v7  ;;  %v3328_v56 = vmin.f32 %v3250_v6, %v3251_v5 }
 0x837   : > { %v3112_v40 = vpop.xlane.xlu1 %3111  ;;  %v3331_v8 = vmin.f32 %v3252_v18, %v3253_v62 }
 0x838   : > { %vm3190_vm14 = vcmp.le.f32.partialorder %v7957_v51, %v3112_v40  ;;  %vm3191_vm15 = vcmp.le.f32.partialorder %v7970_v59, %v3112_v40  ;;  %v3115_v28 = vpop.xlane.xlu0 %3114  ;;  %3329 = vmin.xlane.f32.xlu1 %v3328_v56 }
 0x839   : > { %v3254_v63 = vsel %vm3190_vm14, 1e+30, %v7957_v51  ;;  %v3255_v55 = vsel %vm3191_vm15, 1e+30, %v7970_v59  ;;  %vm3192_vm0 = vcmp.le.f32.partialorder %v7915_v45, %v3115_v28  ;;  %vm3193_vm1 = vcmp.le.f32.partialorder %v7931_v39, %v3115_v28  ;;  %3332 = vmin.xlane.f32.xlu0 %v3331_v8 }
 0x83a   : > { %v3256_v49 = vsel %vm3192_vm0, 1e+30, %v7915_v45  ;;  %v3257_v5 = vsel %vm3193_vm1, 1e+30, %v7931_v39  ;;  %v3334_v6 = vmin.f32 %v3254_v63, %v3255_v55 }
 0x83b   : > { %v3118_v18 = vpop.xlane.xlu1 %3117  ;;  %v3337_v62 = vmin.f32 %v3256_v49, %v3257_v5 }
 0x83c   : > { %vm3194_vm2 = vcmp.le.f32.partialorder %v7932_v31, %v3118_v18  ;;  %vm3195_vm3 = vcmp.le.f32.partialorder %v7946_v4, %v3118_v18  ;;  %v3121_v56 = vpop.xlane.xlu0 %3120  ;;  %3335 = vmin.xlane.f32.xlu1 %v3334_v6 }
 0x83d   : > { %v3258_v40 = vsel %vm3194_vm2, 1e+30, %v7932_v31  ;;  %v3259_v59 = vsel %vm3195_vm3, 1e+30, %v7946_v4  ;;  %vm3196_vm4 = vcmp.le.f32.partialorder %v5445_v35, %v3121_v56  ;;  %vm3197_vm5 = vcmp.le.f32.partialorder %v7919_v0, %v3121_v56  ;;  %3338 = vmin.xlane.f32.xlu0 %v3337_v62 }
 0x83e   : > { %v3260_v8 = vsel %vm3196_vm4, 1e+30, %v5445_v35  ;;  %v3261_v55 = vsel %vm3197_vm5, 1e+30, %v7919_v0  ;;  %v3340_v28 = vmin.f32 %v3258_v40, %v3259_v59 }
 0x83f   : > { %v3124_v63 = vpop.xlane.xlu1 %3123  ;;  %v3343_v49 = vmin.f32 %v3260_v8, %v3261_v55 }
 0x840   : > { %vm3198_vm6 = vcmp.le.f32.partialorder %v7920_v1, %v3124_v63  ;;  %vm3199_vm7 = vcmp.le.f32.partialorder %v7934_v27, %v3124_v63  ;;  %v3127_v5 = vpop.xlane.xlu0 %3126  ;;  %3341 = vmin.xlane.f32.xlu1 %v3340_v28 }
 0x841   : > { %v3262_v6 = vsel %vm3198_vm6, 1e+30, %v7920_v1  ;;  %v3263_v18 = vsel %vm3199_vm7, 1e+30, %v7934_v27  ;;  %vm3200_vm10 = vcmp.le.f32.partialorder %v7906_v14, %v3127_v5  ;;  %vm3201_vm11 = vcmp.le.f32.partialorder %v7907_v19, %v3127_v5  ;;  %3344 = vmin.xlane.f32.xlu0 %v3343_v49 }
 0x842   : > { %v3264_v62 = vsel %vm3200_vm10, 1e+30, %v7906_v14  ;;  %v3265_v59 = vsel %vm3201_vm11, 1e+30, %v7907_v19  ;;  %v3346_v56 = vmin.f32 %v3262_v6, %v3263_v18 }
 0x843   : > { %v3130_v40 = vpop.xlane.xlu1 %3129  ;;  %v3349_v8 = vmin.f32 %v3264_v62, %v3265_v59 }
 0x844   : > { %vm3202_vm12 = vcmp.le.f32.partialorder %v7908_v50, %v3130_v40  ;;  %vm3203_vm13 = vcmp.le.f32.partialorder %v7922_v48, %v3130_v40  ;;  %v3133_v55 = vpop.xlane.xlu0 %3132  ;;  %3347 = vmin.xlane.f32.xlu1 %v3346_v56 }
 0x845   : > { %v3266_v28 = vsel %vm3202_vm12, 1e+30, %v7908_v50  ;;  %v3267_v63 = vsel %vm3203_vm13, 1e+30, %v7922_v48  ;;  %vm3204_vm14 = vcmp.le.f32.partialorder %v7893_v41, %v3133_v55  ;;  %vm3205_vm15 = vcmp.le.f32.partialorder %v7894_v13, %v3133_v55  ;;  %3350 = vmin.xlane.f32.xlu0 %v3349_v8 }
 0x846   : > { %v3268_v49 = vsel %vm3204_vm14, 1e+30, %v7893_v41  ;;  %v3269_v5 = vsel %vm3205_vm15, 1e+30, %v7894_v13  ;;  %v3352_v6 = vmin.f32 %v3266_v28, %v3267_v63 }
 0x847   : > { %v3136_v18 = vpop.xlane.xlu1 %3135  ;;  %v3355_v62 = vmin.f32 %v3268_v49, %v3269_v5 }
 0x848   : > { %vm3206_vm0 = vcmp.le.f32.partialorder %v7895_v11, %v3136_v18  ;;  %vm3207_vm1 = vcmp.le.f32.partialorder %v7910_v58, %v3136_v18  ;;  %v3139_v59 = vpop.xlane.xlu0 %3138  ;;  %3353 = vmin.xlane.f32.xlu1 %v3352_v6 }
 0x849   : > { %v3270_v56 = vsel %vm3206_vm0, 1e+30, %v7895_v11  ;;  %v3271_v40 = vsel %vm3207_vm1, 1e+30, %v7910_v58  ;;  %vm3208_vm2 = vcmp.le.f32.partialorder %v7897_v21, %v3139_v59  ;;  %vm3209_vm3 = vcmp.le.f32.partialorder %v7898_v25, %v3139_v59  ;;  %3356 = vmin.xlane.f32.xlu0 %v3355_v62 }
 0x84a   : > { %v3272_v8 = vsel %vm3208_vm2, 1e+30, %v7897_v21  ;;  %v3273_v55 = vsel %vm3209_vm3, 1e+30, %v7898_v25  ;;  %v3358_v28 = vmin.f32 %v3270_v56, %v3271_v40 }
 0x84b   : > { %v3142_v63 = vpop.xlane.xlu1 %3141  ;;  %v3361_v49 = vmin.f32 %v3272_v8, %v3273_v55 }
 0x84c   : > { %vm3210_vm4 = vcmp.le.f32.partialorder %v7879_v42, %v3142_v63  ;;  %vm3211_vm5 = vcmp.le.f32.partialorder %v7880_v57, %v3142_v63  ;;  %v3145_v5 = vpop.xlane.xlu0 %3144  ;;  %3359 = vmin.xlane.f32.xlu1 %v3358_v28 }
 0x84d   : > { %v3274_v6 = vsel %vm3210_vm4, 1e+30, %v7879_v42  ;;  %v3275_v18 = vsel %vm3211_vm5, 1e+30, %v7880_v57  ;;  %vm3212_vm6 = vcmp.le.f32.partialorder %v7881_v24, %v3145_v5  ;;  %vm3213_vm7 = vcmp.le.f32.partialorder %v7882_v20, %v3145_v5  ;;  %3362 = vmin.xlane.f32.xlu0 %v3361_v49 }
 0x84e   : > { %v3276_v62 = vsel %vm3212_vm6, 1e+30, %v7881_v24  ;;  %v3277_v59 = vsel %vm3213_vm7, 1e+30, %v7882_v20  ;;  %v3364_v56 = vmin.f32 %v3274_v6, %v3275_v18 }
 0x84f   : > { %v3148_v40 = vpop.xlane.xlu1 %3147  ;;  %v3367_v8 = vmin.f32 %v3276_v62, %v3277_v59 }
 0x850   : > { %vm3214_vm10 = vcmp.le.f32.partialorder %v7883_v26, %v3148_v40  ;;  %vm3215_vm11 = vcmp.le.f32.partialorder %v7884_v9, %v3148_v40  ;;  %v3151_v55 = vpop.xlane.xlu0 %3150  ;;  %3365 = vmin.xlane.f32.xlu1 %v3364_v56 }
 0x851   : > { %v3278_v28 = vsel %vm3214_vm10, 1e+30, %v7883_v26  ;;  %v3279_v63 = vsel %vm3215_vm11, 1e+30, %v7884_v9  ;;  %vm3216_vm12 = vcmp.le.f32.partialorder %v5559_v16, %v3151_v55  ;;  %vm3217_vm13 = vcmp.le.f32.partialorder %v5562_v43, %v3151_v55  ;;  %3368 = vmin.xlane.f32.xlu0 %v3367_v8 }
 0x852   : > { %v3280_v49 = vsel %vm3216_vm12, 1e+30, %v5559_v16  ;;  %v3281_v5 = vsel %vm3217_vm13, 1e+30, %v5562_v43  ;;  %v3370_v6 = vmin.f32 %v3278_v28, %v3279_v63 }
 0x853   : > { %v3154_v18 = vpop.xlane.xlu1 %3153  ;;  %v3373_v62 = vmin.f32 %v3280_v49, %v3281_v5  ;;  %v7971_v49 = vld [vmem:[#allocation6_spill] sm:$0xff] }
 0x854   : > { %vm3218_vm14 = vcmp.le.f32.partialorder %v5567_v32, %v3154_v18  ;;  %vm3219_vm15 = vcmp.le.f32.partialorder %v5570_v3, %v3154_v18  ;;  %3371 = vmin.xlane.f32.xlu1 %v3370_v6  ;;  %v3448_v5 = vsub.s32 0, %v7971_v49  ;;  %v3649_v6 = vsub.s32 1, %v7971_v49  ;;  %v7972_v18 = vld [vmem:[#allocation10_spill] sm:$0xff] }
 0x855   : > { %v3282_v59 = vsel %vm3218_vm14, 1e+30, %v5567_v32  ;;  %v3283_v56 = vsel %vm3219_vm15, 1e+30, %v5570_v3  ;;  %3374 = vmin.xlane.f32.xlu0 %v3373_v62  ;;  %v7973_v62 = vld [vmem:[#allocation9_spill] sm:$0xff] }
 0x856   : > { %v3376_v40 = vmin.f32 %v3282_v59, %v3283_v56  ;;  %v6609_v3 = vrot.slane %v7972_v18, %v3448_v5  ;;  %v6612_v59 = vrot.slane %v7973_v62, %v3448_v5 }
 0x857   : > { %v3157_v55 = vpop.xlane.xlu0 %3156 }
 0x858   : > { %vm3220_vm0 = vcmp.le.f32.partialorder %v5575_v44, %v3157_v55  ;;  %vm3221_vm1 = vcmp.le.f32.partialorder %v5578_v33, %v3157_v55  ;;  %3377 = vmin.xlane.f32.xlu1 %v3376_v40  ;;  %v3850_v55 = vsub.s32 2, %v7971_v49  ;;  %v6618_v40 = vrot.slane %v7972_v18, %v3649_v6 }
 0x859   : > { %v3284_v8 = vsel %vm3220_vm0, 1e+30, %v5575_v44  ;;  %v3285_v28 = vsel %vm3221_vm1, 1e+30, %v5578_v33 }
 0x85a   : > { %v3379_v63 = vmin.f32 %v3284_v8, %v3285_v28  ;;  %v6621_v8 = vrot.slane %v7973_v62, %v3649_v6  ;;  %v6636_v6 = vrot.slane %v7972_v18, %v3850_v55  ;;  %v6641_v44 = vrot.slane %v7973_v62, %v3850_v55 }
 0x85c   : > { %3380 = vmin.xlane.f32.xlu0 %v3379_v63 }
 0x86d   : > { %v3288_v56 = vpop.xlane.xlu1 %3287 }
 0x86e   : > { %vm3382_vm2 = vcmp.le.f32.partialorder %v5327_v15, %v3288_v56  ;;  %vm3383_vm3 = vcmp.le.f32.partialorder %v5330_v17, %v3288_v56 }
 0x86f   : > { %v3454_v28 = vsel %vm3382_vm2, %v6609_v3, -1e+30  ;;  %v3455_v63 = vsel %vm3383_vm3, %v6612_v59, -1e+30  ;;  %v3655_v32 = vsel %vm3382_vm2, %v6618_v40, -1e+30 }
 0x870   : > { %v3518_v5 = vmax.f32 %v3454_v28, %v3455_v63  ;;  %v3656_v33 = vsel %vm3383_vm3, %v6621_v8, -1e+30  ;;  %v3856_v18 = vsel %vm3382_vm2, %v6636_v6, -1e+30  ;;  %v3857_v55 = vsel %vm3383_vm3, %v6641_v44, -1e+30 }
 0x871   : > { %v3291_v49 = vpop.xlane.xlu0 %3290  ;;  %v3719_v9 = vmax.f32 %v3655_v32, %v3656_v33  ;;  %v3920_v15 = vmax.f32 %v3856_v18, %v3857_v55 }
 0x872   : > { %vm3384_vm4 = vcmp.le.f32.partialorder %v5335_v22, %v3291_v49  ;;  %vm3385_vm5 = vcmp.le.f32.partialorder %v5338_v23, %v3291_v49  ;;  %3519 = vmax.xlane.f32.xlu1 %v3518_v5 }
 0x873   : > { %v3456_v28 = vsel %vm3384_vm4, %v6609_v3, -1e+30  ;;  %v3457_v63 = vsel %vm3385_vm5, %v6612_v59, -1e+30  ;;  %v3657_v5 = vsel %vm3384_vm4, %v6618_v40, -1e+30 }
 0x874   : > { %v3521_v26 = vmax.f32 %v3456_v28, %v3457_v63  ;;  %v3658_v62 = vsel %vm3385_vm5, %v6621_v8, -1e+30  ;;  %v3858_v17 = vsel %vm3384_vm4, %v6636_v6, -1e+30 }
 0x875   : > { %v3294_v43 = vpop.xlane.xlu1 %3293  ;;  %v3722_v32 = vmax.f32 %v3657_v5, %v3658_v62 }
 0x876   : > { %vm3386_vm6 = vcmp.le.f32.partialorder %v5343_v29, %v3294_v43  ;;  %vm3387_vm7 = vcmp.le.f32.partialorder %v5346_v30, %v3294_v43  ;;  %3720 = vmax.xlane.f32.xlu1 %v3719_v9  ;;  %3522 = vmax.xlane.f32.xlu0 %v3521_v26  ;;  %v3859_v9 = vsel %vm3385_vm5, %v6641_v44, -1e+30 }
 0x877   : > { %v3458_v56 = vsel %vm3386_vm6, %v6609_v3, -1e+30  ;;  %v3459_v28 = vsel %vm3387_vm7, %v6612_v59, -1e+30  ;;  %v3923_v26 = vmax.f32 %v3858_v17, %v3859_v9  ;;  %v3659_v18 = vsel %vm3386_vm6, %v6618_v40, -1e+30 }
 0x878   : > { %v3524_v22 = vmax.f32 %v3458_v56, %v3459_v28  ;;  %v3660_v62 = vsel %vm3387_vm7, %v6621_v8, -1e+30 }
 0x879   : > { %v3297_v33 = vpop.xlane.xlu0 %3296  ;;  %v3725_v55 = vmax.f32 %v3659_v18, %v3660_v62 }
 0x87a   : > { %vm3388_vm10 = vcmp.le.f32.partialorder %v5351_v36, %v3297_v33  ;;  %vm3389_vm11 = vcmp.le.f32.partialorder %v5354_v38, %v3297_v33  ;;  %3921 = vmax.xlane.f32.xlu1 %v3920_v15  ;;  %3723 = vmax.xlane.f32.xlu0 %v3722_v32  ;;  %v3860_v15 = vsel %vm3386_vm6, %v6636_v6, -1e+30  ;;  %v3861_v32 = vsel %vm3387_vm7, %v6641_v44, -1e+30 }
 0x87b   : > { %v3460_v23 = vsel %vm3388_vm10, %v6609_v3, -1e+30  ;;  %v3461_v49 = vsel %vm3389_vm11, %v6612_v59, -1e+30  ;;  %v3661_v17 = vsel %vm3388_vm10, %v6618_v40, -1e+30  ;;  %v3926_v28 = vmax.f32 %v3860_v15, %v3861_v32 }
 0x87c   : > { %v3527_v5 = vmax.f32 %v3460_v23, %v3461_v49  ;;  %v3662_v56 = vsel %vm3389_vm11, %v6621_v8, -1e+30  ;;  %v3862_v30 = vsel %vm3388_vm10, %v6636_v6, -1e+30 }
 0x87d   : > { %v3300_v63 = vpop.xlane.xlu1 %3299  ;;  %v3728_v9 = vmax.f32 %v3661_v17, %v3662_v56 }
 0x87e   : > { %3525 = vmax.xlane.f32.xlu1 %v3524_v22  ;;  %3924 = vmax.xlane.f32.xlu0 %v3923_v26  ;;  %vm3390_vm12 = vcmp.le.f32.partialorder %v5359_v46, %v3300_v63  ;;  %vm3391_vm13 = vcmp.le.f32.partialorder %v5362_v47, %v3300_v63  ;;  %v3863_v26 = vsel %vm3389_vm11, %v6641_v44, -1e+30 }
 0x87f   : > { %v3462_v43 = vsel %vm3390_vm12, %v6609_v3, -1e+30  ;;  %v3463_v22 = vsel %vm3391_vm13, %v6612_v59, -1e+30  ;;  %v3929_v18 = vmax.f32 %v3862_v30, %v3863_v26  ;;  %v3663_v62 = vsel %vm3390_vm12, %v6618_v40, -1e+30 }
 0x880   : > { %v3530_v36 = vmax.f32 %v3462_v43, %v3463_v22  ;;  %v3664_v23 = vsel %vm3391_vm13, %v6621_v8, -1e+30  ;;  %v3864_v15 = vsel %vm3390_vm12, %v6636_v6, -1e+30  ;;  %v3865_v32 = vsel %vm3391_vm13, %v6641_v44, -1e+30 }
 0x881   : > { %v3303_v29 = vpop.xlane.xlu0 %3302  ;;  %v7974_v22 = vld [vmem:[#allocation11_spill] sm:$0xff]  ;;  %v7975_v26 = vld [vmem:[#allocation12_spill] sm:$0xff] }
 0x882   : > { %3726 = vmax.xlane.f32.xlu1 %v3725_v55  ;;  %3528 = vmax.xlane.f32.xlu0 %v3527_v5  ;;  %vm3392_vm14 = vcmp.le.f32.partialorder %v5367_v53, %v3303_v29  ;;  %vm3393_vm15 = vcmp.le.f32.partialorder %v5370_v54, %v3303_v29  ;;  %v3731_v55 = vmax.f32 %v3663_v62, %v3664_v23 }
 0x883   : > { %v3464_v38 = vsel %vm3392_vm14, %v6609_v3, -1e+30  ;;  %v3465_v33 = vsel %vm3393_vm15, %v6612_v59, -1e+30  ;;  %v3665_v17 = vsel %vm3392_vm14, %v6618_v40, -1e+30 }
 0x884   : > { %v3533_v5 = vmax.f32 %v3464_v38, %v3465_v33  ;;  %v3666_v56 = vsel %vm3393_vm15, %v6621_v8, -1e+30  ;;  %v3866_v47 = vsel %vm3392_vm14, %v6636_v6, -1e+30  ;;  %v3867_v43 = vsel %vm3393_vm15, %v6641_v44, -1e+30 }
 0x885   : > { %v3306_v49 = vpop.xlane.xlu1 %3305 }
 0x886   : > { %3927 = vmax.xlane.f32.xlu1 %v3926_v28  ;;  %3729 = vmax.xlane.f32.xlu0 %v3728_v9  ;;  %vm3394_vm0 = vcmp.le.f32.partialorder %v5375_v60, %v3306_v49  ;;  %vm3395_vm1 = vcmp.le.f32.partialorder %v5378_v61, %v3306_v49  ;;  %v3932_v28 = vmax.f32 %v3864_v15, %v3865_v32 }
 0x887   : > { %v3734_v9 = vmax.f32 %v3665_v17, %v3666_v56  ;;  %v3466_v63 = vsel %vm3394_vm0, %v6609_v3, -1e+30  ;;  %v3467_v30 = vsel %vm3395_vm1, %v6612_v59, -1e+30  ;;  %v3668_v62 = vsel %vm3395_vm1, %v6621_v8, -1e+30 }
 0x888   : > { %v3536_v53 = vmax.f32 %v3466_v63, %v3467_v30  ;;  %v7976_v17 = vld [vmem:[#allocation13_spill] sm:$0xff]  ;;  %v7977_v56 = vld [vmem:[#allocation14_spill] sm:$0xff]  ;;  %v7978_v30 = vld [vmem:[#allocation16_spill] sm:$0xff] }
 0x889   : > { %v3309_v46 = vpop.xlane.xlu0 %3308 }
 0x88a   : > { %3531 = vmax.xlane.f32.xlu1 %v3530_v36  ;;  %3930 = vmax.xlane.f32.xlu0 %v3929_v18  ;;  %vm3396_vm2 = vcmp.le.f32.partialorder %v7974_v22, %v3309_v46  ;;  %vm3397_vm3 = vcmp.le.f32.partialorder %v7975_v26, %v3309_v46  ;;  %v3935_v36 = vmax.f32 %v3866_v47, %v3867_v43  ;;  %v3667_v18 = vsel %vm3394_vm0, %v6618_v40, -1e+30 }
 0x88b   : > { %v3468_v54 = vsel %vm3396_vm2, %v6609_v3, -1e+30  ;;  %v3469_v29 = vsel %vm3397_vm3, %v6612_v59, -1e+30  ;;  %v3737_v38 = vmax.f32 %v3667_v18, %v3668_v62  ;;  %v3669_v15 = vsel %vm3396_vm2, %v6618_v40, -1e+30 }
 0x88c   : > { %v3539_v33 = vmax.f32 %v3468_v54, %v3469_v29  ;;  %v3670_v32 = vsel %vm3397_vm3, %v6621_v8, -1e+30  ;;  %v3870_v61 = vsel %vm3396_vm2, %v6636_v6, -1e+30  ;;  %v3871_v63 = vsel %vm3397_vm3, %v6641_v44, -1e+30 }
 0x88d   : > { %v3312_v23 = vpop.xlane.xlu1 %3311  ;;  %v3941_v22 = vmax.f32 %v3870_v61, %v3871_v63  ;;  %v7981_v63 = vld [vmem:[#allocation24_spill] sm:$0xff] }
 0x88e   : > { %3732 = vmax.xlane.f32.xlu1 %v3731_v55  ;;  %3534 = vmax.xlane.f32.xlu0 %v3533_v5  ;;  %v3868_v55 = vsel %vm3394_vm0, %v6636_v6, -1e+30  ;;  %v3869_v5 = vsel %vm3395_vm1, %v6641_v44, -1e+30  ;;  %vm3398_vm4 = vcmp.le.f32.partialorder %v7976_v17, %v3312_v23  ;;  %vm3399_vm5 = vcmp.le.f32.partialorder %v7977_v56, %v3312_v23  ;;  %v7979_v56 = vld [vmem:[#allocation19_spill] sm:$0xff] }
 0x88f   : > { %v3470_v49 = vsel %vm3398_vm4, %v6609_v3, -1e+30  ;;  %v3471_v47 = vsel %vm3399_vm5, %v6612_v59, -1e+30  ;;  %v3872_v54 = vsel %vm3398_vm4, %v6636_v6, -1e+30 }
 0x890   : > { %v3542_v43 = vmax.f32 %v3470_v49, %v3471_v47  ;;  %v3873_v29 = vsel %vm3399_vm5, %v6641_v44, -1e+30  ;;  %v7980_v47 = vld [vmem:[#allocation23_spill] sm:$0xff] }
 0x891   : > { %v3315_v60 = vpop.xlane.xlu0 %3314 }
 0x892   : > { %3933 = vmax.xlane.f32.xlu1 %v3932_v28  ;;  %3735 = vmax.xlane.f32.xlu0 %v3734_v9  ;;  %v3938_v28 = vmax.f32 %v3868_v55, %v3869_v5  ;;  %v3740_v9 = vmax.f32 %v3669_v15, %v3670_v32  ;;  %vm3400_vm6 = vcmp.le.f32.partialorder %v7886_v37, %v3315_v60 }
 0x893   : > { %vm3401_vm7 = vcmp.le.f32.partialorder %v7978_v30, %v3315_v60  ;;  %v3472_v46 = vsel %vm3400_vm6, %v6609_v3, -1e+30  ;;  %v3944_v55 = vmax.f32 %v3872_v54, %v3873_v29  ;;  %v3874_v15 = vsel %vm3400_vm6, %v6636_v6, -1e+30 }
 0x894   : > { %v3473_v26 = vsel %vm3401_vm7, %v6612_v59, -1e+30  ;;  %v3875_v23 = vsel %vm3401_vm7, %v6641_v44, -1e+30 }
 0x895   : > { %v3545_v62 = vmax.f32 %v3472_v46, %v3473_v26  ;;  %v3947_v32 = vmax.f32 %v3874_v15, %v3875_v23 }
 0x896   : > { %3537 = vmax.xlane.f32.xlu1 %v3536_v53  ;;  %3936 = vmax.xlane.f32.xlu0 %v3935_v36  ;;  %v3671_v53 = vsel %vm3398_vm4, %v6618_v40, -1e+30  ;;  %v3672_v36 = vsel %vm3399_vm5, %v6621_v8, -1e+30 }
 0x897   : > { %v3743_v18 = vmax.f32 %v3671_v53, %v3672_v36 }
 0x89a   : > { %3738 = vmax.xlane.f32.xlu1 %v3737_v38  ;;  %3540 = vmax.xlane.f32.xlu0 %v3539_v33  ;;  %v3673_v38 = vsel %vm3400_vm6, %v6618_v40, -1e+30  ;;  %v3674_v33 = vsel %vm3401_vm7, %v6621_v8, -1e+30 }
 0x89b   : > { %v3746_v5 = vmax.f32 %v3673_v38, %v3674_v33 }
 0x89e   : > { %3939 = vmax.xlane.f32.xlu1 %v3938_v28  ;;  %3741 = vmax.xlane.f32.xlu0 %v3740_v9 }
 0x8a2   : > { %3543 = vmax.xlane.f32.xlu1 %v3542_v43  ;;  %3942 = vmax.xlane.f32.xlu0 %v3941_v22 }
 0x8a6   : > { %3744 = vmax.xlane.f32.xlu1 %v3743_v18  ;;  %3546 = vmax.xlane.f32.xlu0 %v3545_v62 }
 0x8aa   : > { %3945 = vmax.xlane.f32.xlu1 %v3944_v55  ;;  %3747 = vmax.xlane.f32.xlu0 %v3746_v5  ;;  %v7982_v55 = vld [vmem:[#allocation27_spill] sm:$0xff]  ;;  %v7983_v5 = vld [vmem:[#allocation28_spill] sm:$0xff] }
 0x8ae   : > { %3948 = vmax.xlane.f32.xlu0 %v3947_v32 }
 0x8b1   : > { %v3321_v17 = vpop.xlane.xlu0 %3320 }
 0x8b2   : > { %vm3404_vm10 = vcmp.le.f32.partialorder %v7979_v56, %v3321_v17  ;;  %vm3405_vm11 = vcmp.le.f32.partialorder %v7963_v12, %v3321_v17 }
 0x8b3   : > { %v3476_v28 = vsel %vm3404_vm10, %v6609_v3, -1e+30  ;;  %v3477_v37 = vsel %vm3405_vm11, %v6612_v59, -1e+30  ;;  %v3677_v60 = vsel %vm3404_vm10, %v6618_v40, -1e+30 }
 0x8b4   : > { %v3551_v9 = vmax.f32 %v3476_v28, %v3477_v37  ;;  %v3678_v49 = vsel %vm3405_vm11, %v6621_v8, -1e+30  ;;  %v3878_v36 = vsel %vm3404_vm10, %v6636_v6, -1e+30  ;;  %v3879_v18 = vsel %vm3405_vm11, %v6641_v44, -1e+30 }
 0x8b5   : > { %v3318_v61 = vpop.xlane.xlu1 %3317  ;;  %v3752_v53 = vmax.f32 %v3677_v60, %v3678_v49  ;;  %v3953_v54 = vmax.f32 %v3878_v36, %v3879_v18 }
 0x8b6   : > { %vm3402_vm12 = vcmp.le.f32.partialorder %v7980_v47, %v3318_v61  ;;  %vm3403_vm13 = vcmp.le.f32.partialorder %v7981_v63, %v3318_v61  ;;  %3552 = vmax.xlane.f32.xlu0 %v3551_v9 }
 0x8b7   : > { %v3474_v30 = vsel %vm3402_vm12, %v6609_v3, -1e+30  ;;  %v3475_v43 = vsel %vm3403_vm13, %v6612_v59, -1e+30  ;;  %v3675_v46 = vsel %vm3402_vm12, %v6618_v40, -1e+30 }
 0x8b8   : > { %v3548_v22 = vmax.f32 %v3474_v30, %v3475_v43  ;;  %v3676_v26 = vsel %vm3403_vm13, %v6621_v8, -1e+30  ;;  %v3876_v38 = vsel %vm3402_vm12, %v6636_v6, -1e+30  ;;  %v3877_v33 = vsel %vm3403_vm13, %v6641_v44, -1e+30 }
 0x8b9   : > { %v3749_v62 = vmax.f32 %v3675_v46, %v3676_v26  ;;  %v3950_v12 = vmax.f32 %v3876_v38, %v3877_v33  ;;  %v7984_v46 = vld [vmem:[#allocation36_spill] sm:$0xff] }
 0x8ba   : > { %3549 = vmax.xlane.f32.xlu1 %v3548_v22  ;;  %3753 = vmax.xlane.f32.xlu0 %v3752_v53 }
 0x8bd   : > { %v3324_v29 = vpop.xlane.xlu1 %3323 }
 0x8be   : > { %vm3406_vm14 = vcmp.le.f32.partialorder %v7982_v55, %v3324_v29  ;;  %vm3407_vm15 = vcmp.le.f32.partialorder %v7983_v5, %v3324_v29  ;;  %v3327_v15 = vpop.xlane.xlu0 %3326  ;;  %3750 = vmax.xlane.f32.xlu1 %v3749_v62  ;;  %3954 = vmax.xlane.f32.xlu0 %v3953_v54 }
 0x8bf   : > { %vm3408_vm0 = vcmp.le.f32.partialorder %v5457_v10, %v3327_v15  ;;  %vm3409_vm1 = vcmp.le.f32.partialorder %v7954_v52, %v3327_v15  ;;  %v3478_v56 = vsel %vm3406_vm14, %v6609_v3, -1e+30  ;;  %v3479_v28 = vsel %vm3407_vm15, %v6612_v59, -1e+30 }
 0x8c0   : > { %v3480_v23 = vsel %vm3408_vm0, %v6609_v3, -1e+30  ;;  %v3481_v32 = vsel %vm3409_vm1, %v6612_v59, -1e+30  ;;  %v3681_v37 = vsel %vm3408_vm0, %v6618_v40, -1e+30  ;;  %v3554_v61 = vmax.f32 %v3478_v56, %v3479_v28 }
 0x8c1   : > { %v3557_v17 = vmax.f32 %v3480_v23, %v3481_v32  ;;  %v3682_v9 = vsel %vm3409_vm1, %v6621_v8, -1e+30  ;;  %v3679_v49 = vsel %vm3406_vm14, %v6618_v40, -1e+30  ;;  %v3680_v47 = vsel %vm3407_vm15, %v6621_v8, -1e+30 }
 0x8c2   : > { %3951 = vmax.xlane.f32.xlu1 %v3950_v12  ;;  %v3758_v60 = vmax.f32 %v3681_v37, %v3682_v9  ;;  %v3882_v30 = vsel %vm3408_vm0, %v6636_v6, -1e+30  ;;  %v3883_v43 = vsel %vm3409_vm1, %v6641_v44, -1e+30  ;;  %v3755_v53 = vmax.f32 %v3679_v49, %v3680_v47  ;;  %v7985_v56 = vld [vmem:[#allocation18_spill] sm:$0xff] }
 0x8c3   : > { %3558 = vmax.xlane.f32.xlu0 %v3557_v17  ;;  %v3959_v36 = vmax.f32 %v3882_v30, %v3883_v43  ;;  %v3880_v10 = vsel %vm3406_vm14, %v6636_v6, -1e+30  ;;  %v3881_v52 = vsel %vm3407_vm15, %v6641_v44, -1e+30 }
 0x8c4   : > { %v3956_v54 = vmax.f32 %v3880_v10, %v3881_v52 }
 0x8c5   : > { %v6897_v22 = vpop.xlane.xlu1 %3329 }
 0x8c6   : > { %v6889_v63 = vpop.xlane.xlu0 %3332  ;;  %3555 = vmax.xlane.f32.xlu1 %v3554_v61  ;;  %vm3410_vm4 = vcmp.le.f32.partialorder %v7968_v2, %v6897_v22  ;;  %vm3411_vm5 = vcmp.le.f32.partialorder %v7984_v46, %v6897_v22 }
 0x8c7   : > { %vm3412_vm2 = vcmp.le.f32.partialorder %v7942_v34, %v6889_v63  ;;  %vm3413_vm3 = vcmp.le.f32.partialorder %v7943_v7, %v6889_v63  ;;  %3759 = vmax.xlane.f32.xlu0 %v3758_v60  ;;  %v3482_v38 = vsel %vm3410_vm4, %v6609_v3, -1e+30  ;;  %v3483_v33 = vsel %vm3411_vm5, %v6612_v59, -1e+30 }
 0x8c8   : > { %v3484_v26 = vsel %vm3412_vm2, %v6609_v3, -1e+30  ;;  %v3485_v18 = vsel %vm3413_vm3, %v6612_v59, -1e+30  ;;  %v3685_v55 = vsel %vm3412_vm2, %v6618_v40, -1e+30  ;;  %v3560_v12 = vmax.f32 %v3482_v38, %v3483_v33 }
 0x8c9   : > { %v3563_v29 = vmax.f32 %v3484_v26, %v3485_v18  ;;  %v3686_v5 = vsel %vm3413_vm3, %v6621_v8, -1e+30  ;;  %v3336_v15 = vpop.xlane.xlu1 %3335  ;;  %v3683_v32 = vsel %vm3410_vm4, %v6618_v40, -1e+30  ;;  %v3684_v17 = vsel %vm3411_vm5, %v6621_v8, -1e+30 }
 0x8ca   : > { %3756 = vmax.xlane.f32.xlu1 %v3755_v53  ;;  %v3339_v62 = vpop.xlane.xlu0 %3338  ;;  %v3764_v23 = vmax.f32 %v3685_v55, %v3686_v5  ;;  %vm3414_vm10 = vcmp.le.f32.partialorder %v7957_v51, %v3336_v15  ;;  %vm3415_vm11 = vcmp.le.f32.partialorder %v7985_v56, %v3336_v15  ;;  %v3761_v9 = vmax.f32 %v3683_v32, %v3684_v17 }
 0x8cb   : > { %3960 = vmax.xlane.f32.xlu0 %v3959_v36  ;;  %vm3416_vm6 = vcmp.le.f32.partialorder %v7915_v45, %v3339_v62  ;;  %vm3417_vm7 = vcmp.le.f32.partialorder %v7931_v39, %v3339_v62  ;;  %v3486_v60 = vsel %vm3414_vm10, %v6609_v3, -1e+30  ;;  %v3487_v49 = vsel %vm3415_vm11, %v6612_v59, -1e+30 }
 0x8cc   : > { %v3488_v28 = vsel %vm3416_vm6, %v6609_v3, -1e+30  ;;  %v3489_v37 = vsel %vm3417_vm7, %v6612_v59, -1e+30  ;;  %v3689_v47 = vsel %vm3416_vm6, %v6618_v40, -1e+30  ;;  %v3566_v36 = vmax.f32 %v3486_v60, %v3487_v49 }
 0x8cd   : > { %v3569_v61 = vmax.f32 %v3488_v28, %v3489_v37  ;;  %v3690_v30 = vsel %vm3417_vm7, %v6621_v8, -1e+30  ;;  %v3342_v43 = vpop.xlane.xlu1 %3341  ;;  %v3687_v52 = vsel %vm3414_vm10, %v6618_v40, -1e+30  ;;  %v3688_v26 = vsel %vm3415_vm11, %v6621_v8, -1e+30 }
 0x8ce   : > { %3957 = vmax.xlane.f32.xlu1 %v3956_v54  ;;  %v3345_v53 = vpop.xlane.xlu0 %3344  ;;  %v3770_v10 = vmax.f32 %v3689_v47, %v3690_v30  ;;  %v3890_v18 = vsel %vm3416_vm6, %v6636_v6, -1e+30  ;;  %v3891_v54 = vsel %vm3417_vm7, %v6641_v44, -1e+30  ;;  %v3888_v55 = vsel %vm3414_vm10, %v6636_v6, -1e+30 }
 0x8cf   : > { %3564 = vmax.xlane.f32.xlu0 %v3563_v29  ;;  %vm3420_vm12 = vcmp.le.f32.partialorder %v5445_v35, %v3345_v53  ;;  %vm3421_vm13 = vcmp.le.f32.partialorder %v7919_v0, %v3345_v53  ;;  %v3767_v29 = vmax.f32 %v3687_v52, %v3688_v26  ;;  %v3971_v33 = vmax.f32 %v3890_v18, %v3891_v54 }
 0x8d0   : > { %v3889_v45 = vsel %vm3415_vm11, %v6641_v44, -1e+30  ;;  %vm3418_vm14 = vcmp.le.f32.partialorder %v7932_v31, %v3342_v43  ;;  %vm3419_vm15 = vcmp.le.f32.partialorder %v7946_v4, %v3342_v43  ;;  %v3492_v39 = vsel %vm3420_vm12, %v6609_v3, -1e+30 }
 0x8d1   : > { %v6981_v38 = vpop.xlane.xlu1 %3347  ;;  %v3493_v62 = vsel %vm3421_vm13, %v6612_v59, -1e+30  ;;  %v3968_v51 = vmax.f32 %v3888_v55, %v3889_v45  ;;  %v3490_v15 = vsel %vm3418_vm14, %v6609_v3, -1e+30  ;;  %v3694_v32 = vsel %vm3421_vm13, %v6621_v8, -1e+30 }
 0x8d2   : > { %3561 = vmax.xlane.f32.xlu1 %v3560_v12  ;;  %v3575_v5 = vmax.f32 %v3492_v39, %v3493_v62  ;;  %v3491_v12 = vsel %vm3419_vm15, %v6612_v59, -1e+30  ;;  %v3351_v17 = vpop.xlane.xlu0 %3350  ;;  %v3894_v60 = vsel %vm3420_vm12, %v6636_v6, -1e+30  ;;  %v3895_v49 = vsel %vm3421_vm13, %v6641_v44, -1e+30 }
 0x8d3   : > { %3765 = vmax.xlane.f32.xlu0 %v3764_v23  ;;  %v3693_v23 = vsel %vm3420_vm12, %v6618_v40, -1e+30  ;;  %v3572_v28 = vmax.f32 %v3490_v15, %v3491_v12  ;;  %vm3424_vm0 = vcmp.le.f32.partialorder %v7906_v14, %v3351_v17  ;;  %vm3425_vm1 = vcmp.le.f32.partialorder %v7907_v19, %v3351_v17 }
 0x8d4   : > { %v3776_v37 = vmax.f32 %v3693_v23, %v3694_v32  ;;  %v3892_v35 = vsel %vm3418_vm14, %v6636_v6, -1e+30  ;;  %v3893_v0 = vsel %vm3419_vm15, %v6641_v44, -1e+30  ;;  %vm3422_vm6 = vcmp.le.f32.partialorder %v7920_v1, %v6981_v38 }
 0x8d5   : > { %v7009_v56 = vpop.xlane.xlu1 %3353  ;;  %vm3423_vm7 = vcmp.le.f32.partialorder %v7934_v27, %v6981_v38  ;;  %v3496_v53 = vsel %vm3424_vm0, %v6609_v3, -1e+30  ;;  %v3497_v31 = vsel %vm3425_vm1, %v6612_v59, -1e+30  ;;  %v3974_v52 = vmax.f32 %v3892_v35, %v3893_v0 }
 0x8d6   : > { %3762 = vmax.xlane.f32.xlu1 %v3761_v9  ;;  %v3691_v9 = vsel %vm3418_vm14, %v6618_v40, -1e+30  ;;  %v7025_v30 = vpop.xlane.xlu0 %3356  ;;  %v3581_v26 = vmax.f32 %v3496_v53, %v3497_v31  ;;  %v3494_v4 = vsel %vm3422_vm6, %v6609_v3, -1e+30  ;;  %v3495_v43 = vsel %vm3423_vm7, %v6612_v59, -1e+30 }
 0x8d7   : > { %3570 = vmax.xlane.f32.xlu0 %v3569_v61  ;;  %v3692_v61 = vsel %vm3419_vm15, %v6621_v8, -1e+30  ;;  %v3697_v18 = vsel %vm3424_vm0, %v6618_v40, -1e+30  ;;  %v3698_v54 = vsel %vm3425_vm1, %v6621_v8, -1e+30  ;;  %v3578_v55 = vmax.f32 %v3494_v4, %v3495_v43 }
 0x8d8   : > { %v3773_v47 = vmax.f32 %v3691_v9, %v3692_v61  ;;  %v3782_v45 = vmax.f32 %v3697_v18, %v3698_v54  ;;  %v3695_v39 = vsel %vm3422_vm6, %v6618_v40, -1e+30  ;;  %v3696_v62 = vsel %vm3423_vm7, %v6621_v8, -1e+30 }
 0x8d9   : > { %vm3428_vm10 = vcmp.le.f32.partialorder %v7893_v41, %v7025_v30  ;;  %vm3429_vm11 = vcmp.le.f32.partialorder %v7894_v13, %v7025_v30  ;;  %v3779_v15 = vmax.f32 %v3695_v39, %v3696_v62  ;;  %vm3426_vm12 = vcmp.le.f32.partialorder %v7908_v50, %v7009_v56 }
 0x8da   : > { %3567 = vmax.xlane.f32.xlu1 %v3566_v36  ;;  %v7027_v36 = vpop.xlane.xlu1 %3359  ;;  %v3896_v19 = vsel %vm3422_vm6, %v6636_v6, -1e+30  ;;  %v3897_v32 = vsel %vm3423_vm7, %v6641_v44, -1e+30  ;;  %vm3427_vm13 = vcmp.le.f32.partialorder %v7922_v48, %v7009_v56  ;;  %v3500_v17 = vsel %vm3428_vm10, %v6609_v3, -1e+30 }
 0x8db   : > { %3771 = vmax.xlane.f32.xlu0 %v3770_v10  ;;  %v3977_v10 = vmax.f32 %v3894_v60, %v3895_v49  ;;  %v3501_v1 = vsel %vm3429_vm11, %v6612_v59, -1e+30  ;;  %v7109_v27 = vsel %vm3412_vm2, %v6636_v6, -1e+30  ;;  %v7115_v38 = vsel %vm3413_vm3, %v6641_v44, -1e+30 }
 0x8dc   : > { %v7127_v34 = vsel %vm3411_vm5, %v6641_v44, -1e+30  ;;  %v3965_v9 = vmax.f32 %v7109_v27, %v7115_v38  ;;  %v3587_v63 = vmax.f32 %v3500_v17, %v3501_v1  ;;  %v3498_v2 = vsel %vm3426_vm12, %v6609_v3, -1e+30  ;;  %v4327_v27 = vld [vmem:[%s7636_s8] sm:$0x3f] }
 0x8dd   : > { %v3499_v22 = vsel %vm3427_vm13, %v6612_v59, -1e+30  ;;  %v3701_v46 = vsel %vm3428_vm10, %v6618_v40, -1e+30  ;;  %v3702_v61 = vsel %vm3429_vm11, %v6621_v8, -1e+30  ;;  %vm3430_vm14 = vcmp.le.f32.partialorder %v7895_v11, %v7027_v36 }
 0x8de   : > { %3768 = vmax.xlane.f32.xlu1 %v3767_v29  ;;  %v7059_v29 = vpop.xlane.xlu0 %3362  ;;  %vm3614_vm2 = vcmask 7168   ;;  %v3699_v35 = vsel %vm3426_vm12, %v6618_v40, -1e+30  ;;  %v3700_v0 = vsel %vm3427_vm13, %v6621_v8, -1e+30  ;;  %vm3815_vm5 = vcmask 15368  }
 0x8df   : > { %3972 = vmax.xlane.f32.xlu0 %v3971_v33  ;;  %v7061_v33 = vpop.xlane.xlu1 %3365  ;;  %v3902_v53 = vsel %vm3428_vm10, %v6636_v6, -1e+30  ;;  %v3903_v31 = vsel %vm3429_vm11, %v6641_v44, -1e+30  ;;  %vm3432_vm3 = vcmp.le.f32.partialorder %v7897_v21, %v7059_v29  ;;  %v3785_v4 = vmax.f32 %v3699_v35, %v3700_v0  ;;  %v4354_v38 = vld [vmem:[%s7638_s10] sm:$0x7] }
 0x8e0   : > { %v3989_v41 = vmax.f32 %v3902_v53, %v3903_v31  ;;  %v3900_v13 = vsel %vm3426_vm12, %v6636_v6, -1e+30  ;;  %v3901_v30 = vsel %vm3427_vm13, %v6641_v44, -1e+30  ;;  %vm3431_vm15 = vcmp.le.f32.partialorder %v7910_v58, %v7027_v36 }
 0x8e1   : > { %v3504_v43 = vsel %vm3432_vm3, %v6609_v3, -1e+30  ;;  %v3986_v18 = vmax.f32 %v3900_v13, %v3901_v30  ;;  %v3705_v39 = vsel %vm3432_vm3, %v6618_v40, -1e+30  ;;  %v3906_v17 = vsel %vm3432_vm3, %v6636_v6, -1e+30 }
 0x8e2   : > { %3969 = vmax.xlane.f32.xlu1 %v3968_v51  ;;  %v3898_v51 = vsel %vm3424_vm0, %v6636_v6, -1e+30  ;;  %v7083_v12 = vpop.xlane.xlu0 %3368  ;;  %vm4016_vm0 = vcmask 23568   ;;  %vm3434_vm7 = vcmp.le.f32.partialorder %v7879_v42, %v7061_v33  ;;  %vm3435_vm10 = vcmp.le.f32.partialorder %v7880_v57, %v7061_v33 }
 0x8e3   : > { %3576 = vmax.xlane.f32.xlu0 %v3575_v5  ;;  %v3899_v5 = vsel %vm3425_vm1, %v6641_v44, -1e+30  ;;  %v7085_v23 = vpop.xlane.xlu1 %3371  ;;  %vm3436_vm1 = vcmp.le.f32.partialorder %v7881_v24, %v7083_v12  ;;  %vm3437_vm6 = vcmp.le.f32.partialorder %v7882_v20, %v7083_v12  ;;  %v3708_v13 = vsel %vm3435_vm10, %v6621_v8, -1e+30 }
 0x8e4   : > { %v3983_v14 = vmax.f32 %v3898_v51, %v3899_v5  ;;  %v3509_v11 = vsel %vm3437_vm6, %v6612_v59, -1e+30  ;;  %v3709_v35 = vsel %vm3436_vm1, %v6618_v40, -1e+30  ;;  %v3710_v0 = vsel %vm3437_vm6, %v6621_v8, -1e+30 }
 0x8e5   : > { %v3910_v30 = vsel %vm3436_vm1, %v6636_v6, -1e+30  ;;  %v3908_v20 = vsel %vm3434_vm7, %v6636_v6, -1e+30  ;;  %v3909_v12 = vsel %vm3435_vm10, %v6641_v44, -1e+30 }
 0x8e6   : > { %3573 = vmax.xlane.f32.xlu1 %v3572_v28  ;;  %v7121_v28 = vsel %vm3410_vm4, %v6636_v6, -1e+30  ;;  %v7149_v60 = vpop.xlane.xlu0 %3374  ;;  %vm3433_vm4 = vcmp.le.f32.partialorder %v7898_v25, %v7059_v29  ;;  %v3904_v25 = vsel %vm3430_vm14, %v6636_v6, -1e+30  ;;  %v3905_v29 = vsel %vm3431_vm15, %v6641_v44, -1e+30 }
 0x8e7   : > { %3777 = vmax.xlane.f32.xlu0 %v3776_v37  ;;  %v3980_v37 = vmax.f32 %v3896_v19, %v3897_v32  ;;  %v3962_v7 = vmax.f32 %v7121_v28, %v7127_v34  ;;  %v7151_v49 = vpop.xlane.xlu1 %3377  ;;  %v3505_v50 = vsel %vm3433_vm4, %v6612_v59, -1e+30  ;;  %v3706_v62 = vsel %vm3433_vm4, %v6621_v8, -1e+30 }
 0x8e8   : > { %v3593_v54 = vmax.f32 %v3504_v43, %v3505_v50  ;;  %v3703_v19 = vsel %vm3430_vm14, %v6618_v40, -1e+30  ;;  %v3704_v32 = vsel %vm3431_vm15, %v6621_v8, -1e+30  ;;  %v3907_v1 = vsel %vm3433_vm4, %v6641_v44, -1e+30 }
 0x8e9   : > { %v3791_v21 = vmax.f32 %v3703_v19, %v3704_v32  ;;  %v3911_v43 = vsel %vm3437_vm6, %v6641_v44, -1e+30  ;;  %vm3440_vm11 = vcmp.le.f32.partialorder %v5559_v16, %v7149_v60  ;;  %v7986_v50 = vld [vmem:[#allocation53_spill] sm:$0xff]  ;;  %vm7479_vm6 = vmpackc.low %vm622_vm9, %vm622_vm9 }
 0x8ea   : > { %3774 = vmax.xlane.f32.xlu1 %v3773_v47  ;;  %v3584_v47 = vmax.f32 %v3498_v2, %v3499_v22  ;;  %v3995_v2 = vmax.f32 %v3906_v17, %v3907_v1  ;;  %v3508_v22 = vsel %vm3436_vm1, %v6609_v3, -1e+30  ;;  %vm3441_vm12 = vcmp.le.f32.partialorder %v7986_v50, %v7149_v60 }
 0x8eb   : > { %3978 = vmax.xlane.f32.xlu0 %v3977_v10  ;;  %v3788_v10 = vmax.f32 %v3701_v46, %v3702_v61  ;;  %v3992_v46 = vmax.f32 %v3904_v25, %v3905_v29  ;;  %v3599_v61 = vmax.f32 %v3508_v22, %v3509_v11  ;;  %v3513_v42 = vsel %vm3441_vm12, %v6612_v59, -1e+30  ;;  %v7989_v25 = vld [vmem:[#allocation56_spill] sm:$0xff]  ;;  %v7990_v29 = vld [vmem:[#allocation57_spill] sm:$0xff] }
 0x8ee   : > { %3975 = vmax.xlane.f32.xlu1 %v3974_v52  ;;  %v7173_v52 = vpop.xlane.xlu0 %3380 }
 0x8ef   : > { %3582 = vmax.xlane.f32.xlu0 %v3581_v26  ;;  %vm3444_vm4 = vcmp.le.f32.partialorder %v7989_v25, %v7173_v52 }
 0x8f2   : > { %3579 = vmax.xlane.f32.xlu1 %v3578_v55  ;;  %v3502_v55 = vsel %vm3430_vm14, %v6609_v3, -1e+30  ;;  %vm3445_vm14 = vcmp.le.f32.partialorder %v7990_v29, %v7173_v52 }
 0x8f3   : > { %3783 = vmax.xlane.f32.xlu0 %v3782_v45  ;;  %v3503_v45 = vsel %vm3431_vm15, %v6612_v59, -1e+30 }
 0x8f6   : > { %3780 = vmax.xlane.f32.xlu1 %v3779_v15  ;;  %v3590_v15 = vmax.f32 %v3502_v55, %v3503_v45  ;;  %v7988_v55 = vld [vmem:[#allocation52_spill] sm:$0xff]  ;;  %v3512_v45 = vsel %vm3440_vm11, %v6609_v3, -1e+30 }
 0x8f7   : > { %3984 = vmax.xlane.f32.xlu0 %v3983_v14  ;;  %v3794_v14 = vmax.f32 %v3705_v39, %v3706_v62  ;;  %vm3439_vm3 = vcmp.le.f32.partialorder %v7988_v55, %v7085_v23  ;;  %v3998_v39 = vmax.f32 %v3908_v20, %v3909_v12  ;;  %v3605_v62 = vmax.f32 %v3512_v45, %v3513_v42 }
 0x8fa   : > { %3981 = vmax.xlane.f32.xlu1 %v3980_v37 }
 0x8fb   : > { %3588 = vmax.xlane.f32.xlu0 %v3587_v63 }
 0x8fe   : > { %3585 = vmax.xlane.f32.xlu1 %v3584_v47  ;;  %v3506_v47 = vsel %vm3434_vm7, %v6609_v3, -1e+30 }
 0x8ff   : > { %3789 = vmax.xlane.f32.xlu0 %v3788_v10  ;;  %v3520_v26 = vpop.xlane.xlu1 %3519  ;;  %v3507_v10 = vsel %vm3435_vm10, %v6612_v59, -1e+30 }
 0x900   : > { %3615 = vst.msk [vmem:[#allocation2] sm:$0xff] %vm3614_vm2, %v3520_v26  ;;  %v3596_v26 = vmax.f32 %v3506_v47, %v3507_v10  ;;  %v3516_v47 = vsel %vm3444_vm4, %v6609_v3, -1e+30  ;;  %v3517_v10 = vsel %vm3445_vm14, %v6612_v59, -1e+30 }
 0x902   : > { %3786 = vmax.xlane.f32.xlu1 %v3785_v4  ;;  %v3800_v4 = vmax.f32 %v3709_v35, %v3710_v0 }
 0x903   : > { %3990 = vmax.xlane.f32.xlu0 %v3989_v41  ;;  %v3721_v48 = vpop.xlane.xlu1 %3720  ;;  %v3523_v56 = vpop.xlane.xlu0 %3522  ;;  %v3707_v41 = vsel %vm3434_vm7, %v6618_v40, -1e+30 }
 0x904   : > { %3816 = vst.msk [vmem:[#allocation2] sm:$0xff] %vm3815_vm5, %v3721_v48  ;;  %v3797_v24 = vmax.f32 %v3707_v41, %v3708_v13  ;;  %v3718_v41 = vsel %vm3445_vm14, %v6621_v8, -1e+30 }
 0x905   : > { %3616 = vst.msk [vmem:[#allocation2 + $0x8] sm:$0xff] %vm3614_vm2, %v3523_v56 }
 0x906   : > { %3987 = vmax.xlane.f32.xlu1 %v3986_v18  ;;  %v4001_v18 = vmax.f32 %v3910_v30, %v3911_v43 }
 0x907   : > { %3594 = vmax.xlane.f32.xlu0 %v3593_v54  ;;  %v3922_v51 = vpop.xlane.xlu1 %3921  ;;  %v3724_v5 = vpop.xlane.xlu0 %3723  ;;  %v7987_v54 = vld [vmem:[#allocation51_spill] sm:$0xff] }
 0x908   : > { %4017 = vst.msk [vmem:[#allocation2] sm:$0xff] %vm4016_vm0, %v3922_v51  ;;  %vm3438_vm13 = vcmp.le.f32.partialorder %v7987_v54, %v7085_v23 }
 0x909   : > { %3817 = vst.msk [vmem:[#allocation2 + $0x8] sm:$0xff] %vm3815_vm5, %v3724_v5  ;;  %v3510_v51 = vsel %vm3438_vm13, %v6609_v3, -1e+30  ;;  %v3511_v5 = vsel %vm3439_vm3, %v6612_v59, -1e+30 }
 0x90a   : > { %3591 = vmax.xlane.f32.xlu1 %v3590_v15  ;;  %v3713_v15 = vsel %vm3440_vm11, %v6618_v40, -1e+30  ;;  %v3602_v17 = vmax.f32 %v3510_v51, %v3511_v5  ;;  %v3912_v60 = vsel %vm3438_vm13, %v6636_v6, -1e+30 }
 0x90b   : > { %3795 = vmax.xlane.f32.xlu0 %v3794_v14  ;;  %v3526_v37 = vpop.xlane.xlu1 %3525  ;;  %v3925_v63 = vpop.xlane.xlu0 %3924  ;;  %v3714_v14 = vsel %vm3441_vm12, %v6621_v8, -1e+30 }
 0x90c   : > { %3617 = vst.msk [vmem:[#allocation2 + $0x10] sm:$0xff] %vm3614_vm2, %v3526_v37  ;;  %v3806_v1 = vmax.f32 %v3713_v15, %v3714_v14  ;;  %v3711_v37 = vsel %vm3438_vm13, %v6618_v40, -1e+30 }
 0x90d   : > { %4018 = vst.msk [vmem:[#allocation2 + $0x8] sm:$0xff] %vm4016_vm0, %v3925_v63  ;;  %v3712_v63 = vsel %vm3439_vm3, %v6621_v8, -1e+30 }
 0x90e   : > { %3792 = vmax.xlane.f32.xlu1 %v3791_v21  ;;  %v3914_v21 = vsel %vm3440_vm11, %v6636_v6, -1e+30  ;;  %v3803_v16 = vmax.f32 %v3711_v37, %v3712_v63 }
 0x90f   : > { %3996 = vmax.xlane.f32.xlu0 %v3995_v2  ;;  %v3727_v58 = vpop.xlane.xlu1 %3726  ;;  %v3529_v36 = vpop.xlane.xlu0 %3528  ;;  %v3915_v2 = vsel %vm3441_vm12, %v6641_v44, -1e+30 }
 0x910   : > { %3818 = vst.msk [vmem:[#allocation2 + $0x10] sm:$0xff] %vm3815_vm5, %v3727_v58  ;;  %v4007_v58 = vmax.f32 %v3914_v21, %v3915_v2 }
 0x911   : > { %3618 = vst.msk [vmem:[#allocation2 + $0x18] sm:$0xff] %vm3614_vm2, %v3529_v36  ;;  %v3913_v36 = vsel %vm3439_vm3, %v6641_v44, -1e+30 }
 0x912   : > { %3993 = vmax.xlane.f32.xlu1 %v3992_v46  ;;  %v7991_v46 = vld [vmem:[#allocation54_spill] sm:$0xff]  ;;  %v4004_v0 = vmax.f32 %v3912_v60, %v3913_v36 }
 0x913   : > { %3600 = vmax.xlane.f32.xlu0 %v3599_v61  ;;  %v3928_v53 = vpop.xlane.xlu1 %3927  ;;  %v3730_v31 = vpop.xlane.xlu0 %3729  ;;  %vm3442_vm15 = vcmp.le.f32.partialorder %v7991_v46, %v7151_v49  ;;  %v7992_v61 = vld [vmem:[#allocation55_spill] sm:$0xff] }
 0x914   : > { %4019 = vst.msk [vmem:[#allocation2 + $0x10] sm:$0xff] %vm4016_vm0, %v3928_v53  ;;  %vm3443_vm1 = vcmp.le.f32.partialorder %v7992_v61, %v7151_v49  ;;  %v3611_v53 = vmax.f32 %v3516_v47, %v3517_v10  ;;  %v3715_v43 = vsel %vm3442_vm15, %v6618_v40, -1e+30  ;;  %v3916_v20 = vsel %vm3442_vm15, %v6636_v6, -1e+30  ;;  %v4049_v10 = vld [vmem:[#allocation2] sm:$0xff] }
 0x915   : > { %3819 = vst.msk [vmem:[#allocation2 + $0x18] sm:$0xff] %vm3815_vm5, %v3730_v31  ;;  %v3514_v31 = vsel %vm3442_vm15, %v6609_v3, -1e+30  ;;  %v3716_v50 = vsel %vm3443_vm1, %v6621_v8, -1e+30 }
 0x916   : > { %3597 = vmax.xlane.f32.xlu1 %v3596_v26  ;;  %v3515_v26 = vsel %vm3443_vm1, %v6612_v59, -1e+30  ;;  %v3917_v52 = vsel %vm3443_vm1, %v6641_v44, -1e+30 }
 0x917   : > { %3801 = vmax.xlane.f32.xlu0 %v3800_v4  ;;  %v3532_v48 = vpop.xlane.xlu1 %3531  ;;  %v3931_v56 = vpop.xlane.xlu0 %3930  ;;  %v3717_v4 = vsel %vm3444_vm4, %v6618_v40, -1e+30  ;;  %v3608_v3 = vmax.f32 %v3514_v31, %v3515_v26  ;;  %v3809_v40 = vmax.f32 %v3715_v43, %v3716_v50  ;;  %v4010_v55 = vmax.f32 %v3916_v20, %v3917_v52 }
 0x918   : > { %3619 = vst.msk [vmem:[#allocation2 + $0x20] sm:$0xff] %vm3614_vm2, %v3532_v48  ;;  %v3812_v59 = vmax.f32 %v3717_v4, %v3718_v41  ;;  %v3918_v48 = vsel %vm3444_vm4, %v6636_v6, -1e+30 }
 0x919   : > { %4020 = vst.msk [vmem:[#allocation2 + $0x18] sm:$0xff] %vm4016_vm0, %v3931_v56  ;;  %v3919_v56 = vsel %vm3445_vm14, %v6641_v44, -1e+30 }
 0x91a   : > { %3798 = vmax.xlane.f32.xlu1 %v3797_v24  ;;  %v4013_v8 = vmax.f32 %v3918_v48, %v3919_v56 }
 0x91b   : > { %4002 = vmax.xlane.f32.xlu0 %v4001_v18  ;;  %v3733_v57 = vpop.xlane.xlu1 %3732  ;;  %v3535_v33 = vpop.xlane.xlu0 %3534 }
 0x91c   : > { %3820 = vst.msk [vmem:[#allocation2 + $0x20] sm:$0xff] %vm3815_vm5, %v3733_v57 }
 0x91d   : > { %3620 = vst.msk [vmem:[#allocation2 + $0x28] sm:$0xff] %vm3614_vm2, %v3535_v33 }
 0x91e   : > { %3999 = vmax.xlane.f32.xlu1 %v3998_v39  ;;  %v7455_v39 = vld [vmem:[%s7635_s7] sm:$0x3f] }
 0x91f   : > { %3606 = vmax.xlane.f32.xlu0 %v3605_v62  ;;  %v3934_v19 = vpop.xlane.xlu1 %3933  ;;  %v3736_v32 = vpop.xlane.xlu0 %3735  ;;  %4658 = vmatprep.mubr.msk.f32.mxu1 %vm622_vm9, %v7455_v39 }
 0x920   : > { %4021 = vst.msk [vmem:[#allocation2 + $0x20] sm:$0xff] %vm4016_vm0, %v3934_v19  ;;  %v4052_v26 = vld [vmem:[#allocation2 + $0x18] sm:$0xff] }
 0x921   : > { %3821 = vst.msk [vmem:[#allocation2 + $0x28] sm:$0xff] %vm3815_vm5, %v3736_v32 }
 0x922   : > { %3603 = vmax.xlane.f32.xlu1 %v3602_v17 }
 0x923   : > { %3807 = vmax.xlane.f32.xlu0 %v3806_v1  ;;  %v3538_v22 = vpop.xlane.xlu1 %3537  ;;  %v3937_v11 = vpop.xlane.xlu0 %3936 }
 0x924   : > { %3621 = vst.msk [vmem:[#allocation2 + $0x30] sm:$0xff] %vm3614_vm2, %v3538_v22 }
 0x925   : > { %4022 = vst.msk [vmem:[#allocation2 + $0x28] sm:$0xff] %vm4016_vm0, %v3937_v11 }
 0x926   : > { %3804 = vmax.xlane.f32.xlu1 %v3803_v16  ;;  %v4050_v16 = vld [vmem:[#allocation2 + $0x8] sm:$0xff] }
 0x927   : > { %4008 = vmax.xlane.f32.xlu0 %v4007_v58  ;;  %v3739_v23 = vpop.xlane.xlu1 %3738  ;;  %v3541_v35 = vpop.xlane.xlu0 %3540 }
 0x928   : > { %3822 = vst.msk [vmem:[#allocation2 + $0x30] sm:$0xff] %vm3815_vm5, %v3739_v23  ;;  %v4663_v23 = vpack.c.bf16 %v4050_v16, %v4049_v10 }
 0x929   : > { %3622 = vst.msk [vmem:[#allocation2 + $0x38] sm:$0xff] %vm3614_vm2, %v3541_v35 }
 0x92a   : > { %4005 = vmax.xlane.f32.xlu1 %v4004_v0 }
 0x92b   : > { %3612 = vmax.xlane.f32.xlu0 %v3611_v53  ;;  %v3940_v13 = vpop.xlane.xlu1 %3939  ;;  %v3742_v30 = vpop.xlane.xlu0 %3741 }
 0x92c   : > { %4023 = vst.msk [vmem:[#allocation2 + $0x30] sm:$0xff] %vm4016_vm0, %v3940_v13 }
 0x92d   : > { %3823 = vst.msk [vmem:[#allocation2 + $0x38] sm:$0xff] %vm3815_vm5, %v3742_v30 }
 0x92e   : > { %3609 = vmax.xlane.f32.xlu1 %v3608_v3 }
 0x92f   : > { %3813 = vmax.xlane.f32.xlu0 %v3812_v59  ;;  %v3544_v24 = vpop.xlane.xlu1 %3543  ;;  %v3943_v18 = vpop.xlane.xlu0 %3942  ;;  %v4051_v59 = vld [vmem:[#allocation2 + $0x10] sm:$0xff] }
 0x930   : > { %3623 = vst.msk [vmem:[#allocation2 + $0x40] sm:$0xff] %vm3614_vm2, %v3544_v24  ;;  %v4669_v43 = vpack.c.bf16 %v4052_v26, %v4051_v59 }
 0x931   : > { %4024 = vst.msk [vmem:[#allocation2 + $0x38] sm:$0xff] %vm4016_vm0, %v3943_v18  ;;  %v4054_v18 = vld [vmem:[#allocation2 + $0x28] sm:$0xff] }
 0x932   : > { %3810 = vmax.xlane.f32.xlu1 %v3809_v40 }
 0x933   : > { %4014 = vmax.xlane.f32.xlu0 %v4013_v8  ;;  %v3745_v12 = vpop.xlane.xlu1 %3744  ;;  %v3547_v54 = vpop.xlane.xlu0 %3546 }
 0x934   : > { %3824 = vst.msk [vmem:[#allocation2 + $0x40] sm:$0xff] %vm3815_vm5, %v3745_v12 }
 0x935   : > { %3624 = vst.msk [vmem:[#allocation2 + $0x48] sm:$0xff] %vm3614_vm2, %v3547_v54  ;;  %v4053_v54 = vld [vmem:[#allocation2 + $0x20] sm:$0xff] }
 0x936   : > { %4011 = vmax.xlane.f32.xlu1 %v4010_v55  ;;  %v4675_v55 = vpack.c.bf16 %v4054_v18, %v4053_v54  ;;  %v4081_v54 = vld [vmem:[%s7634_s6] sm:$0x3f] }
 0x937   : > { %3966 = vmax.xlane.f32.xlu0 %v3965_v9  ;;  %v3946_v6 = vpop.xlane.xlu1 %3945  ;;  %v3748_v45 = vpop.xlane.xlu0 %3747 }
 0x938   : > { %4025 = vst.msk [vmem:[#allocation2 + $0x40] sm:$0xff] %vm4016_vm0, %v3946_v6 }
 0x939   : > { %3825 = vst.msk [vmem:[#allocation2 + $0x48] sm:$0xff] %vm3815_vm5, %v3748_v45 }
 0x93a   : > { %3963 = vmax.xlane.f32.xlu1 %v3962_v7 }
 0x93b   : > { %v3949_v44 = vpop.xlane.xlu0 %3948 }
 0x93c   : > { %4026 = vst.msk [vmem:[#allocation2 + $0x48] sm:$0xff] %vm4016_vm0, %v3949_v44 }
 0x943   : > { %v3553_v49 = vpop.xlane.xlu0 %3552 }
 0x944   : > { %3626 = vst.msk [vmem:[#allocation2 + $0x58] sm:$0xff] %vm3614_vm2, %v3553_v49 }
 0x947   : > { %v3550_v42 = vpop.xlane.xlu1 %3549  ;;  %v3754_v57 = vpop.xlane.xlu0 %3753 }
 0x948   : > { %3625 = vst.msk [vmem:[#allocation2 + $0x50] sm:$0xff] %vm3614_vm2, %v3550_v42  ;;  %v4056_v42 = vld [vmem:[#allocation2 + $0x38] sm:$0xff] }
 0x949   : > { %3827 = vst.msk [vmem:[#allocation2 + $0x58] sm:$0xff] %vm3815_vm5, %v3754_v57 }
 0x94b   : > { %4330 = vperm.xlu1 %4761, %v4327_v27   ;;  %v3751_v28 = vpop.xlane.xlu1 %3750  ;;  %v3955_v34 = vpop.xlane.xlu0 %3954 }
 0x94c   : > { %3826 = vst.msk [vmem:[#allocation2 + $0x50] sm:$0xff] %vm3815_vm5, %v3751_v28 }
 0x94d   : > { %4028 = vst.msk [vmem:[#allocation2 + $0x58] sm:$0xff] %vm4016_vm0, %v3955_v34  ;;  %4357 = vperm.xlu0 %4760, %v4354_v38  }
 0x94f   : > { %v3952_v9 = vpop.xlane.xlu1 %3951 }
 0x950   : > { %4027 = vst.msk [vmem:[#allocation2 + $0x50] sm:$0xff] %vm4016_vm0, %v3952_v9  ;;  %v3559_v7 = vpop.xlane.xlu0 %3558  ;;  %v4055_v9 = vld [vmem:[#allocation2 + $0x30] sm:$0xff] }
 0x951   : > { %3628 = vst.msk [vmem:[#allocation2 + $0x68] sm:$0xff] %vm3614_vm2, %v3559_v7  ;;  %v4681_v7 = vpack.c.bf16 %v4056_v42, %v4055_v9 }
 0x953   : > { %v3556_v33 = vpop.xlane.xlu1 %3555 }
 0x954   : > { %3627 = vst.msk [vmem:[#allocation2 + $0x60] sm:$0xff] %vm3614_vm2, %v3556_v33  ;;  %v3760_v62 = vpop.xlane.xlu0 %3759 }
 0x955   : > { %3829 = vst.msk [vmem:[#allocation2 + $0x68] sm:$0xff] %vm3815_vm5, %v3760_v62 }
 0x957   : > { %v3757_v51 = vpop.xlane.xlu1 %3756 }
 0x958   : > { %3828 = vst.msk [vmem:[#allocation2 + $0x60] sm:$0xff] %vm3815_vm5, %v3757_v51  ;;  %v3961_v5 = vpop.xlane.xlu0 %3960 }
 0x959   : > { %4030 = vst.msk [vmem:[#allocation2 + $0x68] sm:$0xff] %vm4016_vm0, %v3961_v5 }
 0x95b   : > { %v3958_v15 = vpop.xlane.xlu1 %3957 }
 0x95c   : > { %4029 = vst.msk [vmem:[#allocation2 + $0x60] sm:$0xff] %vm4016_vm0, %v3958_v15  ;;  %v3565_v14 = vpop.xlane.xlu0 %3564  ;;  %v4058_v15 = vld [vmem:[#allocation2 + $0x48] sm:$0xff] }
 0x95d   : > { %3630 = vst.msk [vmem:[#allocation2 + $0x78] sm:$0xff] %vm3614_vm2, %v3565_v14 }
 0x95f   : > { %v3562_v19 = vpop.xlane.xlu1 %3561 }
 0x960   : > { %3629 = vst.msk [vmem:[#allocation2 + $0x70] sm:$0xff] %vm3614_vm2, %v3562_v19  ;;  %v3766_v32 = vpop.xlane.xlu0 %3765 }
 0x961   : > { %3831 = vst.msk [vmem:[#allocation2 + $0x78] sm:$0xff] %vm3815_vm5, %v3766_v32 }
 0x963   : > { %v3763_v17 = vpop.xlane.xlu1 %3762 }
 0x964   : > { %3830 = vst.msk [vmem:[#allocation2 + $0x70] sm:$0xff] %vm3815_vm5, %v3763_v17  ;;  %v3571_v1 = vpop.xlane.xlu0 %3570 }
 0x965   : > { %3632 = vst.msk [vmem:[#allocation2 + $0x88] sm:$0xff] %vm3614_vm2, %v3571_v1 }
 0x967   : > { %v3568_v37 = vpop.xlane.xlu1 %3567 }
 0x968   : > { %3631 = vst.msk [vmem:[#allocation2 + $0x80] sm:$0xff] %vm3614_vm2, %v3568_v37  ;;  %v3772_v63 = vpop.xlane.xlu0 %3771  ;;  %v4057_v37 = vld [vmem:[#allocation2 + $0x40] sm:$0xff] }
 0x969   : > { %3833 = vst.msk [vmem:[#allocation2 + $0x88] sm:$0xff] %vm3815_vm5, %v3772_v63  ;;  %v4687_v63 = vpack.c.bf16 %v4058_v15, %v4057_v37 }
 0x96b   : > { %v3769_v21 = vpop.xlane.xlu1 %3768 }
 0x96c   : > { %3832 = vst.msk [vmem:[#allocation2 + $0x80] sm:$0xff] %vm3815_vm5, %v3769_v21  ;;  %v3973_v2 = vpop.xlane.xlu0 %3972 }
 0x96d   : > { %4034 = vst.msk [vmem:[#allocation2 + $0x88] sm:$0xff] %vm4016_vm0, %v3973_v2 }
 0x96f   : > { %v3970_v25 = vpop.xlane.xlu1 %3969 }
 0x970   : > { %4033 = vst.msk [vmem:[#allocation2 + $0x80] sm:$0xff] %vm4016_vm0, %v3970_v25  ;;  %v3577_v29 = vpop.xlane.xlu0 %3576 }
 0x971   : > { %3634 = vst.msk [vmem:[#allocation2 + $0x98] sm:$0xff] %vm3614_vm2, %v3577_v29 }
 0x973   : > { %v3574_v22 = vpop.xlane.xlu1 %3573 }
 0x974   : > { %3633 = vst.msk [vmem:[#allocation2 + $0x90] sm:$0xff] %vm3614_vm2, %v3574_v22  ;;  %v3778_v11 = vpop.xlane.xlu0 %3777  ;;  %v4066_v36 = vld [vmem:[#allocation2 + $0x88] sm:$0xff]  ;;  %v4059_v22 = vld [vmem:[#allocation2 + $0x50] sm:$0xff] }
 0x975   : > { %3835 = vst.msk [vmem:[#allocation2 + $0x98] sm:$0xff] %vm3815_vm5, %v3778_v11 }
 0x977   : > { %v3775_v58 = vpop.xlane.xlu1 %3774  ;;  %v4065_v60 = vld [vmem:[#allocation2 + $0x80] sm:$0xff] }
 0x978   : > { %3834 = vst.msk [vmem:[#allocation2 + $0x90] sm:$0xff] %vm3815_vm5, %v3775_v58  ;;  %v3979_v61 = vpop.xlane.xlu0 %3978  ;;  %v4660_v47 = vpack.c.bf16 %v4066_v36, %v4065_v60 }
 0x979   : > { %4036 = vst.msk [vmem:[#allocation2 + $0x98] sm:$0xff] %vm4016_vm0, %v3979_v61  ;;  %v4060_v61 = vld [vmem:[#allocation2 + $0x58] sm:$0xff] }
 0x97a   : > { %4662 = vmatprep.subr.msk.bf16.mxu1 %vm7479_vm6, %v4660_v47  ;;  %v4693_v47 = vpack.c.bf16 %v4060_v61, %v4059_v22  ;;  %v7999_v22 = vld [vmem:[#allocation8_spill] sm:$0xff] }
 0x97b   : > { %v3976_v35 = vpop.xlane.xlu1 %3975  ;;  %4665 = vmatpush3.bf16.xpose.msk.msra.mxu1 %vm7479_vm6, %v4663_v23 }
 0x97c   : > { %4035 = vst.msk [vmem:[#allocation2 + $0x90] sm:$0xff] %vm4016_vm0, %v3976_v35  ;;  %v3583_v0 = vpop.xlane.xlu0 %3582 }
 0x97d   : > { %3636 = vst.msk [vmem:[#allocation2 + $0xa8] sm:$0xff] %vm3614_vm2, %v3583_v0 }
 0x97f   : > { %v3580_v53 = vpop.xlane.xlu1 %3579 }
 0x980   : > { %3635 = vst.msk [vmem:[#allocation2 + $0xa0] sm:$0xff] %vm3614_vm2, %v3580_v53  ;;  %v3784_v31 = vpop.xlane.xlu0 %3783  ;;  %v4068_v13 = vld [vmem:[#allocation2 + $0x98] sm:$0xff]  ;;  %v4061_v53 = vld [vmem:[#allocation2 + $0x60] sm:$0xff] }
 0x981   : > { %3837 = vst.msk [vmem:[#allocation2 + $0xa8] sm:$0xff] %vm3815_vm5, %v3784_v31 }
 0x983   : > { %v3781_v4 = vpop.xlane.xlu1 %3780  ;;  %v4067_v41 = vld [vmem:[#allocation2 + $0x90] sm:$0xff] }
 0x984   : > { %3836 = vst.msk [vmem:[#allocation2 + $0xa0] sm:$0xff] %vm3815_vm5, %v3781_v4  ;;  %v3985_v30 = vpop.xlane.xlu0 %3984  ;;  %v4666_v3 = vpack.c.bf16 %v4068_v13, %v4067_v41 }
 0x985   : > { %4038 = vst.msk [vmem:[#allocation2 + $0xa8] sm:$0xff] %vm4016_vm0, %v3985_v30  ;;  %v4062_v30 = vld [vmem:[#allocation2 + $0x68] sm:$0xff] }
 0x986   : > { %4668 = vmatprep.subr.msk.bf16.mxu1 %vm7479_vm6, %v4666_v3  ;;  %v4699_v3 = vpack.c.bf16 %v4062_v30, %v4061_v53 }
 0x987   : > { %v3982_v50 = vpop.xlane.xlu1 %3981  ;;  %4671 = vmatpush3.bf16.xpose.msk.msra.mxu1 %vm7479_vm6, %v4669_v43 }
 0x988   : > { %4037 = vst.msk [vmem:[#allocation2 + $0xa0] sm:$0xff] %vm4016_vm0, %v3982_v50  ;;  %v3589_v48 = vpop.xlane.xlu0 %3588 }
 0x989   : > { %3638 = vst.msk [vmem:[#allocation2 + $0xb8] sm:$0xff] %vm3614_vm2, %v3589_v48 }
 0x98b   : > { %v3586_v56 = vpop.xlane.xlu1 %3585 }
 0x98c   : > { %3637 = vst.msk [vmem:[#allocation2 + $0xb0] sm:$0xff] %vm3614_vm2, %v3586_v56  ;;  %v3790_v24 = vpop.xlane.xlu0 %3789  ;;  %v4070_v20 = vld [vmem:[#allocation2 + $0xa8] sm:$0xff] }
 0x98d   : > { %3839 = vst.msk [vmem:[#allocation2 + $0xb8] sm:$0xff] %vm3815_vm5, %v3790_v24 }
 0x98f   : > { %v3787_v40 = vpop.xlane.xlu1 %3786  ;;  %v4069_v8 = vld [vmem:[#allocation2 + $0xa0] sm:$0xff] }
 0x990   : > { %3838 = vst.msk [vmem:[#allocation2 + $0xb0] sm:$0xff] %vm3815_vm5, %v3787_v40  ;;  %v3991_v52 = vpop.xlane.xlu0 %3990  ;;  %v4672_v12 = vpack.c.bf16 %v4070_v20, %v4069_v8  ;;  %v7995_v20 = vld [vmem:[#allocation9_spill] sm:$0xff] }
 0x991   : > { %4040 = vst.msk [vmem:[#allocation2 + $0xb8] sm:$0xff] %vm4016_vm0, %v3991_v52  ;;  %v7996_v52 = vld [vmem:[#allocation10_spill] sm:$0xff] }
 0x992   : > { %4674 = vmatprep.subr.msk.bf16.mxu1 %vm7479_vm6, %v4672_v12  ;;  %v7997_v12 = vmov 0.0  }
 0x993   : > { %v3988_v6 = vpop.xlane.xlu1 %3987  ;;  %4677 = vmatpush3.bf16.xpose.msk.msra.mxu1 %vm7479_vm6, %v4675_v55 }
 0x994   : > { %4039 = vst.msk [vmem:[#allocation2 + $0xb0] sm:$0xff] %vm4016_vm0, %v3988_v6  ;;  %v3595_v45 = vpop.xlane.xlu0 %3594 }
 0x995   : > { %3640 = vst.msk [vmem:[#allocation2 + $0xc8] sm:$0xff] %vm3614_vm2, %v3595_v45 }
 0x997   : > { %v3592_v44 = vpop.xlane.xlu1 %3591 }
 0x998   : > { %3639 = vst.msk [vmem:[#allocation2 + $0xc0] sm:$0xff] %vm3614_vm2, %v3592_v44  ;;  %v3796_v49 = vpop.xlane.xlu0 %3795  ;;  %v4072_v38 = vld [vmem:[#allocation2 + $0xb8] sm:$0xff] }
 0x999   : > { %3841 = vst.msk [vmem:[#allocation2 + $0xc8] sm:$0xff] %vm3815_vm5, %v3796_v49 }
 0x99b   : > { %v3793_v57 = vpop.xlane.xlu1 %3792  ;;  %v4071_v27 = vld [vmem:[#allocation2 + $0xb0] sm:$0xff] }
 0x99c   : > { %3840 = vst.msk [vmem:[#allocation2 + $0xc0] sm:$0xff] %vm3815_vm5, %v3793_v57  ;;  %v3997_v28 = vpop.xlane.xlu0 %3996  ;;  %v4678_v34 = vpack.c.bf16 %v4072_v38, %v4071_v27 }
 0x99d   : > { %4042 = vst.msk [vmem:[#allocation2 + $0xc8] sm:$0xff] %vm4016_vm0, %v3997_v28 }
 0x99e   : > { %4680 = vmatprep.subr.msk.bf16.mxu1 %vm7479_vm6, %v4678_v34 }
 0x99f   : > { %v3994_v33 = vpop.xlane.xlu1 %3993  ;;  %4683 = vmatpush3.bf16.xpose.msk.msra.mxu1 %vm7479_vm6, %v4681_v7 }
 0x9a0   : > { %4041 = vst.msk [vmem:[#allocation2 + $0xc0] sm:$0xff] %vm4016_vm0, %v3994_v33  ;;  %v3601_v62 = vpop.xlane.xlu0 %3600 }
 0x9a1   : > { %3642 = vst.msk [vmem:[#allocation2 + $0xd8] sm:$0xff] %vm3614_vm2, %v3601_v62 }
 0x9a3   : > { %v3598_v51 = vpop.xlane.xlu1 %3597 }
 0x9a4   : > { %3641 = vst.msk [vmem:[#allocation2 + $0xd0] sm:$0xff] %vm3614_vm2, %v3598_v51  ;;  %v3802_v5 = vpop.xlane.xlu0 %3801  ;;  %v4074_v32 = vld [vmem:[#allocation2 + $0xc8] sm:$0xff] }
 0x9a5   : > { %3843 = vst.msk [vmem:[#allocation2 + $0xd8] sm:$0xff] %vm3815_vm5, %v3802_v5 }
 0x9a7   : > { %v3799_v14 = vpop.xlane.xlu1 %3798  ;;  %v4073_v19 = vld [vmem:[#allocation2 + $0xc0] sm:$0xff] }
 0x9a8   : > { %3842 = vst.msk [vmem:[#allocation2 + $0xd0] sm:$0xff] %vm3815_vm5, %v3799_v14  ;;  %v4003_v17 = vpop.xlane.xlu0 %4002  ;;  %v4684_v1 = vpack.c.bf16 %v4074_v32, %v4073_v19 }
 0x9a9   : > { %4044 = vst.msk [vmem:[#allocation2 + $0xd8] sm:$0xff] %vm4016_vm0, %v4003_v17  ;;  %v4353_v17 = vld [vmem:[%s7637_s9] sm:$0x7] }
 0x9aa   : > { %4686 = vmatprep.subr.msk.bf16.mxu1 %vm7479_vm6, %v4684_v1 }
 0x9ab   : > { %v4000_v21 = vpop.xlane.xlu1 %3999  ;;  %4689 = vmatpush3.bf16.xpose.msk.msra.mxu1 %vm7479_vm6, %v4687_v63 }
 0x9ac   : > { %4043 = vst.msk [vmem:[#allocation2 + $0xd0] sm:$0xff] %vm4016_vm0, %v4000_v21  ;;  %v3607_v2 = vpop.xlane.xlu0 %3606 }
 0x9ad   : > { %3644 = vst.msk [vmem:[#allocation2 + $0xe8] sm:$0xff] %vm3614_vm2, %v3607_v2 }
 0x9af   : > { %v3604_v25 = vpop.xlane.xlu1 %3603 }
 0x9b0   : > { %3643 = vst.msk [vmem:[#allocation2 + $0xe0] sm:$0xff] %vm3614_vm2, %v3604_v25  ;;  %v3808_v29 = vpop.xlane.xlu0 %3807  ;;  %v4076_v58 = vld [vmem:[#allocation2 + $0xd8] sm:$0xff]  ;;  %v7998_v25 = vld [vmem:[#allocation7_spill] sm:$0xff] }
 0x9b1   : > { %3845 = vst.msk [vmem:[#allocation2 + $0xe8] sm:$0xff] %vm3815_vm5, %v3808_v29 }
 0x9b3   : > { %v3805_v11 = vpop.xlane.xlu1 %3804  ;;  %v4075_v16 = vld [vmem:[#allocation2 + $0xd0] sm:$0xff] }
 0x9b4   : > { %3844 = vst.msk [vmem:[#allocation2 + $0xe0] sm:$0xff] %vm3815_vm5, %v3805_v11  ;;  %v4009_v60 = vpop.xlane.xlu0 %4008  ;;  %v4690_v36 = vpack.c.bf16 %v4076_v58, %v4075_v16 }
 0x9b5   : > { %4046 = vst.msk [vmem:[#allocation2 + $0xe8] sm:$0xff] %vm4016_vm0, %v4009_v60 }
 0x9b6   : > { %4692 = vmatprep.subr.msk.bf16.mxu1 %vm7479_vm6, %v4690_v36  ;;  %v4452_v36 = vld [vmem:[%s7639_s11] sm:$0x7] }
 0x9b7   : > { %v4006_v10 = vpop.xlane.xlu1 %4005  ;;  %4695 = vmatpush3.bf16.xpose.msk.msra.mxu1 %vm7479_vm6, %v4693_v47 }
 0x9b8   : > { %4045 = vst.msk [vmem:[#allocation2 + $0xe0] sm:$0xff] %vm4016_vm0, %v4006_v10  ;;  %v3613_v23 = vpop.xlane.xlu0 %3612 }
 0x9b9   : > { %3646 = vst.msk [vmem:[#allocation2 + $0xf8] sm:$0xff] %vm3614_vm2, %v3613_v23 }
 0x9bb   : > { %v3610_v35 = vpop.xlane.xlu1 %3609 }
 0x9bc   : > { %3645 = vst.msk [vmem:[#allocation2 + $0xf0] sm:$0xff] %vm3614_vm2, %v3610_v35  ;;  %v3814_v0 = vpop.xlane.xlu0 %3813  ;;  %v4078_v4 = vld [vmem:[#allocation2 + $0xe8] sm:$0xff]  ;;  %vm4360_vm2 = vcmask 48128  }
 0x9bd   : > { %3847 = vst.msk [vmem:[#allocation2 + $0xf8] sm:$0xff] %vm3815_vm5, %v3814_v0 }
 0x9bf   : > { %v3811_v31 = vpop.xlane.xlu1 %3810  ;;  %v4077_v26 = vld [vmem:[#allocation2 + $0xe0] sm:$0xff] }
 0x9c0   : > { %3846 = vst.msk [vmem:[#allocation2 + $0xf0] sm:$0xff] %vm3815_vm5, %v3811_v31  ;;  %v4015_v41 = vpop.xlane.xlu0 %4014  ;;  %v4696_v13 = vpack.c.bf16 %v4078_v4, %v4077_v26  ;;  %v4461_v4 = vld [vmem:[%s7640_s12] sm:$0x1] }
 0x9c1   : > { %4048 = vst.msk [vmem:[#allocation2 + $0xf8] sm:$0xff] %vm4016_vm0, %v4015_v41 }
 0x9c2   : > { %4698 = vmatprep.subr.msk.bf16.mxu1 %vm7479_vm6, %v4696_v13 }
 0x9c3   : > { %v4012_v59 = vpop.xlane.xlu1 %4011  ;;  %4701 = vmatpush3.bf16.xpose.msk.msra.mxu1 %vm7479_vm6, %v4699_v3 }
 0x9c4   : > { %4047 = vst.msk [vmem:[#allocation2 + $0xf0] sm:$0xff] %vm4016_vm0, %v4012_v59  ;;  %v3967_v43 = vpop.xlane.xlu0 %3966 }
 0x9c5   : > { %4032 = vst.msk [vmem:[#allocation2 + $0x78] sm:$0xff] %vm4016_vm0, %v3967_v43 }
 0x9c7   : > { %v3964_v50 = vpop.xlane.xlu1 %3963 }
 0x9c8   : > { %4031 = vst.msk [vmem:[#allocation2 + $0x70] sm:$0xff] %vm4016_vm0, %v3964_v50  ;;  %v4080_v56 = vld [vmem:[#allocation2 + $0xf8] sm:$0xff] }
 0x9cb   : > { %v4079_v48 = vld [vmem:[#allocation2 + $0xf0] sm:$0xff]  ;;  %v4331_v55 = vpop.permute.xlu1 %4330 }
 0x9cc   : > { %v4702_v24 = vpack.c.bf16 %v4080_v56, %v4079_v48  ;;  %v4064_v40 = vld [vmem:[#allocation2 + $0x78] sm:$0xff]  ;;  %v4358_v1 = vpop.permute.xlu0 %4357 }
 0x9ce   : > { %4704 = vmatprep.subr.msk.bf16.mxu1 %vm7479_vm6, %v4702_v24 }
 0x9cf   : > { %v4063_v18 = vld [vmem:[#allocation2 + $0x70] sm:$0xff] }
 0x9d0   : > { %v4705_v8 = vpack.c.bf16 %v4064_v40, %v4063_v18 }
 0x9d2   : > { %4707 = vmatpush3.bf16.xpose.msk.msra.mxu1 %vm7479_vm6, %v4705_v8 }
 0x9d3   : > { %4616 = vmatprep.subr.msk.mxu1 %vm626_vm8, %v7995_v20 }
 0x9d9   : > { %4659 = vmatmul.mubr.msk.f32.vlgmr.msra.gmra.mrb[64].mxu1 %vm622_vm9, %v7455_v39 }
 0x9da   : > { %4617 = vmatpush1.msk.msra.mxu1 %vm626_vm8, %v7996_v52  ;;  %4320 = vmatprep.mubr.f32.mxu1 %v7997_v12 }
 0x9e1   : > { %4618 = vmatmul.mubr.msk.f32.vlgmr.msra.gmra.mrb[64].mxu1 %vm622_vm9, %v4081_v54  ;;  %vm4364_vm9 = vcmask 1045504  }
 0xab4   : > { %v4322_v46 = vpop.f32.mrb[64].mxu1 }
 0xab5   : > { %v4333_v6 = vadd.f32 %v4331_v55, %v4322_v46  ;;  %v4324_v45 = vpop.f32.mrb[65].mxu1 }
 0xab6   : > { %v4334_v44 = vadd.f32 %v4331_v55, %v4324_v45 }
 0xab7   : > { %v4335_v49 = vmul.f32 %v4333_v6, %v4333_v6 }
 0xab8   : > { %v4336_v42 = vmul.f32 %v4334_v44, %v4334_v44 }
 0xab9   : > { %v4337_v57 = vmul.f32 %v4335_v49, %v4333_v6 }
 0xaba   : > { %v4338_v39 = vmul.f32 %v4336_v42, %v4334_v44 }
 0xabb   : > { %v4339_v27 = vmul.f32 0.044715, %v4337_v57 }
 0xabc   : > { %v4340_v38 = vmul.f32 0.044715, %v4338_v39 }
 0xabd   : > { %v4341_v28 = vadd.f32 %v4339_v27, %v4333_v6 }
 0xabe   : > { %v4342_v34 = vadd.f32 %v4340_v38, %v4334_v44 }
 0xabf   : > { %v4343_v9 = vmul.f32 0.7978846, %v4341_v28 }
 0xac0   : > { %v4344_v7 = vmul.f32 0.7978846, %v4342_v34 }
 0xac1   : > { %4771 = vtanh.f32 %v4343_v9 }
 0xac2   : > { %4773 = vtanh.f32 %v4344_v7 }
 0xacb   : > { %v4772_v33 = vpop.eup %4771 }
 0xacc   : > { %v4774_v62 = vpop.eup %4773  ;;  %v4347_v51 = vadd.f32 1.0, %v4772_v33 }
 0xacd   : > { %v4348_v5 = vadd.f32 1.0, %v4774_v62 }
 0xace   : > { %v4349_v15 = vmul.f32 0.5, %v4347_v51 }
 0xacf   : > { %v4350_v14 = vmul.f32 0.5, %v4348_v5 }
 0xad0   : > { %v4351_v32 = vmul.f32 %v4349_v15, %v4333_v6 }
 0xad1   : > { %v4352_v19 = vmul.f32 %v4350_v14, %v4334_v44 }
 0xad3   : > { %4619 = vmatprep.subr.msk.mxu0 %vm4364_vm9, %v4352_v19 }
 0xad4   : > { %4620 = vmatpush1.msk.msra.mxu0 %vm4364_vm9, %v4351_v32 }
 0xad5   : > { %4621 = vmatmul.mubr.msk.f32.vlgmr.msra.gmra.mrb[66].mxu0 %vm4360_vm2, %v4353_v17 }
 0xba8   : > { %v4437_v37 = vpop.f32.mrb[66].mxu0 }
 0xba9   : > { %v4438_v63 = vadd.f32 %v4437_v37, %v4358_v1  ;;  %v4439_v21 = vpop.f32.mrb[67].mxu0 }
 0xbaa   : > { %v4440_v2 = vadd.f32 %v4439_v21, %v4358_v1 }
 0xbab   : > { %v4443_v29 = vadd.f32 %v4438_v63, %v7998_v25 }
 0xbac   : > { %v4444_v11 = vadd.f32 %v4440_v2, %v7999_v22 }
 0xbad   : > { %v4445_v16 = vsel %vm626_vm8, %v4443_v29, 0.0 }
 0xbae   : > { %v4446_v58 = vsel %vm626_vm8, %v4444_v11, 0.0 }
 0xbaf   : > { %v4447_v60 = vadd.f32 %v4446_v58, %v4445_v16 }
 0xbb1   : > { %4448 = vadd.xlane.f32.xlu1 %v4447_v60 }
 0xc3e   : > { %v4449_v61 = vpop.xlane.xlu1 %4448 }
 0xc3f   : > { %v4451_v47 = vmul.f32 0.00390625, %v4449_v61 }
 0xc41   : > { %v4453_v10 = vmul.f32 %v4452_v36, %v4451_v47 }
 0xc43   : > { %v4454_v23 = vsel %vm626_vm8, %v4453_v10, 0.0 }
 0xc44   : > { %v4455_v35 = vrot.slane %v4454_v23, 4 }
 0xc46   : > { %v4456_v0 = vadd.f32 %v4455_v35, %v4454_v23 }
 0xc48   : > { %v4457_v53 = vrot.slane %v4456_v0, 2 }
 0xc4a   : > { %v4458_v31 = vadd.f32 %v4457_v53, %v4456_v0 }
 0xc4c   : > { %v4459_v26 = vrot.slane %v4458_v31, 1 }
 0xc4e   : > { %v4460_v41 = vadd.f32 %v4459_v26, %v4458_v31 }
 0xc50   : > { %v4462_v13 = vadd.f32 %v4461_v4, %v4460_v41 }
 0xc52   : > { %4463 = vst [vmem:[%s432_s21] sm:$0x1] %v4462_v13 }
 0xc53   : > { %4788 = shalt.err (!%p4785_p3)
}
 0xc54   : > { %s4789_s16 = scalar_lea.hbm %s7586_s30, 16  ;;  %s4793_s23 = scalar_lea.hbm %s7641_s13, 32 }
 0xc55   : > { %p4790_p4 = scmp.ne.s32.totalorder %s7586_s30, %s4789_s16  ;;  %p4794_p9 = scmp.lt.u32.totalorder %s7586_s30, %s7641_s13 }
 0xc56   : > { %p4795_p10 = scmp.lt.u32.totalorder %s4793_s23, %s4789_s16  ;;  %p4797_p12 = scmp.lt.u32.totalorder %s4789_s16, %s7586_s30 }
 0xc57   : > { %p4791_p7 = pnand %p4790_p4, %p4959_p5 }
 0xc58   : > { %p4796_p11 = por %p4795_p10, %p4794_p9 }
 0xc59   : > { %p4792_p8 = pneg %p4791_p7 }
 0xc5a   : > { %p4798_p13 = por %p4797_p12, %p4796_p11 }
 0xc5c   : > { %p4799_p0 = pnand %p4798_p13, %p4792_p8 }
 0xc5e   : > { %4802 = shalt.err (!%p4799_p0)
}
 0xc5f   : > { %4710 = dma.vmem_to_hbm [thread:$0]  (%p4959_p5), %s7588_s22, 16, %s7586_s30, %s4465_s15  }
 0xc60 PF: > { %p4716_p1 = scmp.ge.s32.totalorder %s4837_s28, 2  ;;  %s4489_s2 = sand.u32 1, %s4825_s25  }
 0xc61   : > { %s4490_s20 = scalar_lea.sflag [#allocation4], %s4489_s2 }
 0xc62   : > { %p4713_p2 = pnand %p4716_p1, %p4963_p6 }
 0xc64   : > { %4820 = dma.done.wait (!%p4713_p2), %s4490_s20, 16  }
 0xc65   : > { %4822 = vsyncadd (!%p4713_p2), %s4490_s20, 4294967280  ;;  %p23_p3 = scmp.ge.s32.totalorder %s4946_s14, 4   ;;  %s8000_s25 = smov %s4829_s26 }
 0xc66   : > { %s8001_s26 = smov %s4833_s27  ;;  %s8002_s27 = smov %s4957_s17 }
 0xc67   : > { %s8003_s28 = smov %s4946_s14  ;;  %25 = sbr.rel (!%p23_p3) target bundleno = 7 (0x7), region = 115 }
 0xc6e   :  { %4494 = vsyncpa [#allocation4], 1 }
 0xc6f   :  { %4496 = vsyncpa [#allocation4 + $0x1], 1 }

</bundles_post_ra>
